<compile_context>
chip_gen: v6e
topology: v6e:2x2x1
jax: 0.10.0
libtpu: 0.0.40
codegen_flags: <defaults>
</compile_context>

<pallas_src>
import math

import jax
import jax.numpy as jnp
from jax.experimental import pallas as pl
from jax.experimental.pallas import tpu as pltpu

# ---- synthetic "cfg" (deterministic, in-script) --------------------------------
NUM_CLASSES = 8          # cfg.MODEL.NUM_CLASSES
CLS_AGNOSTIC = False     # cfg.MODEL.CLS_AGNOSTIC_BBOX_REG
IOU_HELPER = True        # cfg.CASCADE_RCNN.IOU_HELPER
NUM_STAGE = 3            # cfg.CASCADE_RCNN.NUM_STAGE
IOU_HIDDEN = 1024        # fixed by the module

NUM_BOX_OUT = 4 * 2 if CLS_AGNOSTIC else 4 * NUM_CLASSES
HEAD_PAD = 128           # lane-dense slab: [cls (8) | bbox (32) | zero-pad]
IOU_PAD = 128            # lane-dense slab: [iou (2) | zero-pad]


def _round_up(x, m):
    return (x + m - 1) // m * m


def _cdiv(a, b):
    return -(-a // b)


def _choose_tm(n):
    """ROI-tile rows. Ensure >=2 grid steps when N>16 (v7x megacore) and cap at
    256 rows (v6e/v7x 256x256 MXU; v5e's 4x128^2 is also fine)."""
    if n <= 16:
        return _round_up(max(n, 1), 8)
    return min(256, _round_up(_cdiv(n, 2), 8))


# ---------------------------------------------------------------------------------
# Kernels (input is the already-pooled (TM, C) feature tile)
# ---------------------------------------------------------------------------------
def _box_head_kernel(p_ref, wcb_ref, bcb_ref, head_ref):
    # Fused cls+bbox head: one lane-dense (TM, 128) matmul + unmasked store.
    head_ref[...] = (jnp.dot(p_ref[...], wcb_ref[...],
                             preferred_element_type=jnp.float32) + bcb_ref[...])


def _box_head_iou_kernel(p_ref, wcb_ref, bcb_ref,
                         w1_ref, b1_ref, w2_ref, b2_ref, wi_ref, bi_ref,
                         head_ref, iou_ref):
    pooled = p_ref[...]                                                # (TM, C) f32

    # Fused cls+bbox head: f32 LHS/RHS keeps the reference 1e-4 tolerance.
    head_ref[...] = (jnp.dot(pooled, wcb_ref[...],
                             preferred_element_type=jnp.float32) + bcb_ref[...])

    # IoU helper branch: bf16 weights / activations, f32 accumulation on MXU.
    pb = pooled.astype(jnp.bfloat16)
    h = jnp.dot(pb, w1_ref[...], preferred_element_type=jnp.float32) + b1_ref[...]
    h = jnp.maximum(h, 0.0).astype(jnp.bfloat16)
    h = jnp.dot(h, w2_ref[...], preferred_element_type=jnp.float32) + b2_ref[...]
    h = jnp.maximum(h, 0.0).astype(jnp.bfloat16)
    iou_ref[...] = (jnp.dot(h, wi_ref[...],
                            preferred_element_type=jnp.float32) + bi_ref[...])


# ---------------------------------------------------------------------------------
# Wrapper
# ---------------------------------------------------------------------------------
def box_output_forward(x, packed, stage):
    """x: (N, C, H, W) f32 (or already-pooled (N, C)).
    Returns (cls_score, bbox_pred, iou_logits|None)."""
    iou_active = IOU_HELPER and stage == NUM_STAGE - 1

    # Global average pool in XLA (reads x exactly once from HBM); the kernel
    # only sees the pooled (N, C) features -> no NCHW->NHWC copy, no x stream.
    if x.ndim == 4:
        pooled = jnp.mean(x, axis=(2, 3))
    else:
        pooled = x
    N, C = pooled.shape

    TM = _choose_tm(N)
    N_pad = _round_up(N, TM)
    if N_pad != N:
        pooled = jnp.pad(pooled, ((0, N_pad - N), (0, 0)))
    grid = (N_pad // TM,)

    p_spec = pl.BlockSpec((TM, C), lambda i: (i, 0))

    def resident(arr):
        # Whole-array block with a constant index -> DMA'd once, stays in VMEM
        # across all ROI tiles.
        return pl.BlockSpec(arr.shape, lambda i, _nd=arr.ndim: (0,) * _nd)

    weight_names = ["wcb", "bcb"]
    if iou_active:
        weight_names += ["w1", "b1", "w2", "b2", "wi", "bi"]

    inputs = [pooled] + [packed[k] for k in weight_names]
    in_specs = [p_spec] + [resident(packed[k]) for k in weight_names]

    out_shapes = [jax.ShapeDtypeStruct((N_pad, HEAD_PAD), jnp.float32)]
    out_specs = [pl.BlockSpec((TM, HEAD_PAD), lambda i: (i, 0))]
    kernel = _box_head_kernel
    if iou_active:
        kernel = _box_head_iou_kernel
        out_shapes.append(jax.ShapeDtypeStruct((N_pad, IOU_PAD), jnp.float32))
        out_specs.append(pl.BlockSpec((TM, IOU_PAD), lambda i: (i, 0)))

    # Advisory cost estimate: weights counted once (resident), pooled input only.
    flops = 2 * N_pad * C * HEAD_PAD
    if iou_active:
        flops += 2 * N_pad * (C * IOU_HIDDEN
                              + IOU_HIDDEN * IOU_HIDDEN
                              + IOU_HIDDEN * IOU_PAD)
    weight_bytes = sum(int(packed[k].size) * packed[k].dtype.itemsize
                       for k in weight_names)
    bytes_accessed = (N_pad * C * 4
                      + weight_bytes
                      + sum(math.prod(s.shape) * s.dtype.itemsize for s in out_shapes))
    cost = pl.CostEstimate(flops=flops, transcendentals=0,
                           bytes_accessed=bytes_accessed)

    # VMEM budget: double-buffered tiles + resident weights (+ headroom),
    # clamped to [16 MiB, 64 MiB] so it works on v5e (16 MiB default scoped)
    # through v7x (64 MiB physical per TC).
    tile_bytes = TM * C * 4 + sum(TM * 128 * 4 for _ in out_shapes)
    vmem_limit = max(16 << 20,
                     min(64 << 20, 2 * (tile_bytes + weight_bytes) + (4 << 20)))

    outs = pl.pallas_call(
        kernel,
        out_shape=tuple(out_shapes),
        grid=grid,
        in_specs=in_specs,
        out_specs=tuple(out_specs),
        compiler_params=pltpu.CompilerParams(
            dimension_semantics=("parallel",),   # v7x: split ROI tiles over 2 TCs
            vmem_limit_bytes=int(vmem_limit)),
        cost_estimate=cost,
    )(*inputs)

    head = outs[0]
    cls_score = head[:N, :NUM_CLASSES]
    bbox_pred = head[:N, NUM_CLASSES:NUM_CLASSES + NUM_BOX_OUT]
    iou_logits = outs[1][:N, :2] if iou_active else None
    return cls_score, bbox_pred, iou_logits


# ---------------------------------------------------------------------------------
# Parameters
# ---------------------------------------------------------------------------------
def init_params(key, dim_in):
    """Raw params mirroring the PyTorch module (weights stored transposed (in, out))."""
    ks = jax.random.split(key, 5)

    def linear_default(k, fan_in, fan_out):
        bound = 1.0 / float(fan_in) ** 0.5
        return jax.random.uniform(k, (fan_in, fan_out), jnp.float32, -bound, bound)

    return {
        "wc": 0.01 * jax.random.normal(ks[0], (dim_in, NUM_CLASSES), jnp.float32),
        "bc": jnp.zeros((NUM_CLASSES,), jnp.float32),
        "wb": 0.001 * jax.random.normal(ks[1], (dim_in, NUM_BOX_OUT), jnp.float32),
        "bb": jnp.zeros((NUM_BOX_OUT,), jnp.float32),
        "w1": linear_default(ks[2], dim_in, IOU_HIDDEN),
        "b1": jnp.zeros((IOU_HIDDEN,), jnp.float32),
        "w2": linear_default(ks[3], IOU_HIDDEN, IOU_HIDDEN),
        "b2": jnp.zeros((IOU_HIDDEN,), jnp.float32),
        "wi": 0.01 * jax.random.normal(ks[4], (IOU_HIDDEN, 2), jnp.float32),
        "bi": jnp.zeros((2,), jnp.float32),
    }


def pack_params(raw, dim_in):
    """Kernel-layout params: fused lane-dense cls|bbox slab + bf16 IoU weights."""
    wcb = jnp.zeros((dim_in, HEAD_PAD), jnp.float32)
    wcb = wcb.at[:, :NUM_CLASSES].set(raw["wc"])
    wcb = wcb.at[:, NUM_CLASSES:NUM_CLASSES + NUM_BOX_OUT].set(raw["wb"])
    bcb = jnp.zeros((1, HEAD_PAD), jnp.float32)
    bcb = bcb.at[0, :NUM_CLASSES].set(raw["bc"])
    bcb = bcb.at[0, NUM_CLASSES:NUM_CLASSES + NUM_BOX_OUT].set(raw["bb"])

    wi = jnp.zeros((IOU_HIDDEN, IOU_PAD), jnp.float32).at[:, :2].set(raw["wi"])
    bi = jnp.zeros((1, IOU_PAD), jnp.float32).at[0, :2].set(raw["bi"])

    return {
        "wcb": wcb,
        "bcb": bcb,
        # Big IoU weights in bf16: the IoU branch is weight-DMA dominated for
        # small N; MXU takes bf16 natively on v5e/v6e/v7x and accumulation
        # stays f32 inside the kernel.
        # TODO(synk): int8 weight-only for w1/w2 would help v5e/v6e further but
        # is NOT portable to v7x (no int MXU path there) — kept bf16.
        "w1": raw["w1"].astype(jnp.bfloat16),
        "b1": raw["b1"].reshape(1, IOU_HIDDEN),
        "w2": raw["w2"].astype(jnp.bfloat16),
        "b2": raw["b2"].reshape(1, IOU_HIDDEN),
        "wi": wi.astype(jnp.bfloat16),
        "bi": bi,
    }


# ---------------------------------------------------------------------------------
# Pure-JAX reference (mirrors the kernel's bf16 weight storage for the IoU branch)
# ---------------------------------------------------------------------------------
def reference_forward(x, raw, stage):
    f32 = jnp.float32
    pooled = jnp.mean(x, axis=(2, 3))
    cls = pooled @ raw["wc"] + raw["bc"]
    bbox = pooled @ raw["wb"] + raw["bb"]
    if IOU_HELPER and stage == NUM_STAGE - 1:
        # Accepted numerical deviation from the f32 PyTorch module: bf16
        # pooled/activations/weights with f32 accumulation.
        pb = pooled.astype(jnp.bfloat16).astype(f32)
        h = jax.nn.relu(pb @ raw["w1"].astype(jnp.bfloat16).astype(f32) + raw["b1"])
        h = h.astype(jnp.bfloat16).astype(f32)
        h = jax.nn.relu(h @ raw["w2"].astype(jnp.bfloat16).astype(f32) + raw["b2"])
        h = h.astype(jnp.bfloat16).astype(f32)
        iou = h @ raw["wi"].astype(jnp.bfloat16).astype(f32) + raw["bi"]
    else:
        iou = None
    return cls, bbox, iou


if __name__ == "__main__":
    key = jax.random.PRNGKey(0)
    k_x, k_p = jax.random.split(key)

    # Small ROI-head-like shapes; dim_in = C.  N=24 exercises row padding and a
    # multi-step grid (TM=16 -> grid=(2,)).
    N, C, H, W = 24, 64, 7, 7
    x = jax.random.normal(k_x, (N, C, H, W), jnp.float32)
    raw = init_params(k_p, C)
    packed = pack_params(raw, C)

    # Final cascade stage: IoU branch active inside the kernel.
    stage = NUM_STAGE - 1
    cls_score, bbox_pred, iou_logits = box_output_forward(x, packed, stage)
    jax.block_until_ready((cls_score, bbox_pred, iou_logits))

    r_cls, r_bbox, r_iou = reference_forward(x, raw, stage)
    assert jnp.allclose(cls_score, r_cls, atol=1e-4, rtol=1e-4)
    assert jnp.allclose(bbox_pred, r_bbox, atol=1e-4, rtol=1e-4)
    assert jnp.allclose(iou_logits, r_iou, atol=2e-3, rtol=1e-2)

    # Non-final cascade stage: IoU branch compiled out of the kernel entirely.
    cls0, bbox0, iou0 = box_output_forward(x, packed, stage=0)
    jax.block_until_ready((cls0, bbox0))
    assert iou0 is None
    assert jnp.allclose(cls0, r_cls, atol=1e-4, rtol=1e-4)
    assert jnp.allclose(bbox0, r_bbox, atol=1e-4, rtol=1e-4)

    print("KERNEL_OK")
</pallas_src>

<mosaic_0001>
module attributes {stable_mosaic.version = 11 : i64} {
  func.func @_box_head_iou_kernel(%arg0: i32, %arg1: memref<16x64xf32, #tpu.memory_space<vmem>>, %arg2: memref<64x128xf32, #tpu.memory_space<vmem>>, %arg3: memref<1x128xf32, #tpu.memory_space<vmem>>, %arg4: memref<64x1024xbf16, #tpu.memory_space<vmem>>, %arg5: memref<1x1024xf32, #tpu.memory_space<vmem>>, %arg6: memref<1024x1024xbf16, #tpu.memory_space<vmem>>, %arg7: memref<1x1024xf32, #tpu.memory_space<vmem>>, %arg8: memref<1024x128xbf16, #tpu.memory_space<vmem>>, %arg9: memref<1x128xf32, #tpu.memory_space<vmem>>, %arg10: memref<16x128xf32, #tpu.memory_space<vmem>>, %arg11: memref<16x128xf32, #tpu.memory_space<vmem>>) attributes {dimension_semantics = [#tpu.dimension_semantics<parallel>], iteration_bounds = array<i64: 2>, scalar_prefetch = 0 : i64, scratch_operands = 0 : i64, tpu.core_type = #tpu.core_type<tc>, window_params = [{transform_indices = @transform_0, window_bounds = array<i64: 16, 64>}, {pipeline_mode = #tpu.pipeline_mode<synchronous>, transform_indices = @transform_1, window_bounds = array<i64: 64, 128>}, {pipeline_mode = #tpu.pipeline_mode<synchronous>, transform_indices = @transform_2, window_bounds = array<i64: 1, 128>}, {pipeline_mode = #tpu.pipeline_mode<synchronous>, transform_indices = @transform_3, window_bounds = array<i64: 64, 1024>}, {pipeline_mode = #tpu.pipeline_mode<synchronous>, transform_indices = @transform_4, window_bounds = array<i64: 1, 1024>}, {pipeline_mode = #tpu.pipeline_mode<synchronous>, transform_indices = @transform_5, window_bounds = array<i64: 1024, 1024>}, {pipeline_mode = #tpu.pipeline_mode<synchronous>, transform_indices = @transform_6, window_bounds = array<i64: 1, 1024>}, {pipeline_mode = #tpu.pipeline_mode<synchronous>, transform_indices = @transform_7, window_bounds = array<i64: 1024, 128>}, {pipeline_mode = #tpu.pipeline_mode<synchronous>, transform_indices = @transform_8, window_bounds = array<i64: 1, 128>}, {transform_indices = @transform_9, window_bounds = array<i64: 16, 128>}, {transform_indices = @transform_10, window_bounds = array<i64: 16, 128>}]} {
    %c0 = arith.constant 0 : index
    %c0_0 = arith.constant 0 : index
    %0 = vector.load %arg1[%c0, %c0_0] : memref<16x64xf32, #tpu.memory_space<vmem>>, vector<16x64xf32>
    %c0_1 = arith.constant 0 : index
    %c0_2 = arith.constant 0 : index
    %1 = vector.load %arg2[%c0_1, %c0_2] : memref<64x128xf32, #tpu.memory_space<vmem>>, vector<64x128xf32>
    %cst = arith.constant dense<0.000000e+00> : vector<16x128xf32>
    %2 = tpu.matmul %0, %1, %cst {dimension_numbers = #tpu.dot_dimension_numbers<[1], [0], [0], [1], [0, 0, 1, 1], [], []>} : vector<16x64xf32>, vector<64x128xf32>, vector<16x128xf32> -> vector<16x128xf32>
    %c0_3 = arith.constant 0 : index
    %c0_4 = arith.constant 0 : index
    %3 = vector.load %arg3[%c0_3, %c0_4] : memref<1x128xf32, #tpu.memory_space<vmem>>, vector<1x128xf32>
    %4 = vector.broadcast %3 : vector<1x128xf32> to vector<16x128xf32>
    %5 = arith.addf %2, %4 : vector<16x128xf32>
    %c0_5 = arith.constant 0 : index
    %c0_6 = arith.constant 0 : index
    %6 = vector.load %arg10[%c0_5, %c0_6] : memref<16x128xf32, #tpu.memory_space<vmem>>, vector<16x128xf32>
    tpu.vector_store %arg10[%c0_5, %c0_6], %5 {strides = array<i32>} : memref<16x128xf32, #tpu.memory_space<vmem>>, vector<16x128xf32>,
    %7 = arith.truncf %0 : vector<16x64xf32> to vector<16x64xbf16>
    %c0_7 = arith.constant 0 : index
    %c0_8 = arith.constant 0 : index
    %8 = vector.load %arg4[%c0_7, %c0_8] : memref<64x1024xbf16, #tpu.memory_space<vmem>>, vector<64x1024xbf16>
    %cst_9 = arith.constant dense<0.000000e+00> : vector<16x1024xf32>
    %9 = tpu.matmul %7, %8, %cst_9 {dimension_numbers = #tpu.dot_dimension_numbers<[1], [0], [0], [1], [0, 0, 1, 1], [], []>} : vector<16x64xbf16>, vector<64x1024xbf16>, vector<16x1024xf32> -> vector<16x1024xf32>
    %c0_10 = arith.constant 0 : index
    %c0_11 = arith.constant 0 : index
    %10 = vector.load %arg5[%c0_10, %c0_11] : memref<1x1024xf32, #tpu.memory_space<vmem>>, vector<1x1024xf32>
    %11 = vector.broadcast %10 : vector<1x1024xf32> to vector<16x1024xf32>
    %12 = arith.addf %9, %11 : vector<16x1024xf32>
    %cst_12 = arith.constant 0.000000e+00 : f32
    %13 = vector.broadcast %cst_12 : f32 to vector<16x1024xf32>
    %14 = arith.maximumf %12, %13 : vector<16x1024xf32>
    %15 = arith.truncf %14 : vector<16x1024xf32> to vector<16x1024xbf16>
    %c0_13 = arith.constant 0 : index
    %c0_14 = arith.constant 0 : index
    %16 = vector.load %arg6[%c0_13, %c0_14] : memref<1024x1024xbf16, #tpu.memory_space<vmem>>, vector<1024x1024xbf16>
    %cst_15 = arith.constant dense<0.000000e+00> : vector<16x1024xf32>
    %17 = tpu.matmul %15, %16, %cst_15 {dimension_numbers = #tpu.dot_dimension_numbers<[1], [0], [0], [1], [0, 0, 1, 1], [], []>} : vector<16x1024xbf16>, vector<1024x1024xbf16>, vector<16x1024xf32> -> vector<16x1024xf32>
    %c0_16 = arith.constant 0 : index
    %c0_17 = arith.constant 0 : index
    %18 = vector.load %arg7[%c0_16, %c0_17] : memref<1x1024xf32, #tpu.memory_space<vmem>>, vector<1x1024xf32>
    %19 = vector.broadcast %18 : vector<1x1024xf32> to vector<16x1024xf32>
    %20 = arith.addf %17, %19 : vector<16x1024xf32>
    %cst_18 = arith.constant 0.000000e+00 : f32
    %21 = vector.broadcast %cst_18 : f32 to vector<16x1024xf32>
    %22 = arith.maximumf %20, %21 : vector<16x1024xf32>
    %23 = arith.truncf %22 : vector<16x1024xf32> to vector<16x1024xbf16>
    %c0_19 = arith.constant 0 : index
    %c0_20 = arith.constant 0 : index
    %24 = vector.load %arg8[%c0_19, %c0_20] : memref<1024x128xbf16, #tpu.memory_space<vmem>>, vector<1024x128xbf16>
    %cst_21 = arith.constant dense<0.000000e+00> : vector<16x128xf32>
    %25 = tpu.matmul %23, %24, %cst_21 {dimension_numbers = #tpu.dot_dimension_numbers<[1], [0], [0], [1], [0, 0, 1, 1], [], []>} : vector<16x1024xbf16>, vector<1024x128xbf16>, vector<16x128xf32> -> vector<16x128xf32>
    %c0_22 = arith.constant 0 : index
    %c0_23 = arith.constant 0 : index
    %26 = vector.load %arg9[%c0_22, %c0_23] : memref<1x128xf32, #tpu.memory_space<vmem>>, vector<1x128xf32>
    %27 = vector.broadcast %26 : vector<1x128xf32> to vector<16x128xf32>
    %28 = arith.addf %25, %27 : vector<16x128xf32>
    %c0_24 = arith.constant 0 : index
    %c0_25 = arith.constant 0 : index
    %29 = vector.load %arg11[%c0_24, %c0_25] : memref<16x128xf32, #tpu.memory_space<vmem>>, vector<16x128xf32>
    tpu.vector_store %arg11[%c0_24, %c0_25], %28 {strides = array<i32>} : memref<16x128xf32, #tpu.memory_space<vmem>>, vector<16x128xf32>,
    return
  }
  func.func @transform_0(%arg0: i32) -> (i32, i32) {
    %c0_i32 = arith.constant 0 : i32
    %c0_i32_0 = arith.constant 0 : i32
    return %arg0, %c0_i32 : i32, i32
  }
  func.func @transform_1(%arg0: i32) -> (i32, i32) {
    %c0_i32 = arith.constant 0 : i32
    %c0_i32_0 = arith.constant 0 : i32
    %c0_i32_1 = arith.constant 0 : i32
    return %c0_i32, %c0_i32_0 : i32, i32
  }
  func.func @transform_2(%arg0: i32) -> (i32, i32) {
    %c0_i32 = arith.constant 0 : i32
    %c0_i32_0 = arith.constant 0 : i32
    %c0_i32_1 = arith.constant 0 : i32
    return %c0_i32, %c0_i32_0 : i32, i32
  }
  func.func @transform_3(%arg0: i32) -> (i32, i32) {
    %c0_i32 = arith.constant 0 : i32
    %c0_i32_0 = arith.constant 0 : i32
    %c0_i32_1 = arith.constant 0 : i32
    return %c0_i32, %c0_i32_0 : i32, i32
  }
  func.func @transform_4(%arg0: i32) -> (i32, i32) {
    %c0_i32 = arith.constant 0 : i32
    %c0_i32_0 = arith.constant 0 : i32
    %c0_i32_1 = arith.constant 0 : i32
    return %c0_i32, %c0_i32_0 : i32, i32
  }
  func.func @transform_5(%arg0: i32) -> (i32, i32) {
    %c0_i32 = arith.constant 0 : i32
    %c0_i32_0 = arith.constant 0 : i32
    %c0_i32_1 = arith.constant 0 : i32
    return %c0_i32, %c0_i32_0 : i32, i32
  }
  func.func @transform_6(%arg0: i32) -> (i32, i32) {
    %c0_i32 = arith.constant 0 : i32
    %c0_i32_0 = arith.constant 0 : i32
    %c0_i32_1 = arith.constant 0 : i32
    return %c0_i32, %c0_i32_0 : i32, i32
  }
  func.func @transform_7(%arg0: i32) -> (i32, i32) {
    %c0_i32 = arith.constant 0 : i32
    %c0_i32_0 = arith.constant 0 : i32
    %c0_i32_1 = arith.constant 0 : i32
    return %c0_i32, %c0_i32_0 : i32, i32
  }
  func.func @transform_8(%arg0: i32) -> (i32, i32) {
    %c0_i32 = arith.constant 0 : i32
    %c0_i32_0 = arith.constant 0 : i32
    %c0_i32_1 = arith.constant 0 : i32
    return %c0_i32, %c0_i32_0 : i32, i32
  }
  func.func @transform_9(%arg0: i32) -> (i32, i32) {
    %c0_i32 = arith.constant 0 : i32
    %c0_i32_0 = arith.constant 0 : i32
    return %arg0, %c0_i32 : i32, i32
  }
  func.func @transform_10(%arg0: i32) -> (i32, i32) {
    %c0_i32 = arith.constant 0 : i32
    %c0_i32_0 = arith.constant 0 : i32
    return %arg0, %c0_i32 : i32, i32
  }
}

</mosaic_0001>

<bundles_post_ra>
// kernel: tpu_custom_call.1
= control target key start
LH: loop header
LB: loop body
LE: loop exit
PB: predicated region body
PF: predicated region fallthrough
CT: control target
= control target key end

     0   :  { %s7715_s0 = inlined_call_operand.hbm [shape: f32[32,64], index: 0, kind: input, shape index: {}]   ;;  %s7716_s1 = inlined_call_operand.hbm [shape: f32[64,128], index: 1, kind: input, shape index: {}]   ;;  %s7717_s2 = inlined_call_operand.hbm [shape: f32[1,128], index: 2, kind: input, shape index: {}]   ;;  %s7718_s3 = inlined_call_operand.hbm [shape: bf16[64,1024], index: 3, kind: input, shape index: {}]   ;;  %s7719_s4 = inlined_call_operand.hbm [shape: f32[1,1024], index: 4, kind: input, shape index: {}]   ;;  %s7720_s5 = inlined_call_operand.hbm [shape: bf16[1024,1024], index: 5, kind: input, shape index: {}]   ;;  %s7721_s6 = inlined_call_operand.hbm [shape: f32[1,1024], index: 6, kind: input, shape index: {}]   ;;  %s7722_s7 = inlined_call_operand.hbm [shape: bf16[1024,128], index: 7, kind: input, shape index: {}]   ;;  %s7723_s8 = inlined_call_operand.hbm [shape: f32[1,128], index: 8, kind: input, shape index: {}]   ;;  %s7724_s9 = inlined_call_operand.hbm [shape: f32[32,128], index: 9, kind: output, shape index: {0}]   ;;  %s7725_s10 = inlined_call_operand.hbm [shape: f32[32,128], index: 10, kind: output, shape index: {1}]  }
   0x1   :  { %7732 = sst [smem:[#allocation27_spill]] %s7716_s1 }
   0x2   :  { %7733 = sst [smem:[#allocation28_spill]] %s7717_s2 }
   0x3   :  { %7734 = sst [smem:[#allocation29_spill]] %s7718_s3 }
   0x4   :  { %7735 = sst [smem:[#allocation30_spill]] %s7719_s4 }
   0x5   :  { %16 = vsyncpa [#allocation3], 0 }
   0x6   :  { %18 = vsyncpa [#allocation3 + $0x1], 0 }
   0x7   :  { %19 = vsyncpa [#allocation6], 0 }
   0x8   :  { %20 = vsyncpa [#allocation9], 0 }
   0x9   :  { %21 = vsyncpa [#allocation12], 0 }
   0xa   :  { %22 = vsyncpa [#allocation15], 0 }
   0xb   :  { %23 = vsyncpa [#allocation4], 0 }
   0xc   :  { %25 = vsyncpa [#allocation4 + $0x1], 0 }
   0xd   :  { %26 = vsyncpa [#allocation19], 0 }
   0xe   :  { %28 = vsyncpa [#allocation19 + $0x1], 0  ;;  %s7161_s13 = smov 0   ;;  %s7163_s14 = smov 0  }
   0xf   :  { %s7165_s15 = smov 0   ;;  %s7167_s16 = smov 0  }
  0x10 LB: > { %s7086_s17 = smov [#allocation5]   ;;  %s7182_s19 = sadd.s32 4294967295, %s7084_s16   ;;  %s7084_s16 = sphi %s7167_s16, %s7767_s16   ;;  %s7080_s15 = sphi %s7165_s15, %s7766_s15   ;;  %s7076_s14 = sphi %s7163_s14, %s7765_s14   ;;  %s7072_s13 = sphi %s7161_s13, %s7764_s13  }
  0x11   : > { %s297_s18 = sshll.u32 %s7086_s17, 4  ;;  %p5764_p0 = scmp.ge.s32.totalorder %s7084_s16, 1  ;;  %s298_s18 = int_to_ptr.vmem [resolvable:$true] %s297_s18 }
  0x12   : > { %p7727_p1 = scmp.eq.s32.totalorder %s7182_s19, 0  ;;  %p285_p2 = scmp.lt.s32.totalorder %s7084_s16, 3 }
  0x13   : > { %s7087_s21 = smov [#allocation8]   ;;  %s7088_s24 = smov [#allocation11]  }
  0x14   : > { %p7187_p3 = pnand %p5764_p0, %p285_p2  ;;  %s321_s22 = sshll.u32 %s7087_s21, 4  ;;  %s7200_s22 = int_to_ptr.vmem [resolvable:$true] %s321_s22 }
  0x15   : > { %s7202_s25 = sshll.u32 %s7088_s24, 4  ;;  %s6749_s27 = scalar_lea.vmem %s298_s18, 1024  ;;  %s346_s25 = int_to_ptr.vmem [resolvable:$true] %s7202_s25 }
  0x16   : > { %s7736_s20 = scalar_select %p7187_p3, 1, 0 }
  0x17   : > { %p6571_p5 = pneg %p7187_p3  ;;  %p6750_p8 = scmp.ne.s32.totalorder %s298_s18, %s6749_s27 }
  0x18   : > { %p6757_p11 = scmp.lt.s32.totalorder %s298_s18, %s298_s18  ;;  %p6758_p12 = scmp.lt.s32.totalorder %s6749_s27, %s6749_s27 }
  0x19   : > { %p7196_p6 = pnand %p6571_p5, %p7727_p1 }
  0x1a   : > { %p6759_p13 = por %p6758_p12, %p6757_p11 }
  0x1b   : > { %p7206_p7 = pneg %p7196_p6 }
  0x1d   : > { %p6752_p9 = pnand %p6750_p8, %p7206_p7 }
  0x1f   : > { %p6753_p10 = pneg %p6752_p9 }
  0x21   : > { %p6760_p0 = pnand %p6759_p13, %p6753_p10 }
  0x23   : > { %6763 = shalt.err (!%p6760_p0)
}
  0x24   : > { %s7726_s28 = smov 128   ;;  %s7729_s29 = smov 8  }
  0x25   : > { %s7739_s1 = sld [smem:[#allocation27_spill]]  ;;  %s6775_s12 = scalar_lea.vmem %s7200_s22, 4096 }
  0x26   : > { %p6776_p2 = scmp.ne.s32.totalorder %s7200_s22, %s6775_s12  ;;  %p6783_p9 = scmp.lt.s32.totalorder %s7200_s22, %s7200_s22 }
  0x27   : > { %p6784_p10 = scmp.lt.s32.totalorder %s6775_s12, %s6775_s12 }
  0x28   : > { %p6778_p5 = pnand %p6776_p2, %p7206_p7 }
  0x29   : > { %p6785_p11 = por %p6784_p10, %p6783_p9 }
  0x2a   : > { %p6779_p8 = pneg %p6778_p5 }
  0x2b   : > { %6574 = dma.hbm_to_vmem [thread:$0]  (!%p7196_p6), %s7739_s1, 1024, %s298_s18, [#allocation6], %s7726_s28, %s7726_s28, %s7729_s29  }
  0x2c   : > { %p6786_p12 = pnand %p6785_p11, %p6779_p8 }
  0x2e   : > { %6789 = shalt.err (!%p6786_p12)
}
  0x2f   : > { %s7091_s17 = smov 512   ;;  %s7092_s21 = smov 32  }
  0x30   : > { %s7740_s3 = sld [smem:[#allocation29_spill]]  ;;  %s6801_s27 = scalar_lea.vmem %s346_s25, 65536 }
  0x31   : > { %p6802_p13 = scmp.ne.s32.totalorder %s346_s25, %s6801_s27  ;;  %p6809_p5 = scmp.lt.s32.totalorder %s346_s25, %s346_s25 }
  0x32   : > { %p6810_p8 = scmp.lt.s32.totalorder %s6801_s27, %s6801_s27 }
  0x33   : > { %p6804_p0 = pnand %p6802_p13, %p7206_p7 }
  0x34   : > { %p6811_p9 = por %p6810_p8, %p6809_p5 }
  0x35   : > { %p6805_p2 = pneg %p6804_p0 }
  0x36   : > { %6580 = dma.hbm_to_vmem [thread:$0]  (!%p7196_p6), %s7740_s3, 4096, %s7200_s22, [#allocation9], %s7091_s17, %s7091_s17, %s7092_s21  }
  0x37   : > { %p6812_p10 = pnand %p6811_p9, %p6805_p2 }
  0x39   : > { %6815 = shalt.err (!%p6812_p10)
}
  0x3a   : > { %6586 = dma.hbm_to_vmem [thread:$0]  (!%p7196_p6), %s7720_s5, 65536, %s346_s25, [#allocation12], %s7091_s17, %s7091_s17, %s7092_s21  }
  0x3b   : > { %s7093_s12 = smov [#allocation14]  }
  0x3c   : > { %s369_s22 = sshll.u32 %s7093_s12, 4  ;;  %s370_s22 = int_to_ptr.vmem [resolvable:$true] %s369_s22 }
  0x3d   : > { %s6827_s24 = scalar_lea.vmem %s370_s22, 8192  ;;  %p6835_p0 = scmp.lt.s32.totalorder %s370_s22, %s370_s22 }
  0x3e   : > { %p6828_p11 = scmp.ne.s32.totalorder %s370_s22, %s6827_s24  ;;  %p6836_p4 = scmp.lt.s32.totalorder %s6827_s24, %s6827_s24 }
  0x40   : > { %p6830_p12 = pnand %p6828_p11, %p7206_p7  ;;  %p6837_p5 = por %p6836_p4, %p6835_p0 }
  0x42   : > { %p6831_p13 = pneg %p6830_p12 }
  0x44   : > { %p6838_p2 = pnand %p6837_p5, %p6831_p13 }
  0x46   : > { %6841 = shalt.err (!%p6838_p2)
}
  0x47   : > { %s7094_s18 = smov 64   ;;  %s7095_s27 = smov 4  }
  0x48   : > { %6592 = dma.hbm_to_vmem [thread:$0]  (!%p7196_p6), %s7722_s7, 8192, %s370_s22, [#allocation15], %s7094_s18, %s7094_s18, %s7095_s27  }
  0x49   : > { %s7096_s17 = smov [#allocation7]   ;;  %s7097_s11 = smov [#allocation10]  }
  0x4a   : > { %s311_s21 = sshll.u32 %s7096_s17, 4  ;;  %s335_s12 = sshll.u32 %s7097_s11, 4  ;;  %s312_s21 = int_to_ptr.vmem [resolvable:$true] %s311_s21  ;;  %s336_s12 = int_to_ptr.vmem [resolvable:$true] %s335_s12 }
  0x4b   : > { %s6853_s28 = scalar_lea.vmem %s312_s21, 16  ;;  %s6860_s24 = scalar_lea.vmem %s312_s21, 32 }
  0x4c   : > { %p6854_p8 = scmp.ne.s32.totalorder %s312_s21, %s6853_s28  ;;  %p6861_p10 = scmp.lt.s32.totalorder %s312_s21, %s312_s21 }
  0x4d   : > { %p6862_p11 = scmp.lt.s32.totalorder %s6860_s24, %s6853_s28 }
  0x4e   : > { %p6856_p4 = pnand %p6854_p8, %p7206_p7 }
  0x4f   : > { %p6863_p12 = por %p6862_p11, %p6861_p10 }
  0x50   : > { %p6857_p9 = pneg %p6856_p4 }
  0x52   : > { %p6864_p13 = pnand %p6863_p12, %p6857_p9 }
  0x54   : > { %6867 = shalt.err (!%p6864_p13)
}
  0x55   : > { %s7741_s2 = sld [smem:[#allocation28_spill]]  ;;  %s6879_s27 = scalar_lea.vmem %s336_s12, 128 }
  0x56   : > { %p6880_p0 = scmp.ne.s32.totalorder %s336_s12, %s6879_s27  ;;  %p6887_p8 = scmp.lt.s32.totalorder %s336_s12, %s336_s12 }
  0x57   : > { %p6888_p4 = scmp.lt.s32.totalorder %s6879_s27, %s6879_s27 }
  0x58   : > { %p6882_p5 = pnand %p6880_p0, %p7206_p7 }
  0x59   : > { %p6889_p1 = por %p6888_p4, %p6887_p8 }
  0x5a   : > { %p6883_p2 = pneg %p6882_p5 }
  0x5b   : > { %6577 = dma.hbm_to_vmem [thread:$0]  (!%p7196_p6), %s7741_s2, 16, %s312_s21, [#allocation6]  }
  0x5c   : > { %p6890_p3 = pnand %p6889_p1, %p6883_p2 }
  0x5e   : > { %6893 = shalt.err (!%p6890_p3)
}
  0x5f   : > { %s7742_s4 = sld [smem:[#allocation30_spill]]  ;;  %s7098_s25 = smov [#allocation13]  }
  0x60   : > { %s359_s17 = sshll.u32 %s7098_s25, 4  ;;  %s7099_s21 = smov [#allocation16]   ;;  %s360_s17 = int_to_ptr.vmem [resolvable:$true] %s359_s17 }
  0x61   : > { %s383_s11 = sshll.u32 %s7099_s21, 4  ;;  %s6905_s24 = scalar_lea.vmem %s360_s17, 128  ;;  %s384_s11 = int_to_ptr.vmem [resolvable:$true] %s383_s11 }
  0x62   : > { %p6906_p9 = scmp.ne.s32.totalorder %s360_s17, %s6905_s24  ;;  %p6913_p1 = scmp.lt.s32.totalorder %s360_s17, %s360_s17 }
  0x63   : > { %p6914_p3 = scmp.lt.s32.totalorder %s6905_s24, %s6905_s24 }
  0x64   : > { %p6908_p10 = pnand %p6906_p9, %p7206_p7 }
  0x65   : > { %6583 = dma.hbm_to_vmem [thread:$0]  (!%p7196_p6), %s7742_s4, 128, %s336_s12, [#allocation9]  }
  0x66   : > { %p6909_p11 = pneg %p6908_p10  ;;  %p6915_p12 = por %p6914_p3, %p6913_p1 }
  0x68   : > { %p6916_p13 = pnand %p6915_p12, %p6909_p11 }
  0x6a   : > { %6919 = shalt.err (!%p6916_p13)
}
  0x6b   : > { %6589 = dma.hbm_to_vmem [thread:$0]  (!%p7196_p6), %s7721_s6, 128, %s360_s17, [#allocation12]  }
  0x6c   : > { %s6931_s18 = scalar_lea.vmem %s384_s11, 16  ;;  %s6938_s27 = scalar_lea.vmem %s384_s11, 32 }
  0x6d   : > { %p6932_p0 = scmp.ne.s32.totalorder %s384_s11, %s6931_s18  ;;  %p6939_p8 = scmp.lt.s32.totalorder %s384_s11, %s384_s11 }
  0x6e   : > { %p6940_p4 = scmp.lt.s32.totalorder %s6938_s27, %s6931_s18 }
  0x6f   : > { %p6934_p5 = pnand %p6932_p0, %p7206_p7 }
  0x70   : > { %p6941_p9 = por %p6940_p4, %p6939_p8 }
  0x71   : > { %p6935_p2 = pneg %p6934_p5 }
  0x73   : > { %p6942_p10 = pnand %p6941_p9, %p6935_p2 }
  0x75   : > { %6945 = shalt.err (!%p6942_p10)
}
  0x76   : > { %6595 = dma.hbm_to_vmem [thread:$0]  (!%p7196_p6), %s7723_s8, 16, %s384_s11, [#allocation15]  }
  0x77   : > { %s5763_s26 = sadd.s32 4294967294, %s7084_s16   ;;  %s7277_s23 = sadd.s32 1, %s7084_s16  }
  0x78   : > { %s38_s25 = ssub.s32 %s7084_s16, %s7277_s23  ;;  %s41_s17 = sadd.s32 1, %s7080_s15 }
  0x79   : > { %p39_p7 = scmp.eq.s32.totalorder %s38_s25, 0  ;;  %p48_p11 = scmp.ne.s32.totalorder %s7080_s15, %s7076_s14 }
  0x7a   : > { %p49_p1 = scmp.eq.s32.totalorder %s7084_s16, 0  ;;  %p54_p3 = scmp.ne.s32.totalorder %s7076_s14, %s7072_s13 }
  0x7b   : > { %s7288_s21 = scalar_select %p39_p7, %s7080_s15, %s41_s17  }
  0x7c   : > { %p7290_p12 = por %p49_p1, %p48_p11  ;;  %p7744_p13 = scmp.eq.s32.totalorder %s7182_s19, 0 }
  0x7d   : > { %p246_p0 = scmp.eq.s32.totalorder %s7182_s19, 1  ;;  %p252_p5 = scmp.eq.s32.totalorder %s5763_s26, 1 }
  0x7e   : > { %p7296_p6 = por %p7744_p13, %p54_p3  ;;  %p6615_p2 = scmp.lt.s32.totalorder %s7084_s16, 2 }
  0x7f   : > { %s394_s22 = sand.u32 1, %s7080_s15   ;;  %p7303_p8 = por %p246_p0, %p48_p11 }
  0x80   : > { %s7745_s11 = scalar_select %p7296_p6, 1, 0 }
  0x81   : > { %s7746_s12 = scalar_select %p7303_p8, 1, 0 }
  0x82   : > { %p7307_p4 = por %p252_p5, %p54_p3  ;;  %s5774_s27 = sshll.u32 %s394_s22, 4 }
  0x83   : > { %s6413_s28 = sshll.u32 %s7084_s16, 8  ;;  %s398_s26 = scalar_lea.vmem [#allocation2], %s5774_s27 }
  0x84   : > { %s7747_s18 = scalar_select %p7307_p4, 1, 0 }
  0x85   : > { %s7315_s17 = scalar_lea.hbm %s7715_s0, %s6413_s28  ;;  %s405_s29 = sshll.u32 %s398_s26, 4  ;;  %s7317_s29 = int_to_ptr.vmem [resolvable:$true] %s405_s29 }
  0x86   : > { %p7321_p9 = pnand %p6615_p2, %p7290_p12  ;;  %s7325_s2 = scalar_lea.sflag [#allocation3], %s394_s22 }
  0x87   : > { %s6946_s3 = scalar_lea.hbm %s7315_s17, 256  ;;  %s6951_s27 = scalar_lea.hbm %s7715_s0, 512 }
  0x88   : > { %p6947_p10 = scmp.ne.s32.totalorder %s7315_s17, %s6946_s3  ;;  %p6948_p7 = pneg %p7321_p9 }
  0x89   : > { %p6952_p3 = scmp.lt.s32.totalorder %s7315_s17, %s7715_s0  ;;  %p6953_p12 = scmp.lt.s32.totalorder %s6951_s27, %s6946_s3 }
  0x8a   : > { %p6949_p11 = pnand %p6948_p7, %p6947_p10 }
  0x8b   : > { %p6954_p13 = por %p6953_p12, %p6952_p3 }
  0x8c   : > { %p6950_p1 = pneg %p6949_p11 }
  0x8e   : > { %p6955_p0 = pnand %p6954_p13, %p6950_p1 }
  0x90   : > { %6958 = shalt.err (!%p6955_p0)
}
  0x91   : > { %s6959_s24 = scalar_lea.vmem %s7317_s29, 256  ;;  %s7100_s22 = smov [#allocation2]  }
  0x92   : > { %p6960_p5 = scmp.ne.s32.totalorder %s7317_s29, %s6959_s24  ;;  %s6964_s4 = sshll.u32 %s7100_s22, 4  ;;  %s6965_s4 = int_to_ptr.vmem [resolvable:$false] %s6964_s4 }
  0x93   : > { %s6966_s28 = scalar_lea.vmem %s6965_s4, 512  ;;  %p6967_p11 = scmp.lt.s32.totalorder %s7317_s29, %s6965_s4 }
  0x94   : > { %p6962_p2 = pnand %p6960_p5, %p6948_p7  ;;  %p6968_p4 = scmp.lt.s32.totalorder %s6966_s28, %s6959_s24 }
  0x96   : > { %p6963_p10 = pneg %p6962_p2  ;;  %p6969_p8 = por %p6968_p4, %p6967_p11 }
  0x98   : > { %p6970_p6 = pnand %p6969_p8, %p6963_p10 }
  0x9a   : > { %6973 = shalt.err (!%p6970_p6)
}
  0x9b   : > { %s7749_s3 = smov 8   ;;  %s7750_s30 = smov 128  }
  0x9c   : > { %6599 = dma.hbm_to_vmem [thread:$0]  (!%p7321_p9), %s7315_s17, 256, %s7317_s29, %s7325_s2, %s7750_s30, %s7750_s30, %s7749_s3  }
  0x9d   : > { %p7751_p7 = scmp.ne.s32.totalorder %s7736_s20, 0 }
  0x9e   : > { %s7352_s27 = sand.u32 (!%p7751_p7), 1, %s7076_s14   ;;  %p7752_p6 = scmp.ne.s32.totalorder (!%p7751_p7), %s7745_s11, 0 }
  0x9f   : > { %417 = sbr.rel (%p7751_p7) target bundleno = 1288 (0x508), region = 56  ;;  %s7355_s4 = sshll.u32 (!%p7751_p7), %s7352_s27, 4 }
  0xa0   : > { %s420_s1 = scalar_lea.sflag (!%p7751_p7), [#allocation3], %s7352_s27  ;;  %s423_s25 = scalar_lea.vmem (!%p7751_p7), [#allocation2], %s7355_s4 }
  0xa4   : > { %7043 = dma.done.wait (%p7752_p6), %s420_s1, 256  }
  0xa5   : > { %7045 = vsyncadd (%p7752_p6), %s420_s1, 4294967040  ;;  %p7753_p8 = scmp.eq.s32.totalorder %s7182_s19, 0 }
  0xa7   : > { %7047 = dma.done.wait (%p7753_p8), [#allocation6], 1040   ;;  %p7754_p4 = pmov %p7753_p8 }
  0xa9   : > { %7049 = vsyncadd (%p7754_p4), [#allocation6], 4294966256  ;;  %p7755_p9 = pmov %p7754_p4 }
  0xaa   : > { %p7756_p1 = pmov %p7754_p4 }
  0xab   : > { %7051 = dma.done.wait (%p7755_p9), [#allocation9], 4224  }
  0xac   : > { %7053 = vsyncadd (%p7756_p1), [#allocation9], 4294963072  ;;  %p7757_p3 = pmov %p7756_p1 }
  0xad   : > { %p7758_p12 = pmov %p7756_p1 }
  0xae   : > { %7055 = dma.done.wait (%p7757_p3), [#allocation12], 65664  }
  0xaf   : > { %7057 = vsyncadd (%p7758_p12), [#allocation12], 4294901632  ;;  %p7759_p13 = pmov %p7756_p1 }
  0xb0   : > { %p7760_p0 = pmov %p7756_p1 }
  0xb1   : > { %7059 = dma.done.wait (%p7759_p13), [#allocation15], 8208  }
  0xb2   : > { %7061 = vsyncadd (%p7760_p0), [#allocation15], 4294959088  ;;  %v7101_v0 = vmov 0   ;;  %v510_v1 = vld [vmem:[#allocation5 + $0x38] sm:$0xff]  ;;  %v509_v2 = vld [vmem:[#allocation5 + $0x30] sm:$0xff]  ;;  %vm518_vm0 = vcmask 523264  }
  0xb3   : > { %872 = vmatprep.mubr.bf16.mxu1 %v7101_v0  ;;  %v627_v3 = vld [vmem:[#allocation8 + $0xc0] sm:$0xff]  ;;  %6514 = vmatprep.subr.mxu0 %v510_v1  ;;  %v506_v16 = vld [vmem:[#allocation5 + $0x18] sm:$0xff]  ;;  %v505_v20 = vld [vmem:[#allocation5 + $0x10] sm:$0xff]  ;;  %s7428_s2 = scalar_lea.vmem [#allocation17], %s7355_s4  ;;  %s6414_s29 = sshll.u32 %s7182_s19, 8 }
  0xb4   : > { %v631_v4 = vld [vmem:[#allocation8 + $0xe0] sm:$0xff]  ;;  %6515 = vmatpush3.msra.mxu0 %v510_v1  ;;  %v628_v24 = vld [vmem:[#allocation8 + $0xc8] sm:$0xff]  ;;  %v629_v27 = vld [vmem:[#allocation8 + $0xd0] sm:$0xff]  ;;  %s5566_s20 = sshll.u32 %s7428_s2, 4  ;;  %s7635_s26 = scalar_lea.hbm %s7724_s9, %s6414_s29  ;;  %s7627_s20 = int_to_ptr.vmem [resolvable:$true] %s5566_s20 }
  0xb5   : > { %v5817_v5 = vcombine.high %v627_v3, %v631_v4  ;;  %v5816_v6 = vcombine.low %v627_v3, %v631_v4  ;;  %v508_v7 = vld [vmem:[#allocation5 + $0x28] sm:$0xff]  ;;  %6516 = vmatprep.subr.mxu0 %v509_v2  ;;  %v507_v13 = vld [vmem:[#allocation5 + $0x20] sm:$0xff]  ;;  %v633_v28 = vld [vmem:[#allocation8 + $0xf0] sm:$0xff]  ;;  %s5548_s24 = scalar_lea.sflag [#allocation4], %s7352_s27  ;;  %s6974_s22 = scalar_lea.vmem %s7627_s20, 256 }
  0xb6   : > { %v619_v8 = vld [vmem:[#allocation8 + $0x80] sm:$0xff]  ;;  %6517 = vmatpush3.msra.mxu0 %v509_v2  ;;  %v632_v25 = vld [vmem:[#allocation8 + $0xe8] sm:$0xff]  ;;  %v5821_v35 = vcombine.high %v629_v27, %v633_v28  ;;  %v621_v36 = vld [vmem:[#allocation8 + $0x90] sm:$0xff]  ;;  %v5820_v42 = vcombine.low %v629_v27, %v633_v28  ;;  %p6975_p5 = scmp.ne.s32.totalorder %s7627_s20, %s6974_s22  ;;  %p7761_p2 = scmp.ne.s32.totalorder %s7746_s12, 0 }
  0xb7   : > { %v623_v9 = vld [vmem:[#allocation8 + $0xa0] sm:$0xff]  ;;  %848 = vmatprep.subr.bf16.mxu1 %v5817_v5  ;;  %6518 = vmatprep.subr.mxu0 %v508_v7  ;;  %v620_v31 = vld [vmem:[#allocation8 + $0x88] sm:$0xff]  ;;  %v5819_v33 = vcombine.high %v628_v24, %v632_v25  ;;  %v5818_v34 = vcombine.low %v628_v24, %v632_v25  ;;  %v625_v37 = vld [vmem:[#allocation8 + $0xb0] sm:$0xff]  ;;  %s7102_s28 = smov [#allocation17]  }
  0xb8   : > { %v5809_v10 = vcombine.high %v619_v8, %v623_v9  ;;  %v611_v11 = vld [vmem:[#allocation8 + $0x40] sm:$0xff]  ;;  %849 = vmatpush1.bf16.msra.mxu1 %v5816_v6  ;;  %v5808_v14 = vcombine.low %v619_v8, %v623_v9  ;;  %6519 = vmatpush3.msra.mxu0 %v508_v7  ;;  %v624_v32 = vld [vmem:[#allocation8 + $0xa8] sm:$0xff]  ;;  %v5813_v43 = vcombine.high %v621_v36, %v625_v37  ;;  %v613_v45 = vld [vmem:[#allocation8 + $0x50] sm:$0xff]  ;;  %p6976_p10 = pnand %p6975_p5, %p7761_p2  ;;  %s6978_s3 = sshll.u32 %s7102_s28, 4  ;;  %s6979_s3 = int_to_ptr.vmem [resolvable:$false] %s6978_s3 }
  0xb9   : > { %v615_v12 = vld [vmem:[#allocation8 + $0x60] sm:$0xff]  ;;  %6520 = vmatprep.subr.mxu0 %v507_v13  ;;  %v5811_v39 = vcombine.high %v620_v31, %v624_v32  ;;  %v612_v40 = vld [vmem:[#allocation8 + $0x48] sm:$0xff]  ;;  %v5810_v44 = vcombine.low %v620_v31, %v624_v32  ;;  %v617_v46 = vld [vmem:[#allocation8 + $0x70] sm:$0xff]  ;;  %v5812_v50 = vcombine.low %v621_v36, %v625_v37  ;;  %s6980_s30 = scalar_lea.vmem %s6979_s3, 512  ;;  %p6981_p7 = scmp.lt.s32.totalorder %s7627_s20, %s6979_s3 }
  0xba   : > { %v501_v15 = vld [vmem:[%s423_s25] sm:$0xff]  ;;  %850 = vmatprep.subr.bf16.mxu1 %v5809_v10  ;;  %v5801_v17 = vcombine.high %v611_v11, %v615_v12  ;;  %6521 = vmatpush3.msra.mxu0 %v507_v13  ;;  %v5800_v21 = vcombine.low %v611_v11, %v615_v12  ;;  %v504_v22 = vld [vmem:[#allocation5 + $0x8] sm:$0xff]  ;;  %v5805_v51 = vcombine.high %v613_v45, %v617_v46  ;;  %p6977_p11 = pneg %p6976_p10  ;;  %p6982_p6 = scmp.lt.s32.totalorder %s6980_s30, %s6974_s22 }
  0xbb   : > { %v603_v18 = vld [vmem:[#allocation8] sm:$0xff]  ;;  %6530 = vmatprep.mubr.msk.f32.mxu0 %vm518_vm0, %v501_v15  ;;  %6522 = vmatprep.subr.mxu0 %v506_v16  ;;  %v616_v41 = vld [vmem:[#allocation8 + $0x68] sm:$0xff]  ;;  %v605_v53 = vld [vmem:[#allocation8 + $0x10] sm:$0xff]  ;;  %v5804_v56 = vcombine.low %v613_v45, %v617_v46 }
  0xbc   : > { %v607_v19 = vld [vmem:[#allocation8 + $0x20] sm:$0xff]  ;;  %851 = vmatpush1.bf16.msra.mxu1 %v5808_v14  ;;  %6523 = vmatpush3.msra.mxu0 %v506_v16  ;;  %v5803_v47 = vcombine.high %v612_v40, %v616_v41  ;;  %v604_v48 = vld [vmem:[#allocation8 + $0x8] sm:$0xff]  ;;  %v5802_v52 = vcombine.low %v612_v40, %v616_v41  ;;  %v609_v54 = vld [vmem:[#allocation8 + $0x30] sm:$0xff]  ;;  %p6983_p8 = por %p6982_p6, %p6981_p7 }
  0xbd   : > { %852 = vmatprep.subr.bf16.mxu1 %v5801_v17  ;;  %v5793_v23 = vcombine.high %v603_v18, %v607_v19  ;;  %6524 = vmatprep.subr.mxu0 %v505_v20  ;;  %v503_v26 = vld [vmem:[#allocation5] sm:$0xff]  ;;  %v502_v29 = vld [vmem:[%s423_s25 + $0x8] sm:$0xff]  ;;  %v5792_v30 = vcombine.low %v603_v18, %v607_v19  ;;  %v5797_v59 = vcombine.high %v605_v53, %v609_v54 }
  0xbe   : > { %6525 = vmatpush3.msra.mxu0 %v505_v20  ;;  %v7385_v38 = vpack.c.bf16 %v502_v29, %v501_v15  ;;  %v608_v49 = vld [vmem:[#allocation8 + $0x28] sm:$0xff]  ;;  %v630_v57 = vld [vmem:[#allocation8 + $0xd8] sm:$0xff]  ;;  %v5796_v3 = vcombine.low %v605_v53, %v609_v54  ;;  %p6984_p4 = pnand %p6983_p8, %p6977_p11 }
  0xbf   : > { %6526 = vmatprep.subr.mxu0 %v504_v22  ;;  %v5795_v55 = vcombine.high %v604_v48, %v608_v49  ;;  %v634_v58 = vld [vmem:[#allocation8 + $0xf8] sm:$0xff]  ;;  %v5794_v60 = vcombine.low %v604_v48, %v608_v49  ;;  %v1092_v61 = vld [vmem:[#allocation11 + $0x1c0] sm:$0xff] }
  0xc0   : > { %853 = vmatpush1.bf16.msra.mxu1 %v5800_v21  ;;  %6527 = vmatpush3.msra.mxu0 %v504_v22  ;;  %v1096_v62 = vld [vmem:[#allocation11 + $0x1e0] sm:$0xff]  ;;  %v5823_v63 = vcombine.high %v630_v57, %v634_v58  ;;  %v622_v1 = vld [vmem:[#allocation8 + $0x98] sm:$0xff]  ;;  %v5822_v7 = vcombine.low %v630_v57, %v634_v58 }
  0xc1   : > { %854 = vmatprep.subr.bf16.mxu1 %v5793_v23  ;;  %6528 = vmatprep.subr.mxu0 %v503_v26  ;;  %v626_v2 = vld [vmem:[#allocation8 + $0xb8] sm:$0xff]  ;;  %v1084_v4 = vld [vmem:[#allocation11 + $0x180] sm:$0xff]  ;;  %v5885_v6 = vcombine.high %v1092_v61, %v1096_v62  ;;  %v5884_v11 = vcombine.low %v1092_v61, %v1096_v62 }
  0xc2   : > { %6529 = vmatpush3.msra.mxu0 %v503_v26  ;;  %v1088_v5 = vld [vmem:[#allocation11 + $0x1a0] sm:$0xff]  ;;  %v614_v8 = vld [vmem:[#allocation8 + $0x58] sm:$0xff]  ;;  %v5815_v10 = vcombine.high %v622_v1, %v626_v2  ;;  %v5814_v15 = vcombine.low %v622_v1, %v626_v2 }
  0xc3   : > { %6531 = vmatmul.mubr.msk.f32.vlgmr.msra.gmra.mxu0 %vm518_vm0, %v502_v29  ;;  %891 = vmatprep.subr.bf16.mxu0 %v5819_v33  ;;  %v618_v9 = vld [vmem:[#allocation8 + $0x78] sm:$0xff]  ;;  %v1076_v12 = vld [vmem:[#allocation11 + $0x140] sm:$0xff]  ;;  %v5877_v14 = vcombine.high %v1084_v4, %v1088_v5  ;;  %v5876_v19 = vcombine.low %v1084_v4, %v1088_v5 }
  0xc4   : > { %855 = vmatpush1.bf16.msra.mxu1 %v5792_v30  ;;  %915 = vmatprep.mubr.bf16.mxu0 %v7101_v0  ;;  %v1080_v13 = vld [vmem:[#allocation11 + $0x160] sm:$0xff]  ;;  %v606_v16 = vld [vmem:[#allocation8 + $0x18] sm:$0xff]  ;;  %v5807_v18 = vcombine.high %v614_v8, %v618_v9  ;;  %v5806_v23 = vcombine.low %v614_v8, %v618_v9 }
  0xc5   : > { %892 = vmatpush1.bf16.msra.mxu0 %v5818_v34  ;;  %934 = vmatprep.subr.bf16.mxu1 %v5821_v35  ;;  %v610_v17 = vld [vmem:[#allocation8 + $0x38] sm:$0xff]  ;;  %v1068_v20 = vld [vmem:[#allocation11 + $0x100] sm:$0xff]  ;;  %v5869_v22 = vcombine.high %v1076_v12, %v1080_v13  ;;  %v5868_v27 = vcombine.low %v1076_v12, %v1080_v13 }
  0xc6   : > { %893 = vmatprep.subr.bf16.mxu0 %v5811_v39  ;;  %v1072_v21 = vld [vmem:[#allocation11 + $0x120] sm:$0xff]  ;;  %v5799_v26 = vcombine.high %v606_v16, %v610_v17  ;;  %v5798_v30 = vcombine.low %v606_v16, %v610_v17 }
  0xc7   : > { %5824 = vmatmul.mubr.msk.bf16.vlgmr.msra.gmra.mxu1 %vm518_vm0, %v7385_v38  ;;  %v1220_v24 = vld [vmem:[#allocation11 + $0x5c0] sm:$0xff]  ;;  %v5861_v29 = vcombine.high %v1068_v20, %v1072_v21  ;;  %v5860_v34 = vcombine.low %v1068_v20, %v1072_v21 }
  0xc8   : > { %935 = vmatpush1.bf16.msra.mxu1 %v5820_v42  ;;  %958 = vmatprep.mubr.bf16.mxu1 %v7101_v0  ;;  %v1224_v25 = vld [vmem:[#allocation11 + $0x5e0] sm:$0xff] }
  0xc9   : > { %936 = vmatprep.subr.bf16.mxu1 %v5813_v43  ;;  %894 = vmatpush1.bf16.msra.mxu0 %v5810_v44  ;;  %v1064_v28 = vld [vmem:[#allocation11 + $0xe0] sm:$0xff]  ;;  %v6013_v33 = vcombine.high %v1220_v24, %v1224_v25  ;;  %v6012_v39 = vcombine.low %v1220_v24, %v1224_v25 }
  0xca   : > { %895 = vmatprep.subr.bf16.mxu0 %v5803_v47  ;;  %v1212_v31 = vld [vmem:[#allocation11 + $0x580] sm:$0xff] }
  0xcb   : > { %v1216_v32 = vld [vmem:[#allocation11 + $0x5a0] sm:$0xff] }
  0xcc   : > { %937 = vmatpush1.bf16.msra.mxu1 %v5812_v50  ;;  %v1052_v35 = vld [vmem:[#allocation11 + $0x80] sm:$0xff]  ;;  %v6005_v42 = vcombine.high %v1212_v31, %v1216_v32  ;;  %v6004_v47 = vcombine.low %v1212_v31, %v1216_v32 }
  0xcd   : > { %938 = vmatprep.subr.bf16.mxu1 %v5805_v51  ;;  %896 = vmatpush1.bf16.msra.mxu0 %v5802_v52  ;;  %v1056_v36 = vld [vmem:[#allocation11 + $0xa0] sm:$0xff] }
  0xce   : > { %897 = vmatprep.subr.bf16.mxu0 %v5795_v55  ;;  %v1204_v40 = vld [vmem:[#allocation11 + $0x540] sm:$0xff]  ;;  %v5845_v46 = vcombine.high %v1052_v35, %v1056_v36  ;;  %v5844_v51 = vcombine.low %v1052_v35, %v1056_v36 }
  0xcf   : > { %v1208_v41 = vld [vmem:[#allocation11 + $0x560] sm:$0xff] }
  0xd0   : > { %939 = vmatpush1.bf16.msra.mxu1 %v5804_v56  ;;  %v1044_v44 = vld [vmem:[#allocation11 + $0x40] sm:$0xff]  ;;  %v5997_v50 = vcombine.high %v1204_v40, %v1208_v41  ;;  %v5996_v55 = vcombine.low %v1204_v40, %v1208_v41 }
  0xd1   : > { %940 = vmatprep.subr.bf16.mxu1 %v5797_v59  ;;  %898 = vmatpush1.bf16.msra.mxu0 %v5794_v60  ;;  %v1048_v45 = vld [vmem:[#allocation11 + $0x60] sm:$0xff] }
  0xd2   : > { %977 = vmatprep.subr.bf16.mxu0 %v5823_v63  ;;  %v1196_v48 = vld [vmem:[#allocation11 + $0x500] sm:$0xff]  ;;  %v5837_v54 = vcombine.high %v1044_v44, %v1048_v45  ;;  %v5836_v58 = vcombine.low %v1044_v44, %v1048_v45 }
  0xd3   : > { %v1200_v49 = vld [vmem:[#allocation11 + $0x520] sm:$0xff] }
  0xd4   : > { %941 = vmatpush1.bf16.msra.mxu1 %v5796_v3  ;;  %5825 = vmatmul.mubr.msk.bf16.vlgmr.msra.gmra.mxu0 %vm518_vm0, %v7385_v38  ;;  %v1036_v52 = vld [vmem:[#allocation11] sm:$0xff]  ;;  %v5988_v62 = vcombine.low %v1196_v48, %v1200_v49 }
  0xd5   : > { %4150 = vmatprep.subr.bf16.mxu1 %v5885_v6  ;;  %978 = vmatpush1.bf16.msra.mxu0 %v5822_v7  ;;  %v1040_v53 = vld [vmem:[#allocation11 + $0x20] sm:$0xff] }
  0xd6   : > { %1001 = vmatprep.mubr.bf16.mxu0 %v7101_v0  ;;  %979 = vmatprep.subr.bf16.mxu0 %v5815_v10  ;;  %v1060_v0 = vld [vmem:[#allocation11 + $0xc0] sm:$0xff]  ;;  %v5829_v61 = vcombine.high %v1036_v52, %v1040_v53  ;;  %v5828_v3 = vcombine.low %v1036_v52, %v1040_v53 }
  0xd7   : > { %5826 = vmatmul.mubr.msk.bf16.vlgmr.msra.gmra.mxu1 %vm518_vm0, %v7385_v38  ;;  %v5853_v37 = vcombine.high %v1060_v0, %v1064_v28  ;;  %v5852_v43 = vcombine.low %v1060_v0, %v1064_v28  ;;  %v1188_v56 = vld [vmem:[#allocation11 + $0x4c0] sm:$0xff] }
  0xd8   : > { %4151 = vmatpush1.bf16.msra.mxu1 %v5884_v11  ;;  %v1192_v57 = vld [vmem:[#allocation11 + $0x4e0] sm:$0xff] }
  0xd9   : > { %4152 = vmatprep.subr.bf16.mxu1 %v5877_v14  ;;  %980 = vmatpush1.bf16.msra.mxu0 %v5814_v15  ;;  %v1156_v59 = vld [vmem:[#allocation11 + $0x3c0] sm:$0xff]  ;;  %v5981_v2 = vcombine.high %v1188_v56, %v1192_v57  ;;  %v5980_v7 = vcombine.low %v1188_v56, %v1192_v57 }
  0xda   : > { %981 = vmatprep.subr.bf16.mxu0 %v5807_v18  ;;  %v1160_v60 = vld [vmem:[#allocation11 + $0x3e0] sm:$0xff] }
  0xdb   : > { %v1180_v63 = vld [vmem:[#allocation11 + $0x480] sm:$0xff]  ;;  %v5949_v6 = vcombine.high %v1156_v59, %v1160_v60  ;;  %v5948_v11 = vcombine.low %v1156_v59, %v1160_v60 }
  0xdc   : > { %4153 = vmatpush1.bf16.msra.mxu1 %v5876_v19  ;;  %v1184_v1 = vld [vmem:[#allocation11 + $0x4a0] sm:$0xff] }
  0xdd   : > { %4154 = vmatprep.subr.bf16.mxu1 %v5869_v22  ;;  %982 = vmatpush1.bf16.msra.mxu0 %v5806_v23  ;;  %v1148_v4 = vld [vmem:[#allocation11 + $0x380] sm:$0xff]  ;;  %v5973_v10 = vcombine.high %v1180_v63, %v1184_v1  ;;  %v5972_v15 = vcombine.low %v1180_v63, %v1184_v1 }
  0xde   : > { %983 = vmatprep.subr.bf16.mxu0 %v5799_v26  ;;  %v1152_v5 = vld [vmem:[#allocation11 + $0x3a0] sm:$0xff] }
  0xdf   : > { %v1172_v8 = vld [vmem:[#allocation11 + $0x440] sm:$0xff]  ;;  %v5941_v14 = vcombine.high %v1148_v4, %v1152_v5  ;;  %v5940_v19 = vcombine.low %v1148_v4, %v1152_v5 }
  0xe0   : > { %4155 = vmatpush1.bf16.msra.mxu1 %v5868_v27  ;;  %v1176_v9 = vld [vmem:[#allocation11 + $0x460] sm:$0xff] }
  0xe1   : > { %4156 = vmatprep.subr.bf16.mxu1 %v5861_v29  ;;  %984 = vmatpush1.bf16.msra.mxu0 %v5798_v30  ;;  %v1140_v12 = vld [vmem:[#allocation11 + $0x340] sm:$0xff]  ;;  %v5965_v18 = vcombine.high %v1172_v8, %v1176_v9  ;;  %v5964_v21 = vcombine.low %v1172_v8, %v1176_v9 }
  0xe2   : > { %4193 = vmatprep.subr.bf16.mxu0 %v6013_v33  ;;  %v1144_v13 = vld [vmem:[#allocation11 + $0x360] sm:$0xff] }
  0xe3   : > { %v1164_v16 = vld [vmem:[#allocation11 + $0x400] sm:$0xff]  ;;  %v5933_v20 = vcombine.high %v1140_v12, %v1144_v13  ;;  %v5932_v25 = vcombine.low %v1140_v12, %v1144_v13 }
  0xe4   : > { %4157 = vmatpush1.bf16.msra.mxu1 %v5860_v34  ;;  %5827 = vmatmul.mubr.msk.bf16.vlgmr.msra.gmra.mxu0 %vm518_vm0, %v7385_v38  ;;  %v5989_v38 = vcombine.high %v1196_v48, %v1200_v49  ;;  %v1168_v17 = vld [vmem:[#allocation11 + $0x420] sm:$0xff] }
  0xe5   : > { %4158 = vmatprep.subr.bf16.mxu1 %v5853_v37  ;;  %4194 = vmatpush1.bf16.msra.mxu0 %v6012_v39  ;;  %v1132_v22 = vld [vmem:[#allocation11 + $0x300] sm:$0xff]  ;;  %v5957_v24 = vcombine.high %v1164_v16, %v1168_v17  ;;  %v5956_v28 = vcombine.low %v1164_v16, %v1168_v17 }
  0xe6   : > { %4195 = vmatprep.subr.bf16.mxu0 %v6005_v42  ;;  %v1136_v23 = vld [vmem:[#allocation11 + $0x320] sm:$0xff] }
  0xe7   : > { %v1284_v26 = vld [vmem:[#allocation11 + $0x7c0] sm:$0xff]  ;;  %v5925_v0 = vcombine.high %v1132_v22, %v1136_v23  ;;  %v5924_v32 = vcombine.low %v1132_v22, %v1136_v23 }
  0xe8   : > { %4159 = vmatpush1.bf16.msra.mxu1 %v5852_v43  ;;  %v1288_v27 = vld [vmem:[#allocation11 + $0x7e0] sm:$0xff] }
  0xe9   : > { %4160 = vmatprep.subr.bf16.mxu1 %v5845_v46  ;;  %4196 = vmatpush1.bf16.msra.mxu0 %v6004_v47  ;;  %v1124_v29 = vld [vmem:[#allocation11 + $0x2c0] sm:$0xff]  ;;  %v6077_v31 = vcombine.high %v1284_v26, %v1288_v27  ;;  %v6076_v34 = vcombine.low %v1284_v26, %v1288_v27 }
  0xea   : > { %4197 = vmatprep.subr.bf16.mxu0 %v5997_v50  ;;  %v1128_v30 = vld [vmem:[#allocation11 + $0x2e0] sm:$0xff] }
  0xeb   : > { %v5917_v33 = vcombine.high %v1124_v29, %v1128_v30  ;;  %v1276_v35 = vld [vmem:[#allocation11 + $0x780] sm:$0xff]  ;;  %v5916_v37 = vcombine.low %v1124_v29, %v1128_v30 }
  0xec   : > { %4161 = vmatpush1.bf16.msra.mxu1 %v5844_v51  ;;  %v1280_v36 = vld [vmem:[#allocation11 + $0x7a0] sm:$0xff] }
  0xed   : > { %4162 = vmatprep.subr.bf16.mxu1 %v5837_v54  ;;  %4198 = vmatpush1.bf16.msra.mxu0 %v5996_v55  ;;  %v6069_v39 = vcombine.high %v1276_v35, %v1280_v36  ;;  %v1116_v40 = vld [vmem:[#allocation11 + $0x280] sm:$0xff]  ;;  %v6068_v42 = vcombine.low %v1276_v35, %v1280_v36 }
  0xee   : > { %4199 = vmatprep.subr.bf16.mxu0 %v5989_v38  ;;  %v1120_v41 = vld [vmem:[#allocation11 + $0x2a0] sm:$0xff] }
  0xef   : > { %v5909_v43 = vcombine.high %v1116_v40, %v1120_v41  ;;  %v1268_v44 = vld [vmem:[#allocation11 + $0x740] sm:$0xff]  ;;  %v5908_v46 = vcombine.low %v1116_v40, %v1120_v41 }
  0xf0   : > { %4163 = vmatpush1.bf16.msra.mxu1 %v5836_v58  ;;  %v1272_v45 = vld [vmem:[#allocation11 + $0x760] sm:$0xff] }
  0xf1   : > { %4164 = vmatprep.subr.bf16.mxu1 %v5829_v61  ;;  %4200 = vmatpush1.bf16.msra.mxu0 %v5988_v62  ;;  %v6061_v47 = vcombine.high %v1268_v44, %v1272_v45  ;;  %v1108_v48 = vld [vmem:[#allocation11 + $0x240] sm:$0xff]  ;;  %v6060_v50 = vcombine.low %v1268_v44, %v1272_v45 }
  0xf2   : > { %4201 = vmatprep.subr.bf16.mxu0 %v5981_v2  ;;  %v1112_v49 = vld [vmem:[#allocation11 + $0x260] sm:$0xff] }
  0xf3   : > { %v5901_v51 = vcombine.high %v1108_v48, %v1112_v49  ;;  %v1260_v52 = vld [vmem:[#allocation11 + $0x700] sm:$0xff]  ;;  %v5900_v54 = vcombine.low %v1108_v48, %v1112_v49 }
  0xf4   : > { %4165 = vmatpush1.bf16.msra.mxu1 %v5828_v3  ;;  %v1264_v53 = vld [vmem:[#allocation11 + $0x720] sm:$0xff] }
  0xf5   : > { %4166 = vmatprep.subr.bf16.mxu1 %v5949_v6  ;;  %4202 = vmatpush1.bf16.msra.mxu0 %v5980_v7  ;;  %v6053_v55 = vcombine.high %v1260_v52, %v1264_v53  ;;  %v1100_v56 = vld [vmem:[#allocation11 + $0x200] sm:$0xff]  ;;  %v6052_v38 = vcombine.low %v1260_v52, %v1264_v53 }
  0xf6   : > { %4203 = vmatprep.subr.bf16.mxu0 %v5973_v10  ;;  %v1104_v57 = vld [vmem:[#allocation11 + $0x220] sm:$0xff] }
  0xf7   : > { %v5893_v58 = vcombine.high %v1100_v56, %v1104_v57  ;;  %v1252_v59 = vld [vmem:[#allocation11 + $0x6c0] sm:$0xff]  ;;  %v5892_v61 = vcombine.low %v1100_v56, %v1104_v57 }
  0xf8   : > { %4167 = vmatpush2.bf16.msra.mxu1 %v5948_v11  ;;  %v1256_v60 = vld [vmem:[#allocation11 + $0x6e0] sm:$0xff] }
  0xf9   : > { %4168 = vmatprep.subr.bf16.mxu1 %v5941_v14  ;;  %4204 = vmatpush1.bf16.msra.mxu0 %v5972_v15  ;;  %v6045_v62 = vcombine.high %v1252_v59, %v1256_v60  ;;  %v7399_v63 = vld [vmem:[#allocation11 + $0x9c0] sm:$0xff]  ;;  %v6044_v2 = vcombine.low %v1252_v59, %v1256_v60 }
  0xfa   : > { %4205 = vmatprep.subr.bf16.mxu0 %v5965_v18  ;;  %v7401_v1 = vld [vmem:[#allocation11 + $0x9e0] sm:$0xff] }
  0xfb   : > { %v6141_v3 = vcombine.high %v7399_v63, %v7401_v1  ;;  %v6140_v4 = vcombine.low %v7399_v63, %v7401_v1  ;;  %v1244_v5 = vld [vmem:[#allocation11 + $0x680] sm:$0xff] }
  0xfc   : > { %4169 = vmatpush2.bf16.msra.mxu1 %v5940_v19  ;;  %v1248_v6 = vld [vmem:[#allocation11 + $0x6a0] sm:$0xff] }
  0xfd   : > { %4170 = vmatprep.subr.bf16.mxu1 %v5933_v20  ;;  %4206 = vmatpush1.bf16.msra.mxu0 %v5964_v21  ;;  %v6037_v7 = vcombine.high %v1244_v5, %v1248_v6  ;;  %v6036_v8 = vcombine.low %v1244_v5, %v1248_v6  ;;  %v1236_v9 = vld [vmem:[#allocation11 + $0x640] sm:$0xff]  ;;  %v637_v21 = vlaneseq }
  0xfe   : > { %4207 = vmatprep.subr.bf16.mxu0 %v5957_v24  ;;  %v1240_v10 = vld [vmem:[#allocation11 + $0x660] sm:$0xff]  ;;  %v5789_v24 = vld [vmem:[#allocation7] ss:$0 sm:$0xff] }
  0xff   : > { %v6029_v11 = vcombine.high %v1236_v9, %v1240_v10  ;;  %v6028_v12 = vcombine.low %v1236_v9, %v1240_v10  ;;  %v1228_v13 = vld [vmem:[#allocation11 + $0x600] sm:$0xff]  ;;  %v7415_v22 = vshrl.u32 %v637_v21, 7 }
 0x100   : > { %4171 = vmatpush2.bf16.msra.mxu1 %v5932_v25  ;;  %v1232_v14 = vld [vmem:[#allocation11 + $0x620] sm:$0xff]  ;;  %v7418_v25 = vld [vmem:[#allocation10] sm:$0xff] }
 0x101   : > { %4172 = vmatprep.subr.bf16.mxu1 %v5925_v0  ;;  %4208 = vmatpush1.bf16.msra.mxu0 %v5956_v28  ;;  %v6021_v15 = vcombine.high %v1228_v13, %v1232_v14  ;;  %v6020_v16 = vcombine.low %v1228_v13, %v1232_v14  ;;  %v7407_v17 = vld [vmem:[#allocation11 + $0xdc0] sm:$0xff]  ;;  %v639_v23 = vsub.s32 0, %v7415_v22  ;;  %v643_v26 = vsub.s32 1, %v7415_v22 }
 0x102   : > { %4209 = vmatprep.subr.bf16.mxu0 %v6077_v31  ;;  %v7409_v18 = vld [vmem:[#allocation11 + $0xde0] sm:$0xff]  ;;  %v651_v49 = vsub.s32 3, %v7415_v22 }
 0x103   : > { %v6269_v19 = vcombine.high %v7407_v17, %v7409_v18  ;;  %v6268_v20 = vcombine.low %v7407_v17, %v7409_v18  ;;  %v640_v28 = vrot.slane %v7418_v25, %v639_v23  ;;  %v644_v30 = vrot.slane %v7418_v25, %v643_v26  ;;  %v1340_v45 = vld [vmem:[#allocation11 + $0x980] sm:$0xff] }
 0x104   : > { %4173 = vmatpush2.bf16.msra.mxu1 %v5924_v32  ;;  %v1332_v53 = vld [vmem:[#allocation11 + $0x940] sm:$0xff]  ;;  %v652_v56 = vrot.slane %v7418_v25, %v651_v49 }
 0x105   : > { %4174 = vmatprep.subr.bf16.mxu1 %v5917_v33  ;;  %4210 = vmatpush2.bf16.msra.mxu0 %v6076_v34  ;;  %v1328_v63 = vld [vmem:[#allocation11 + $0x920] sm:$0xff] }
 0x106   : > { %4211 = vmatprep.subr.bf16.mxu0 %v6069_v39  ;;  %v1320_v13 = vld [vmem:[#allocation11 + $0x8e0] sm:$0xff] }
 0x108   : > { %4175 = vmatpush2.bf16.msra.mxu1 %v5916_v37 }
 0x109   : > { %4176 = vmatprep.subr.bf16.mxu1 %v5909_v43  ;;  %4212 = vmatpush2.bf16.msra.mxu0 %v6068_v42 }
 0x10a   : > { %4213 = vmatprep.subr.bf16.mxu0 %v6061_v47 }
 0x10c   : > { %4177 = vmatpush2.bf16.msra.mxu1 %v5908_v46  ;;  %v1344_v46 = vld [vmem:[#allocation11 + $0x9a0] sm:$0xff] }
 0x10d   : > { %4178 = vmatprep.subr.bf16.mxu1 %v5901_v51  ;;  %4214 = vmatpush2.bf16.msra.mxu0 %v6060_v50  ;;  %v659_v50 = vsub.s32 5, %v7415_v22  ;;  %v647_v51 = vsub.s32 2, %v7415_v22  ;;  %v6133_v52 = vcombine.high %v1340_v45, %v1344_v46  ;;  %v6132_v57 = vcombine.low %v1340_v45, %v1344_v46  ;;  %v1300_v45 = vld [vmem:[#allocation11 + $0x840] sm:$0xff] }
 0x10e   : > { %4215 = vmatprep.subr.bf16.mxu0 %v6053_v55  ;;  %v1304_v46 = vld [vmem:[#allocation11 + $0x860] sm:$0xff] }
 0x10f   : > { %v6093_v17 = vcombine.high %v1300_v45, %v1304_v46 }
 0x110   : > { %4179 = vmatpush2.bf16.msra.mxu1 %v5900_v54  ;;  %v1336_v54 = vld [vmem:[#allocation11 + $0x960] sm:$0xff] }
 0x111   : > { %4180 = vmatprep.subr.bf16.mxu1 %v5893_v58  ;;  %4216 = vmatpush2.bf16.msra.mxu0 %v6052_v38  ;;  %v660_v38 = vrot.slane %v7418_v25, %v659_v50  ;;  %v648_v58 = vrot.slane %v7418_v25, %v647_v51  ;;  %v6125_v60 = vcombine.high %v1332_v53, %v1336_v54 }
 0x112   : > { %4217 = vmatprep.subr.bf16.mxu0 %v6045_v62  ;;  %v1324_v62 = vld [vmem:[#allocation11 + $0x900] sm:$0xff]  ;;  %v6124_v5 = vcombine.low %v1332_v53, %v1336_v54 }
 0x113   : > { %v6117_v9 = vcombine.high %v1324_v62, %v1328_v63 }
 0x114   : > { %4181 = vmatpush2.bf16.msra.mxu1 %v5892_v61 }
 0x115   : > { %4236 = vmatprep.subr.bf16.mxu1 %v6141_v3  ;;  %4218 = vmatpush2.bf16.msra.mxu0 %v6044_v2 }
 0x116   : > { %4219 = vmatprep.subr.bf16.mxu0 %v6037_v7 }
 0x119   : > { %4220 = vmatpush2.bf16.msra.mxu0 %v6036_v8 }
 0x11a   : > { %4221 = vmatprep.subr.bf16.mxu0 %v6029_v11 }
 0x11d   : > { %4222 = vmatpush2.bf16.msra.mxu0 %v6028_v12  ;;  %v1316_v12 = vld [vmem:[#allocation11 + $0x8c0] sm:$0xff] }
 0x11e   : > { %4223 = vmatprep.subr.bf16.mxu0 %v6021_v15  ;;  %v6116_v15 = vcombine.low %v1324_v62, %v1328_v63  ;;  %v6092_v63 = vcombine.low %v1300_v45, %v1304_v46  ;;  %v1388_v46 = vld [vmem:[#allocation11 + $0xb00] sm:$0xff] }
 0x121   : > { %4224 = vmatpush2.bf16.msra.mxu0 %v6020_v16 }
 0x122   : > { %4279 = vmatprep.subr.bf16.mxu0 %v6269_v19 }
 0x183   : > { %v6532_v27 = vpop.f32.mrf.mxu0 }
 0x184   : > { %v597_v0 = vadd.f32 %v6532_v27, %v5789_v24  ;;  %v1472_v27 = vld [vmem:[#allocation11 + $0xda0] sm:$0xff] }
 0x185   : > { %v591_v29 = vpop.f32.mrf.mxu0 }
 0x186   : > { %601 = vst [vmem:[%s7428_s2 + $0x8] sm:$0xff] %v597_v0  ;;  %v592_v31 = vadd.f32 %v5789_v24, %v591_v29  ;;  %v1468_v24 = vld [vmem:[#allocation11 + $0xd80] sm:$0xff] }
 0x187   : > { %v874_v32 = vpop.f32.mrf.mxu1 }
 0x188   : > { %600 = vst [vmem:[%s7428_s2] sm:$0xff] %v592_v31  ;;  %v875_v33 = vadd.f32 %v874_v32, %v640_v28  ;;  %v1308_v32 = vld [vmem:[#allocation11 + $0x880] sm:$0xff] }
 0x189   : > { %v876_v34 = vpop.f32.mrf.mxu1 }
 0x18a   : > { %v877_v35 = vadd.f32 %v876_v34, %v644_v30  ;;  %v1012_v39 = vmax.f32 %v875_v33, 0.0  ;;  %v1312_v33 = vld [vmem:[#allocation11 + $0x8a0] sm:$0xff] }
 0x18b   : > { %v878_v36 = vpop.f32.mrf.mxu1 }
 0x18c   : > { %v879_v37 = vadd.f32 %v878_v36, %v640_v28  ;;  %v1013_v41 = vmax.f32 %v877_v35, 0.0  ;;  %v667_v35 = vsub.s32 7, %v7415_v22 }
 0x18d   : > { %v880_v40 = vpop.f32.mrf.mxu1 }
 0x18e   : > { %v1020_v42 = vmax.f32 %v879_v37, 0.0  ;;  %v881_v43 = vadd.f32 %v880_v40, %v644_v30  ;;  %v6109_v30 = vcombine.high %v1316_v12, %v1320_v13  ;;  %v6261_v37 = vcombine.high %v1468_v24, %v1472_v27  ;;  %v1460_v40 = vld [vmem:[#allocation11 + $0xd40] sm:$0xff] }
 0x190   : > { %v1021_v44 = vmax.f32 %v881_v43, 0.0  ;;  %v7432_v47 = vpack.c.bf16 %v1020_v42, %v1012_v39  ;;  %v6108_v39 = vcombine.low %v1316_v12, %v1320_v13  ;;  %v6101_v43 = vcombine.high %v1308_v32, %v1312_v33  ;;  %v1436_v13 = vld [vmem:[#allocation11 + $0xc80] sm:$0xff] }
 0x192   : > { %v7434_v48 = vpack.c.bf16 %v1021_v44, %v1013_v41  ;;  %v1464_v41 = vld [vmem:[#allocation11 + $0xd60] sm:$0xff]  ;;  %v6260_v44 = vcombine.low %v1468_v24, %v1472_v27 }
 0x193   : > { %v6253_v53 = vcombine.high %v1460_v40, %v1464_v41  ;;  %v1408_v24 = vld [vmem:[#allocation11 + $0xba0] sm:$0xff] }
 0x194   : > { %4182 = vmatprep.mubr.bf16.mxu1 %v7434_v48  ;;  %v917_v55 = vpop.f32.mrf.mxu0 }
 0x195   : > { %4183 = vmatmul.mubr.bf16.vlgmr.msra.gmra.mxu1 %v7432_v47  ;;  %v918_v7 = vadd.f32 %v917_v55, %v648_v58  ;;  %v6100_v55 = vcombine.low %v1308_v32, %v1312_v33 }
 0x196   : > { %4237 = vmatpush1.bf16.msra.mxu1 %v6140_v4  ;;  %v919_v59 = vpop.f32.mrf.mxu0 }
 0x197   : > { %4238 = vmatprep.subr.bf16.mxu1 %v6133_v52  ;;  %v7453_v61 = vpop.f32.mrf.mxu1  ;;  %v920_v3 = vadd.f32 %v919_v59, %v652_v56  ;;  %v1014_v29 = vmax.f32 %v918_v7, 0.0  ;;  %v668_v52 = vrot.slane %v7418_v25, %v667_v35  ;;  %v1416_v7 = vld [vmem:[#allocation11 + $0xbe0] sm:$0xff] }
 0x198   : > { %v921_v1 = vpop.f32.mrf.mxu0 }
 0x199   : > { %v962_v2 = vpop.f32.mrf.mxu1  ;;  %v922_v4 = vadd.f32 %v921_v1, %v648_v58  ;;  %v1015_v19 = vmax.f32 %v920_v3, 0.0  ;;  %v1296_v58 = vld [vmem:[#allocation11 + $0x820] sm:$0xff] }
 0x19a   : > { %4239 = vmatpush1.bf16.msra.mxu1 %v6132_v57  ;;  %v963_v6 = vadd.f32 %v962_v2, %v660_v38  ;;  %v923_v8 = vpop.f32.mrf.mxu0  ;;  %v1456_v57 = vld [vmem:[#allocation11 + $0xd20] sm:$0xff] }
 0x19b   : > { %4240 = vmatprep.subr.bf16.mxu1 %v6125_v60  ;;  %v7455_v10 = vpop.f32.mrf.mxu1  ;;  %v924_v11 = vadd.f32 %v923_v8, %v652_v56  ;;  %v1022_v14 = vmax.f32 %v922_v4, 0.0  ;;  %v1452_v56 = vld [vmem:[#allocation11 + $0xd00] sm:$0xff] }
 0x19c   : > { %v1017_v0 = vmax.f32 %v963_v6, 0.0  ;;  %v6245_v60 = vcombine.high %v1452_v56, %v1456_v57  ;;  %v1444_v1 = vld [vmem:[#allocation11 + $0xcc0] sm:$0xff] }
 0x19d   : > { %v966_v16 = vpop.f32.mrf.mxu1  ;;  %v1023_v21 = vmax.f32 %v924_v11, 0.0  ;;  %v7460_v36 = vpack.c.bf16 %v1022_v14, %v1014_v29  ;;  %v1448_v2 = vld [vmem:[#allocation11 + $0xce0] sm:$0xff] }
 0x19e   : > { %4241 = vmatpush1.bf16.msra.mxu1 %v6124_v5  ;;  %v967_v28 = vadd.f32 %v966_v16, %v660_v38  ;;  %v1292_v38 = vld [vmem:[#allocation11 + $0x800] sm:$0xff]  ;;  %v6244_v5 = vcombine.low %v1452_v56, %v1456_v57  ;;  %v6237_v11 = vcombine.high %v1444_v1, %v1448_v2 }
 0x19f   : > { %4242 = vmatprep.subr.bf16.mxu1 %v6117_v9  ;;  %v7457_v31 = vpack.c.bf16 %v1023_v21, %v1015_v19  ;;  %v6085_v3 = vcombine.high %v1292_v38, %v1296_v58  ;;  %v1412_v6 = vld [vmem:[#allocation11 + $0xbc0] sm:$0xff]  ;;  %v6084_v12 = vcombine.low %v1292_v38, %v1296_v58  ;;  %v6236_v19 = vcombine.low %v1444_v1, %v1448_v2 }
 0x1a0   : > { %v1025_v34 = vmax.f32 %v967_v28, 0.0  ;;  %v1440_v14 = vld [vmem:[#allocation11 + $0xca0] sm:$0xff]  ;;  %v6205_v16 = vcombine.high %v1412_v6, %v1416_v7  ;;  %v6204_v28 = vcombine.low %v1412_v6, %v1416_v7 }
 0x1a1   : > { %4225 = vmatprep.mubr.bf16.mxu0 %v7457_v31  ;;  %v1404_v21 = vld [vmem:[#allocation11 + $0xb80] sm:$0xff]  ;;  %v6228_v33 = vcombine.low %v1436_v13, %v1440_v14 }
 0x1a2   : > { %4243 = vmatpush1.bf16.msra.mxu1 %v6116_v15  ;;  %v7463_v42 = vpack.c.bf16 %v1025_v34, %v1017_v0  ;;  %4226 = vmatmul.mubr.bf16.vlgmr.msra.gmra.mxu0 %v7460_v36  ;;  %v6229_v0 = vcombine.high %v1436_v13, %v1440_v14  ;;  %v1428_v29 = vld [vmem:[#allocation11 + $0xc40] sm:$0xff]  ;;  %v6197_v32 = vcombine.high %v1404_v21, %v1408_v24 }
 0x1a3   : > { %4244 = vmatprep.subr.bf16.mxu1 %v6109_v30  ;;  %4280 = vmatpush1.bf16.msra.mxu0 %v6268_v20  ;;  %v6252_v20 = vcombine.low %v1460_v40, %v1464_v41  ;;  %v1432_v30 = vld [vmem:[#allocation11 + $0xc60] sm:$0xff]  ;;  %v6196_v40 = vcombine.low %v1404_v21, %v1408_v24 }
 0x1a4   : > { %4268 = vmatprep.mubr.bf16.mxu1 %v7463_v42  ;;  %4281 = vmatprep.subr.bf16.mxu0 %v6261_v37  ;;  %v7473_v54 = vpop.f32.mrf.mxu0  ;;  %v1396_v34 = vld [vmem:[#allocation11 + $0xb40] sm:$0xff]  ;;  %v6220_v45 = vcombine.low %v1428_v29, %v1432_v30 }
 0x1a5   : > { %v1400_v37 = vld [vmem:[#allocation11 + $0xb60] sm:$0xff] }
 0x1a6   : > { %4245 = vmatpush1.bf16.msra.mxu1 %v6108_v39  ;;  %v1005_v18 = vpop.f32.mrf.mxu0  ;;  %v6221_v39 = vcombine.high %v1428_v29, %v1432_v30  ;;  %v1420_v41 = vld [vmem:[#allocation11 + $0xc00] sm:$0xff] }
 0x1a7   : > { %4246 = vmatprep.subr.bf16.mxu1 %v6101_v43  ;;  %4282 = vmatpush1.bf16.msra.mxu0 %v6260_v44  ;;  %v1006_v59 = vadd.f32 %v1005_v18, %v668_v52  ;;  %v1424_v43 = vld [vmem:[#allocation11 + $0xc20] sm:$0xff]  ;;  %v6189_v44 = vcombine.high %v1396_v34, %v1400_v37 }
 0x1a8   : > { %4283 = vmatprep.subr.bf16.mxu0 %v6253_v53  ;;  %v7475_v62 = vpop.f32.mrf.mxu0  ;;  %v6213_v53 = vcombine.high %v1420_v41, %v1424_v43  ;;  %v1540_v56 = vld [vmem:[#allocation11 + $0xfc0] sm:$0xff]  ;;  %v6212_v18 = vcombine.low %v1420_v41, %v1424_v43 }
 0x1a9   : > { %v1019_v8 = vmax.f32 %v1006_v59, 0.0  ;;  %v1544_v57 = vld [vmem:[#allocation11 + $0xfe0] sm:$0xff] }
 0x1aa   : > { %4247 = vmatpush1.bf16.msra.mxu1 %v6100_v55  ;;  %v1009_v4 = vpop.f32.mrf.mxu0  ;;  %v6188_v55 = vcombine.low %v1396_v34, %v1400_v37  ;;  %v1384_v38 = vld [vmem:[#allocation11 + $0xae0] sm:$0xff]  ;;  %v6333_v58 = vcombine.high %v1540_v56, %v1544_v57  ;;  %v6332_v2 = vcombine.low %v1540_v56, %v1544_v57 }
 0x1ab   : > { %4248 = vmatprep.subr.bf16.mxu1 %v6093_v17  ;;  %4284 = vmatpush1.bf16.msra.mxu0 %v6252_v20  ;;  %v1010_v9 = vadd.f32 %v1009_v4, %v668_v52  ;;  %v1392_v52 = vld [vmem:[#allocation11 + $0xb20] sm:$0xff] }
 0x1ac   : > { %4285 = vmatprep.subr.bf16.mxu0 %v6245_v60  ;;  %v6181_v17 = vcombine.high %v1388_v46, %v1392_v52  ;;  %v1380_v20 = vld [vmem:[#allocation11 + $0xac0] sm:$0xff]  ;;  %v6180_v59 = vcombine.low %v1388_v46, %v1392_v52 }
 0x1ad   : > { %v1027_v15 = vmax.f32 %v1010_v9, 0.0  ;;  %v1532_v60 = vld [vmem:[#allocation11 + $0xf80] sm:$0xff]  ;;  %v6173_v1 = vcombine.high %v1380_v20, %v1384_v38  ;;  %v6172_v7 = vcombine.low %v1380_v20, %v1384_v38  ;;  %v663_v38 = vsub.s32 6, %v7415_v22 }
 0x1ae   : > { %4249 = vmatpush1.bf16.msra.mxu1 %v6092_v63  ;;  %v1536_v63 = vld [vmem:[#allocation11 + $0xfa0] sm:$0xff] }
 0x1af   : > { %4250 = vmatprep.subr.bf16.mxu1 %v6085_v3  ;;  %4286 = vmatpush1.bf16.msra.mxu0 %v6244_v5  ;;  %v7477_v27 = vpack.c.bf16 %v1027_v15, %v1019_v8  ;;  %v1372_v3 = vld [vmem:[#allocation11 + $0xa80] sm:$0xff]  ;;  %v655_v5 = vsub.s32 4, %v7415_v22  ;;  %v6325_v6 = vcombine.high %v1532_v60, %v1536_v63 }
 0x1b0   : > { %4287 = vmatprep.subr.bf16.mxu0 %v6237_v11  ;;  %v1376_v4 = vld [vmem:[#allocation11 + $0xaa0] sm:$0xff] }
 0x1b1   : > { %4311 = vmatprep.mubr.bf16.mxu0 %v7477_v27  ;;  %v1524_v8 = vld [vmem:[#allocation11 + $0xf40] sm:$0xff]  ;;  %v6165_v11 = vcombine.high %v1372_v3, %v1376_v4  ;;  %v656_v15 = vrot.slane %v7418_v25, %v655_v5 }
 0x1b2   : > { %4251 = vmatpush1.bf16.msra.mxu1 %v6084_v12  ;;  %v1528_v9 = vld [vmem:[#allocation11 + $0xf60] sm:$0xff]  ;;  %v6324_v12 = vcombine.low %v1532_v60, %v1536_v63 }
 0x1b3   : > { %4252 = vmatprep.subr.bf16.mxu1 %v6205_v16  ;;  %4288 = vmatpush1.bf16.msra.mxu0 %v6236_v19  ;;  %v1364_v13 = vld [vmem:[#allocation11 + $0xa40] sm:$0xff]  ;;  %v6317_v16 = vcombine.high %v1524_v8, %v1528_v9  ;;  %v6164_v19 = vcombine.low %v1372_v3, %v1376_v4  ;;  %v1077_v3 = vld [vmem:[#allocation11 + $0x148] sm:$0xff] }
 0x1b4   : > { %4289 = vmatprep.subr.bf16.mxu0 %v6229_v0  ;;  %v1368_v14 = vld [vmem:[#allocation11 + $0xa60] sm:$0xff]  ;;  %v1081_v4 = vld [vmem:[#allocation11 + $0x168] sm:$0xff] }
 0x1b5   : > { %v1516_v21 = vld [vmem:[#allocation11 + $0xf00] sm:$0xff]  ;;  %v6157_v0 = vcombine.high %v1364_v13, %v1368_v14  ;;  %v6156_v37 = vcombine.low %v1364_v13, %v1368_v14  ;;  %v1069_v14 = vld [vmem:[#allocation11 + $0x108] sm:$0xff] }
 0x1b6   : > { %4253 = vmatpush2.bf16.msra.mxu1 %v6204_v28  ;;  %v1520_v24 = vld [vmem:[#allocation11 + $0xf20] sm:$0xff]  ;;  %v6316_v28 = vcombine.low %v1524_v8, %v1528_v9 }
 0x1b7   : > { %4254 = vmatprep.subr.bf16.mxu1 %v6197_v32  ;;  %4290 = vmatpush1.bf16.msra.mxu0 %v6228_v33  ;;  %v1356_v29 = vld [vmem:[#allocation11 + $0xa00] sm:$0xff]  ;;  %v961_v32 = vadd.f32 %v7453_v61, %v656_v15  ;;  %v965_v33 = vadd.f32 %v7455_v10, %v656_v15  ;;  %v6309_v34 = vcombine.high %v1516_v21, %v1520_v24  ;;  %v1073_v15 = vld [vmem:[#allocation11 + $0x128] sm:$0xff] }
 0x1b8   : > { %4291 = vmatprep.subr.bf16.mxu0 %v6221_v39  ;;  %v1360_v30 = vld [vmem:[#allocation11 + $0xa20] sm:$0xff]  ;;  %v6308_v43 = vcombine.low %v1516_v21, %v1520_v24  ;;  %v5870_v21 = vcombine.low %v1077_v3, %v1081_v4  ;;  %v1221_v24 = vld [vmem:[#allocation11 + $0x5c8] sm:$0xff] }
 0x1b9   : > { %v1508_v39 = vld [vmem:[#allocation11 + $0xec0] sm:$0xff]  ;;  %v6149_v41 = vcombine.high %v1356_v29, %v1360_v30  ;;  %v1016_v46 = vmax.f32 %v961_v32, 0.0  ;;  %v1024_v52 = vmax.f32 %v965_v33, 0.0  ;;  %v6148_v61 = vcombine.low %v1356_v29, %v1360_v30  ;;  %v1061_v30 = vld [vmem:[#allocation11 + $0xc8] sm:$0xff] }
 0x1ba   : > { %4255 = vmatpush2.bf16.msra.mxu1 %v6196_v40  ;;  %v1512_v40 = vld [vmem:[#allocation11 + $0xee0] sm:$0xff]  ;;  %v1065_v32 = vld [vmem:[#allocation11 + $0xe8] sm:$0xff] }
 0x1bb   : > { %4256 = vmatprep.subr.bf16.mxu1 %v6189_v44  ;;  %4292 = vmatpush1.bf16.msra.mxu0 %v6220_v45  ;;  %v1093_v44 = vld [vmem:[#allocation11 + $0x1c8] sm:$0xff]  ;;  %v1504_v10 = vld [vmem:[#allocation11 + $0xea0] sm:$0xff]  ;;  %v6300_v57 = vcombine.low %v1508_v39, %v1512_v40  ;;  %v7486_v20 = vpack.c.bf16 %v1024_v52, %v1016_v46  ;;  %v5854_v52 = vcombine.low %v1061_v30, %v1065_v32 }
 0x1bc   : > { %4293 = vmatprep.subr.bf16.mxu0 %v6213_v53  ;;  %v1097_v45 = vld [vmem:[#allocation11 + $0x1e8] sm:$0xff]  ;;  %v6301_v53 = vcombine.high %v1508_v39, %v1512_v40  ;;  %v1492_v60 = vld [vmem:[#allocation11 + $0xe40] sm:$0xff]  ;;  %v5855_v40 = vcombine.high %v1061_v30, %v1065_v32 }
 0x1bd   : > { %v5887_v56 = vcombine.high %v1093_v44, %v1097_v45  ;;  %v1496_v63 = vld [vmem:[#allocation11 + $0xe60] sm:$0xff]  ;;  %v1213_v39 = vld [vmem:[#allocation11 + $0x588] sm:$0xff] }
 0x1be   : > { %4257 = vmatpush2.bf16.msra.mxu1 %v6188_v55  ;;  %v1500_v55 = vld [vmem:[#allocation11 + $0xe80] sm:$0xff]  ;;  %v6284_v13 = vcombine.low %v1492_v60, %v1496_v63  ;;  %v1177_v30 = vld [vmem:[#allocation11 + $0x468] sm:$0xff] }
 0x1bf   : > { %4258 = vmatprep.subr.bf16.mxu1 %v6181_v17  ;;  %4294 = vmatpush1.bf16.msra.mxu0 %v6212_v18  ;;  %v1085_v17 = vld [vmem:[#allocation11 + $0x188] sm:$0xff]  ;;  %v1484_v9 = vld [vmem:[#allocation11 + $0xe00] sm:$0xff] }
 0x1c0   : > { %4295 = vmatprep.subr.bf16.mxu0 %v6333_v58  ;;  %v1089_v18 = vld [vmem:[#allocation11 + $0x1a8] sm:$0xff]  ;;  %v6293_v58 = vcombine.high %v1500_v55, %v1504_v10 }
 0x1c1   : > { %v5878_v8 = vcombine.low %v1085_v17, %v1089_v18 }
 0x1c2   : > { %4259 = vmatpush2.bf16.msra.mxu1 %v6180_v59  ;;  %v5886_v59 = vcombine.low %v1093_v44, %v1097_v45  ;;  %v1057_v44 = vld [vmem:[#allocation11 + $0xa8] sm:$0xff] }
 0x1c3   : > { %4260 = vmatprep.subr.bf16.mxu1 %v6173_v1  ;;  %4296 = vmatpush2.bf16.msra.mxu0 %v6332_v2  ;;  %v5879_v1 = vcombine.high %v1085_v17, %v1089_v18  ;;  %v6292_v2 = vcombine.low %v1500_v55, %v1504_v10 }
 0x1c4   : > { %4297 = vmatprep.subr.bf16.mxu0 %v6325_v6  ;;  %v664_v6 = vrot.slane %v7418_v25, %v663_v38 }
 0x1c6   : > { %4261 = vmatpush2.bf16.msra.mxu1 %v6172_v7  ;;  %v6285_v7 = vcombine.high %v1492_v60, %v1496_v63  ;;  %v1008_v25 = vadd.f32 %v7475_v62, %v664_v6  ;;  %v1217_v62 = vld [vmem:[#allocation11 + $0x5a8] sm:$0xff] }
 0x1c7   : > { %4262 = vmatprep.subr.bf16.mxu1 %v6165_v11  ;;  %4298 = vmatpush2.bf16.msra.mxu0 %v6324_v12  ;;  %v1488_v11 = vld [vmem:[#allocation11 + $0xe20] sm:$0xff]  ;;  %v5871_v12 = vcombine.high %v1077_v3, %v1081_v4  ;;  %v6007_v46 = vcombine.high %v1213_v39, %v1217_v62  ;;  %v6006_v10 = vcombine.low %v1213_v39, %v1217_v62  ;;  %v1165_v62 = vld [vmem:[#allocation11 + $0x408] sm:$0xff] }
 0x1c8   : > { %4299 = vmatprep.subr.bf16.mxu0 %v6317_v16  ;;  %v1004_v16 = vadd.f32 %v7473_v54, %v664_v6  ;;  %v6276_v29 = vcombine.low %v1484_v9, %v1488_v11  ;;  %v5862_v54 = vcombine.low %v1069_v14, %v1073_v15  ;;  %v1189_v6 = vld [vmem:[#allocation11 + $0x4c8] sm:$0xff] }
 0x1ca   : > { %4263 = vmatpush2.bf16.msra.mxu1 %v6164_v19  ;;  %v6277_v19 = vcombine.high %v1484_v9, %v1488_v11  ;;  %v1018_v33 = vmax.f32 %v1004_v16, 0.0  ;;  %v1157_v11 = vld [vmem:[#allocation11 + $0x3c8] sm:$0xff] }
 0x1cb   : > { %4264 = vmatprep.subr.bf16.mxu1 %v6157_v0  ;;  %4300 = vmatpush2.bf16.msra.mxu0 %v6316_v28  ;;  %v1225_v0 = vld [vmem:[#allocation11 + $0x5e8] sm:$0xff]  ;;  %v5863_v28 = vcombine.high %v1069_v14, %v1073_v15 }
 0x1cc   : > { %4301 = vmatprep.subr.bf16.mxu0 %v6309_v34  ;;  %v1026_v34 = vmax.f32 %v1008_v25, 0.0  ;;  %v1181_v15 = vld [vmem:[#allocation11 + $0x488] sm:$0xff] }
 0x1cd   : > { %v1185_v16 = vld [vmem:[#allocation11 + $0x4a8] sm:$0xff] }
 0x1ce   : > { %4265 = vmatpush2.bf16.msra.mxu1 %v6156_v37  ;;  %v6015_v37 = vcombine.high %v1221_v24, %v1225_v0  ;;  %v7496_v45 = vpack.c.bf16 %v1026_v34, %v1018_v33  ;;  %v5974_v33 = vcombine.low %v1181_v15, %v1185_v16  ;;  %v1141_v34 = vld [vmem:[#allocation11 + $0x348] sm:$0xff] }
 0x1cf   : > { %4266 = vmatprep.subr.bf16.mxu1 %v6149_v41  ;;  %4302 = vmatpush2.bf16.msra.mxu0 %v6308_v43  ;;  %v6014_v41 = vcombine.low %v1221_v24, %v1225_v0  ;;  %v1053_v43 = vld [vmem:[#allocation11 + $0x88] sm:$0xff]  ;;  %v5975_v0 = vcombine.high %v1181_v15, %v1185_v16 }
 0x1d0   : > { %4303 = vmatprep.subr.bf16.mxu0 %v6301_v53  ;;  %v1205_v53 = vld [vmem:[#allocation11 + $0x548] sm:$0xff]  ;;  %v5847_v55 = vcombine.high %v1053_v43, %v1057_v44  ;;  %v5846_v18 = vcombine.low %v1053_v43, %v1057_v44 }
 0x1d1   : > { %v1153_v24 = vld [vmem:[#allocation11 + $0x3a8] sm:$0xff] }
 0x1d2   : > { %4267 = vmatpush2.bf16.msra.mxu1 %v6148_v61  ;;  %v1209_v61 = vld [vmem:[#allocation11 + $0x568] sm:$0xff] }
 0x1d3   : > { %4322 = vmatprep.subr.bf16.mxu1 %v5887_v56  ;;  %4304 = vmatpush2.bf16.msra.mxu0 %v6300_v57  ;;  %v1045_v56 = vld [vmem:[#allocation11 + $0x48] sm:$0xff]  ;;  %v5999_v17 = vcombine.high %v1205_v53, %v1209_v61  ;;  %v5998_v63 = vcombine.low %v1205_v53, %v1209_v61 }
 0x1d4   : > { %4305 = vmatprep.subr.bf16.mxu0 %v6293_v58  ;;  %v1049_v57 = vld [vmem:[#allocation11 + $0x68] sm:$0xff] }
 0x1d5   : > { %4269 = vmatmul.mubr.bf16.vlgmr.msra.gmra.mxu1 %v7486_v20  ;;  %v1197_v58 = vld [vmem:[#allocation11 + $0x508] sm:$0xff]  ;;  %v5839_v60 = vcombine.high %v1045_v56, %v1049_v57  ;;  %v5838_v4 = vcombine.low %v1045_v56, %v1049_v57 }
 0x1d6   : > { %4323 = vmatpush1.bf16.msra.mxu1 %v5886_v59  ;;  %4354 = vmatprep.mubr.bf16.mxu1 %v7434_v48  ;;  %v1201_v59 = vld [vmem:[#allocation11 + $0x528] sm:$0xff] }
 0x1d7   : > { %4324 = vmatprep.subr.bf16.mxu1 %v5879_v1  ;;  %4306 = vmatpush2.bf16.msra.mxu0 %v6292_v2  ;;  %v1037_v1 = vld [vmem:[#allocation11 + $0x8] sm:$0xff]  ;;  %v5991_v3 = vcombine.high %v1197_v58, %v1201_v59  ;;  %v5990_v9 = vcombine.low %v1197_v58, %v1201_v59 }
 0x1d8   : > { %4307 = vmatprep.subr.bf16.mxu0 %v6285_v7  ;;  %v1041_v2 = vld [vmem:[#allocation11 + $0x28] sm:$0xff] }
 0x1d9   : > { %v1193_v7 = vld [vmem:[#allocation11 + $0x4e8] sm:$0xff]  ;;  %v5830_v14 = vcombine.low %v1037_v1, %v1041_v2 }
 0x1da   : > { %4325 = vmatpush1.bf16.msra.mxu1 %v5878_v8  ;;  %v5831_v8 = vcombine.high %v1037_v1, %v1041_v2  ;;  %v1133_v44 = vld [vmem:[#allocation11 + $0x308] sm:$0xff] }
 0x1db   : > { %4326 = vmatprep.subr.bf16.mxu1 %v5871_v12  ;;  %4308 = vmatpush2.bf16.msra.mxu0 %v6284_v13  ;;  %v1161_v12 = vld [vmem:[#allocation11 + $0x3e8] sm:$0xff]  ;;  %v5983_v13 = vcombine.high %v1189_v6, %v1193_v7 }
 0x1dc   : > { %4309 = vmatprep.subr.bf16.mxu0 %v6277_v19  ;;  %v5951_v25 = vcombine.high %v1157_v11, %v1161_v12  ;;  %v5982_v19 = vcombine.low %v1189_v6, %v1193_v7  ;;  %v1285_v61 = vld [vmem:[#allocation11 + $0x7c8] sm:$0xff] }
 0x1dd   : > { %v1125_v57 = vld [vmem:[#allocation11 + $0x2c8] sm:$0xff] }
 0x1de   : > { %4327 = vmatpush1.bf16.msra.mxu1 %v5870_v21  ;;  %v1149_v21 = vld [vmem:[#allocation11 + $0x388] sm:$0xff] }
 0x1df   : > { %4328 = vmatprep.subr.bf16.mxu1 %v5863_v28  ;;  %4310 = vmatpush2.bf16.msra.mxu0 %v6276_v29  ;;  %v5950_v28 = vcombine.low %v1157_v11, %v1161_v12  ;;  %v1173_v29 = vld [vmem:[#allocation11 + $0x448] sm:$0xff]  ;;  %v5943_v32 = vcombine.high %v1149_v21, %v1153_v24  ;;  %v5942_v39 = vcombine.low %v1149_v21, %v1153_v24 }
 0x1e0   : > { %4365 = vmatprep.subr.bf16.mxu0 %v6015_v37  ;;  %v1145_v37 = vld [vmem:[#allocation11 + $0x368] sm:$0xff]  ;;  %v5966_v43 = vcombine.low %v1173_v29, %v1177_v30 }
 0x1e1   : > { %v5934_v53 = vcombine.low %v1141_v34, %v1145_v37  ;;  %v1277_v59 = vld [vmem:[#allocation11 + $0x788] sm:$0xff] }
 0x1e2   : > { %4329 = vmatpush1.bf16.msra.mxu1 %v5862_v54  ;;  %4312 = vmatmul.mubr.bf16.vlgmr.msra.gmra.mxu0 %v7496_v45  ;;  %v5967_v54 = vcombine.high %v1173_v29, %v1177_v30  ;;  %v1117_v2 = vld [vmem:[#allocation11 + $0x288] sm:$0xff] }
 0x1e3   : > { %4330 = vmatprep.subr.bf16.mxu1 %v5855_v40  ;;  %4366 = vmatpush1.bf16.msra.mxu0 %v6014_v41  ;;  %v1169_v40 = vld [vmem:[#allocation11 + $0x428] sm:$0xff]  ;;  %v5935_v41 = vcombine.high %v1141_v34, %v1145_v37 }
 0x1e4   : > { %4397 = vmatprep.mubr.bf16.mxu0 %v7457_v31  ;;  %4367 = vmatprep.subr.bf16.mxu0 %v6007_v46  ;;  %v1137_v46 = vld [vmem:[#allocation11 + $0x328] sm:$0xff]  ;;  %v5958_v56 = vcombine.low %v1165_v62, %v1169_v40 }
 0x1e5   : > { %v5926_v58 = vcombine.low %v1133_v44, %v1137_v46  ;;  %v1269_v7 = vld [vmem:[#allocation11 + $0x748] sm:$0xff] }
 0x1e6   : > { %4331 = vmatpush1.bf16.msra.mxu1 %v5854_v52  ;;  %v5959_v52 = vcombine.high %v1165_v62, %v1169_v40  ;;  %v1109_v12 = vld [vmem:[#allocation11 + $0x248] sm:$0xff] }
 0x1e7   : > { %4332 = vmatprep.subr.bf16.mxu1 %v5847_v55  ;;  %4368 = vmatpush1.bf16.msra.mxu0 %v6006_v10  ;;  %v1289_v55 = vld [vmem:[#allocation11 + $0x7e8] sm:$0xff]  ;;  %v5927_v10 = vcombine.high %v1133_v44, %v1137_v46 }
 0x1e8   : > { %4369 = vmatprep.subr.bf16.mxu0 %v5999_v17  ;;  %v1129_v17 = vld [vmem:[#allocation11 + $0x2e8] sm:$0xff]  ;;  %v6078_v1 = vcombine.low %v1285_v61, %v1289_v55 }
 0x1e9   : > { %v5918_v6 = vcombine.low %v1125_v57, %v1129_v17  ;;  %v1261_v16 = vld [vmem:[#allocation11 + $0x708] sm:$0xff] }
 0x1ea   : > { %4333 = vmatpush1.bf16.msra.mxu1 %v5846_v18  ;;  %v6079_v18 = vcombine.high %v1285_v61, %v1289_v55  ;;  %v1101_v24 = vld [vmem:[#allocation11 + $0x208] sm:$0xff] }
 0x1eb   : > { %4334 = vmatprep.subr.bf16.mxu1 %v5839_v60  ;;  %4370 = vmatpush1.bf16.msra.mxu0 %v5998_v63  ;;  %v1281_v60 = vld [vmem:[#allocation11 + $0x7a8] sm:$0xff]  ;;  %v5919_v63 = vcombine.high %v1125_v57, %v1129_v17 }
 0x1ec   : > { %4371 = vmatprep.subr.bf16.mxu0 %v5991_v3  ;;  %v1121_v3 = vld [vmem:[#allocation11 + $0x2a8] sm:$0xff]  ;;  %v6070_v11 = vcombine.low %v1277_v59, %v1281_v60 }
 0x1ed   : > { %v5910_v15 = vcombine.low %v1117_v2, %v1121_v3  ;;  %v1253_v30 = vld [vmem:[#allocation11 + $0x6c8] sm:$0xff] }
 0x1ee   : > { %4335 = vmatpush1.bf16.msra.mxu1 %v5838_v4  ;;  %v6071_v4 = vcombine.high %v1277_v59, %v1281_v60  ;;  %v1349_v37 = vld [vmem:[#allocation11 + $0x9c8] sm:$0xff] }
 0x1ef   : > { %4336 = vmatprep.subr.bf16.mxu1 %v5831_v8  ;;  %4372 = vmatpush1.bf16.msra.mxu0 %v5990_v9  ;;  %v1273_v8 = vld [vmem:[#allocation11 + $0x768] sm:$0xff]  ;;  %v5911_v9 = vcombine.high %v1117_v2, %v1121_v3 }
 0x1f0   : > { %4373 = vmatprep.subr.bf16.mxu0 %v5983_v13  ;;  %v1113_v13 = vld [vmem:[#allocation11 + $0x268] sm:$0xff]  ;;  %v6062_v21 = vcombine.low %v1269_v7, %v1273_v8 }
 0x1f1   : > { %v5902_v29 = vcombine.low %v1109_v12, %v1113_v13  ;;  %v1245_v40 = vld [vmem:[#allocation11 + $0x688] sm:$0xff] }
 0x1f2   : > { %4337 = vmatpush1.bf16.msra.mxu1 %v5830_v14  ;;  %v6063_v14 = vcombine.high %v1269_v7, %v1273_v8  ;;  %v1341_v46 = vld [vmem:[#allocation11 + $0x988] sm:$0xff] }
 0x1f3   : > { %4338 = vmatprep.subr.bf16.mxu1 %v5951_v25  ;;  %4374 = vmatpush1.bf16.msra.mxu0 %v5982_v19  ;;  %v1265_v25 = vld [vmem:[#allocation11 + $0x728] sm:$0xff]  ;;  %v5903_v19 = vcombine.high %v1109_v12, %v1113_v13 }
 0x1f4   : > { %4375 = vmatprep.subr.bf16.mxu0 %v5975_v0  ;;  %v1105_v0 = vld [vmem:[#allocation11 + $0x228] sm:$0xff]  ;;  %v6054_v34 = vcombine.low %v1261_v16, %v1265_v25 }
 0x1f5   : > { %v5894_v62 = vcombine.low %v1101_v24, %v1105_v0  ;;  %v1237_v55 = vld [vmem:[#allocation11 + $0x648] sm:$0xff] }
 0x1f6   : > { %4339 = vmatpush2.bf16.msra.mxu1 %v5950_v28  ;;  %v6055_v28 = vcombine.high %v1261_v16, %v1265_v25  ;;  %v1333_v17 = vld [vmem:[#allocation11 + $0x948] sm:$0xff] }
 0x1f7   : > { %4340 = vmatprep.subr.bf16.mxu1 %v5943_v32  ;;  %4376 = vmatpush1.bf16.msra.mxu0 %v5974_v33  ;;  %v1257_v32 = vld [vmem:[#allocation11 + $0x6e8] sm:$0xff]  ;;  %v5895_v33 = vcombine.high %v1101_v24, %v1105_v0 }
 0x1f8   : > { %4377 = vmatprep.subr.bf16.mxu0 %v5967_v54  ;;  %v1353_v54 = vld [vmem:[#allocation11 + $0x9e8] sm:$0xff]  ;;  %v6046_v44 = vcombine.low %v1253_v30, %v1257_v32 }
 0x1f9   : > { %v6142_v61 = vcombine.low %v1349_v37, %v1353_v54  ;;  %v1229_v60 = vld [vmem:[#allocation11 + $0x608] sm:$0xff] }
 0x1fa   : > { %4341 = vmatpush2.bf16.msra.mxu1 %v5942_v39  ;;  %v6047_v39 = vcombine.high %v1253_v30, %v1257_v32  ;;  %v1325_v3 = vld [vmem:[#allocation11 + $0x908] sm:$0xff] }
 0x1fb   : > { %4342 = vmatprep.subr.bf16.mxu1 %v5935_v41  ;;  %4378 = vmatpush1.bf16.msra.mxu0 %v5966_v43  ;;  %v1249_v41 = vld [vmem:[#allocation11 + $0x6a8] sm:$0xff]  ;;  %v6143_v43 = vcombine.high %v1349_v37, %v1353_v54 }
 0x1fc   : > { %4379 = vmatprep.subr.bf16.mxu0 %v5959_v52  ;;  %v1345_v52 = vld [vmem:[#allocation11 + $0x9a8] sm:$0xff]  ;;  %v6038_v57 = vcombine.low %v1245_v40, %v1249_v41 }
 0x1fd   : > { %v6134_v59 = vcombine.low %v1341_v46, %v1345_v52  ;;  %v1477_v8 = vld [vmem:[#allocation11 + $0xdc8] sm:$0xff] }
 0x1fe   : > { %4343 = vmatpush2.bf16.msra.mxu1 %v5934_v53  ;;  %v6039_v53 = vcombine.high %v1245_v40, %v1249_v41  ;;  %v1317_v13 = vld [vmem:[#allocation11 + $0x8c8] sm:$0xff] }
 0x1ff   : > { %4344 = vmatprep.subr.bf16.mxu1 %v5927_v10  ;;  %4380 = vmatpush1.bf16.msra.mxu0 %v5958_v56  ;;  %v1241_v10 = vld [vmem:[#allocation11 + $0x668] sm:$0xff]  ;;  %v6135_v56 = vcombine.high %v1341_v46, %v1345_v52 }
 0x200   : > { %4381 = vmatprep.subr.bf16.mxu0 %v6079_v18  ;;  %v1337_v18 = vld [vmem:[#allocation11 + $0x968] sm:$0xff]  ;;  %v6030_v2 = vcombine.low %v1237_v55, %v1241_v10 }
 0x201   : > { %v6126_v7 = vcombine.low %v1333_v17, %v1337_v18  ;;  %v1469_v25 = vld [vmem:[#allocation11 + $0xd88] sm:$0xff] }
 0x202   : > { %4345 = vmatpush2.bf16.msra.mxu1 %v5926_v58  ;;  %v6031_v58 = vcombine.high %v1237_v55, %v1241_v10  ;;  %v1309_v0 = vld [vmem:[#allocation11 + $0x888] sm:$0xff] }
 0x203   : > { %4346 = vmatprep.subr.bf16.mxu1 %v5919_v63  ;;  %4382 = vmatpush2.bf16.msra.mxu0 %v6078_v1  ;;  %v1233_v63 = vld [vmem:[#allocation11 + $0x628] sm:$0xff]  ;;  %v6127_v1 = vcombine.high %v1333_v17, %v1337_v18 }
 0x204   : > { %4383 = vmatprep.subr.bf16.mxu0 %v6071_v4  ;;  %v1329_v4 = vld [vmem:[#allocation11 + $0x928] sm:$0xff]  ;;  %v6022_v12 = vcombine.low %v1229_v60, %v1233_v63 }
 0x205   : > { %v6118_v16 = vcombine.low %v1325_v3, %v1329_v4  ;;  %v1461_v32 = vld [vmem:[#allocation11 + $0xd48] sm:$0xff] }
 0x206   : > { %4347 = vmatpush2.bf16.msra.mxu1 %v5918_v6  ;;  %v6023_v6 = vcombine.high %v1229_v60, %v1233_v63  ;;  %v1301_v54 = vld [vmem:[#allocation11 + $0x848] sm:$0xff] }
 0x207   : > { %4348 = vmatprep.subr.bf16.mxu1 %v5911_v9  ;;  %4384 = vmatpush2.bf16.msra.mxu0 %v6070_v11  ;;  %v1481_v9 = vld [vmem:[#allocation11 + $0xde8] sm:$0xff]  ;;  %v6119_v11 = vcombine.high %v1325_v3, %v1329_v4 }
 0x208   : > { %4385 = vmatprep.subr.bf16.mxu0 %v6063_v14  ;;  %v1321_v14 = vld [vmem:[#allocation11 + $0x8e8] sm:$0xff]  ;;  %v6270_v24 = vcombine.low %v1477_v8, %v1481_v9 }
 0x209   : > { %v6110_v30 = vcombine.low %v1317_v13, %v1321_v14  ;;  %v1453_v41 = vld [vmem:[#allocation11 + $0xd08] sm:$0xff] }
 0x20a   : > { %4349 = vmatpush2.bf16.msra.mxu1 %v5910_v15  ;;  %v6271_v15 = vcombine.high %v1477_v8, %v1481_v9  ;;  %v1293_v52 = vld [vmem:[#allocation11 + $0x808] sm:$0xff] }
 0x20b   : > { %4350 = vmatprep.subr.bf16.mxu1 %v5903_v19  ;;  %4386 = vmatpush2.bf16.msra.mxu0 %v6062_v21  ;;  %v1473_v19 = vld [vmem:[#allocation11 + $0xda8] sm:$0xff]  ;;  %v6111_v21 = vcombine.high %v1317_v13, %v1321_v14 }
 0x20c   : > { %4387 = vmatprep.subr.bf16.mxu0 %v6055_v28  ;;  %v1313_v28 = vld [vmem:[#allocation11 + $0x8a8] sm:$0xff]  ;;  %v6262_v37 = vcombine.low %v1469_v25, %v1473_v19 }
 0x20d   : > { %v6102_v40 = vcombine.low %v1309_v0, %v1313_v28  ;;  %v1445_v10 = vld [vmem:[#allocation11 + $0xcc8] sm:$0xff] }
 0x20e   : > { %4351 = vmatpush2.bf16.msra.mxu1 %v5902_v29  ;;  %v6263_v29 = vcombine.high %v1469_v25, %v1473_v19  ;;  %v1413_v18 = vld [vmem:[#allocation11 + $0xbc8] sm:$0xff] }
 0x20f   : > { %4352 = vmatprep.subr.bf16.mxu1 %v5895_v33  ;;  %4388 = vmatpush2.bf16.msra.mxu0 %v6054_v34  ;;  %v1465_v33 = vld [vmem:[#allocation11 + $0xd68] sm:$0xff]  ;;  %v6103_v34 = vcombine.high %v1309_v0, %v1313_v28 }
 0x210   : > { %4389 = vmatprep.subr.bf16.mxu0 %v6047_v39  ;;  %v1305_v39 = vld [vmem:[#allocation11 + $0x868] sm:$0xff]  ;;  %v6254_v46 = vcombine.low %v1461_v32, %v1465_v33 }
 0x211   : > { %v6094_v55 = vcombine.low %v1301_v54, %v1305_v39  ;;  %v1437_v63 = vld [vmem:[#allocation11 + $0xc88] sm:$0xff] }
 0x212   : > { %4353 = vmatpush2.bf16.msra.mxu1 %v5894_v62  ;;  %v6255_v62 = vcombine.high %v1461_v32, %v1465_v33  ;;  %v1405_v4 = vld [vmem:[#allocation11 + $0xb88] sm:$0xff] }
 0x213   : > { %4408 = vmatprep.subr.bf16.mxu1 %v6143_v43  ;;  %4390 = vmatpush2.bf16.msra.mxu0 %v6046_v44  ;;  %v1457_v43 = vld [vmem:[#allocation11 + $0xd28] sm:$0xff]  ;;  %v6095_v44 = vcombine.high %v1301_v54, %v1305_v39 }
 0x214   : > { %4391 = vmatprep.subr.bf16.mxu0 %v6039_v53  ;;  %v1297_v53 = vld [vmem:[#allocation11 + $0x828] sm:$0xff]  ;;  %v6246_v17 = vcombine.low %v1453_v41, %v1457_v43 }
 0x215   : > { %4355 = vmatmul.mubr.bf16.vlgmr.msra.gmra.mxu1 %v7432_v47  ;;  %v6086_v60 = vcombine.low %v1293_v52, %v1297_v53  ;;  %v1429_v9 = vld [vmem:[#allocation11 + $0xc48] sm:$0xff] }
 0x216   : > { %4409 = vmatpush1.bf16.msra.mxu1 %v6142_v61  ;;  %4440 = vmatprep.mubr.bf16.mxu1 %v7463_v42  ;;  %v6247_v61 = vcombine.high %v1453_v41, %v1457_v43  ;;  %v1397_v14 = vld [vmem:[#allocation11 + $0xb48] sm:$0xff] }
 0x217   : > { %4410 = vmatprep.subr.bf16.mxu1 %v6135_v56  ;;  %4392 = vmatpush2.bf16.msra.mxu0 %v6038_v57  ;;  %v1449_v56 = vld [vmem:[#allocation11 + $0xce8] sm:$0xff]  ;;  %v6087_v57 = vcombine.high %v1293_v52, %v1297_v53 }
 0x218   : > { %4393 = vmatprep.subr.bf16.mxu0 %v6031_v58  ;;  %v1417_v58 = vld [vmem:[#allocation11 + $0xbe8] sm:$0xff]  ;;  %v6238_v3 = vcombine.low %v1445_v10, %v1449_v56 }
 0x219   : > { %v6206_v8 = vcombine.low %v1413_v18, %v1417_v58  ;;  %v1421_v19 = vld [vmem:[#allocation11 + $0xc08] sm:$0xff] }
 0x21a   : > { %4411 = vmatpush1.bf16.msra.mxu1 %v6134_v59  ;;  %v6239_v59 = vcombine.high %v1445_v10, %v1449_v56  ;;  %v1389_v28 = vld [vmem:[#allocation11 + $0xb08] sm:$0xff] }
 0x21b   : > { %4412 = vmatprep.subr.bf16.mxu1 %v6127_v1  ;;  %4394 = vmatpush2.bf16.msra.mxu0 %v6030_v2  ;;  %v1441_v1 = vld [vmem:[#allocation11 + $0xca8] sm:$0xff]  ;;  %v6207_v2 = vcombine.high %v1413_v18, %v1417_v58 }
 0x21c   : > { %4395 = vmatprep.subr.bf16.mxu0 %v6023_v6  ;;  %v1409_v6 = vld [vmem:[#allocation11 + $0xba8] sm:$0xff]  ;;  %v6230_v13 = vcombine.low %v1437_v63, %v1441_v1 }
 0x21d   : > { %v6198_v25 = vcombine.low %v1405_v4, %v1409_v6  ;;  %v1541_v33 = vld [vmem:[#allocation11 + $0xfc8] sm:$0xff] }
 0x21e   : > { %4413 = vmatpush1.bf16.msra.mxu1 %v6126_v7  ;;  %v6231_v7 = vcombine.high %v1437_v63, %v1441_v1  ;;  %v1381_v39 = vld [vmem:[#allocation11 + $0xac8] sm:$0xff] }
 0x21f   : > { %4414 = vmatprep.subr.bf16.mxu1 %v6119_v11  ;;  %4396 = vmatpush2.bf16.msra.mxu0 %v6022_v12  ;;  %v1433_v11 = vld [vmem:[#allocation11 + $0xc68] sm:$0xff]  ;;  %v6199_v12 = vcombine.high %v1405_v4, %v1409_v6 }
 0x220   : > { %4451 = vmatprep.subr.bf16.mxu0 %v6271_v15  ;;  %v1401_v15 = vld [vmem:[#allocation11 + $0xb68] sm:$0xff]  ;;  %v6222_v0 = vcombine.low %v1429_v9, %v1433_v11 }
 0x221   : > { %v6190_v32 = vcombine.low %v1397_v14, %v1401_v15  ;;  %v1533_v43 = vld [vmem:[#allocation11 + $0xf88] sm:$0xff] }
 0x222   : > { %4415 = vmatpush1.bf16.msra.mxu1 %v6118_v16  ;;  %4398 = vmatmul.mubr.bf16.vlgmr.msra.gmra.mxu0 %v7460_v36  ;;  %v6223_v16 = vcombine.high %v1429_v9, %v1433_v11  ;;  %v1373_v53 = vld [vmem:[#allocation11 + $0xa88] sm:$0xff] }
 0x223   : > { %4416 = vmatprep.subr.bf16.mxu1 %v6111_v21  ;;  %4452 = vmatpush1.bf16.msra.mxu0 %v6270_v24  ;;  %v1425_v21 = vld [vmem:[#allocation11 + $0xc28] sm:$0xff]  ;;  %v6191_v24 = vcombine.high %v1397_v14, %v1401_v15  ;;  %v1094_v15 = vld [vmem:[#allocation11 + $0x1d0] sm:$0xff] }
 0x224   : > { %4483 = vmatprep.mubr.bf16.mxu0 %v7477_v27  ;;  %4453 = vmatprep.subr.bf16.mxu0 %v6263_v29  ;;  %v1393_v29 = vld [vmem:[#allocation11 + $0xb28] sm:$0xff]  ;;  %v6214_v54 = vcombine.low %v1421_v19, %v1425_v21 }
 0x225   : > { %v6182_v41 = vcombine.low %v1389_v28, %v1393_v29  ;;  %v1525_v56 = vld [vmem:[#allocation11 + $0xf48] sm:$0xff] }
 0x226   : > { %4417 = vmatpush1.bf16.msra.mxu1 %v6110_v30  ;;  %v6215_v30 = vcombine.high %v1421_v19, %v1425_v21  ;;  %v1365_v58 = vld [vmem:[#allocation11 + $0xa48] sm:$0xff] }
 0x227   : > { %4418 = vmatprep.subr.bf16.mxu1 %v6103_v34  ;;  %4454 = vmatpush1.bf16.msra.mxu0 %v6262_v37  ;;  %v1545_v34 = vld [vmem:[#allocation11 + $0xfe8] sm:$0xff]  ;;  %v6183_v37 = vcombine.high %v1389_v28, %v1393_v29  ;;  %v1086_v29 = vld [vmem:[#allocation11 + $0x190] sm:$0xff] }
 0x228   : > { %4455 = vmatprep.subr.bf16.mxu0 %v6255_v62  ;;  %v1385_v62 = vld [vmem:[#allocation11 + $0xae8] sm:$0xff]  ;;  %v6334_v52 = vcombine.low %v1541_v33, %v1545_v34 }
 0x229   : > { %v6174_v10 = vcombine.low %v1381_v39, %v1385_v62  ;;  %v1517_v1 = vld [vmem:[#allocation11 + $0xf08] sm:$0xff] }
 0x22a   : > { %4419 = vmatpush1.bf16.msra.mxu1 %v6102_v40  ;;  %v6335_v40 = vcombine.high %v1541_v33, %v1545_v34  ;;  %v1357_v6 = vld [vmem:[#allocation11 + $0xa08] sm:$0xff] }
 0x22b   : > { %4420 = vmatprep.subr.bf16.mxu1 %v6095_v44  ;;  %4456 = vmatpush1.bf16.msra.mxu0 %v6254_v46  ;;  %v1537_v44 = vld [vmem:[#allocation11 + $0xfa8] sm:$0xff]  ;;  %v6175_v46 = vcombine.high %v1381_v39, %v1385_v62  ;;  %v1078_v62 = vld [vmem:[#allocation11 + $0x150] sm:$0xff] }
 0x22c   : > { %4457 = vmatprep.subr.bf16.mxu0 %v6247_v61  ;;  %v1377_v61 = vld [vmem:[#allocation11 + $0xaa8] sm:$0xff]  ;;  %v6326_v18 = vcombine.low %v1533_v43, %v1537_v44 }
 0x22d   : > { %v6166_v63 = vcombine.low %v1373_v53, %v1377_v61  ;;  %v1509_v11 = vld [vmem:[#allocation11 + $0xec8] sm:$0xff] }
 0x22e   : > { %4421 = vmatpush1.bf16.msra.mxu1 %v6094_v55  ;;  %v6327_v55 = vcombine.high %v1533_v43, %v1537_v44  ;;  %v1501_v21 = vld [vmem:[#allocation11 + $0xe88] sm:$0xff] }
 0x22f   : > { %4422 = vmatprep.subr.bf16.mxu1 %v6087_v57  ;;  %4458 = vmatpush1.bf16.msra.mxu0 %v6246_v17  ;;  %v1529_v57 = vld [vmem:[#allocation11 + $0xf68] sm:$0xff]  ;;  %v6167_v17 = vcombine.high %v1373_v53, %v1377_v61  ;;  %v1070_v61 = vld [vmem:[#allocation11 + $0x110] sm:$0xff] }
 0x230   : > { %4459 = vmatprep.subr.bf16.mxu0 %v6239_v59  ;;  %v1369_v59 = vld [vmem:[#allocation11 + $0xa68] sm:$0xff]  ;;  %v6318_v4 = vcombine.low %v1525_v56, %v1529_v57 }
 0x231   : > { %v6158_v9 = vcombine.low %v1365_v58, %v1369_v59  ;;  %v1493_v34 = vld [vmem:[#allocation11 + $0xe48] sm:$0xff] }
 0x232   : > { %4423 = vmatpush1.bf16.msra.mxu1 %v6086_v60  ;;  %v6319_v60 = vcombine.high %v1525_v56, %v1529_v57  ;;  %v1485_v44 = vld [vmem:[#allocation11 + $0xe08] sm:$0xff]  ;;  %v1222_v57 = vld [vmem:[#allocation11 + $0x5d0] sm:$0xff] }
 0x233   : > { %4424 = vmatprep.subr.bf16.mxu1 %v6207_v2  ;;  %4460 = vmatpush1.bf16.msra.mxu0 %v6238_v3  ;;  %v1521_v2 = vld [vmem:[#allocation11 + $0xf28] sm:$0xff]  ;;  %v6159_v3 = vcombine.high %v1365_v58, %v1369_v59  ;;  %v1062_v59 = vld [vmem:[#allocation11 + $0xd0] sm:$0xff] }
 0x234   : > { %4461 = vmatprep.subr.bf16.mxu0 %v6231_v7  ;;  %v1361_v7 = vld [vmem:[#allocation11 + $0xa28] sm:$0xff]  ;;  %v6310_v14 = vcombine.low %v1517_v1, %v1521_v2 }
 0x235   : > { %v6150_v19 = vcombine.low %v1357_v6, %v1361_v7 }
 0x236   : > { %4425 = vmatpush2.bf16.msra.mxu1 %v6206_v8  ;;  %v6311_v8 = vcombine.high %v1517_v1, %v1521_v2  ;;  %v1214_v2 = vld [vmem:[#allocation11 + $0x590] sm:$0xff] }
 0x237   : > { %4426 = vmatprep.subr.bf16.mxu1 %v6199_v12  ;;  %4462 = vmatpush1.bf16.msra.mxu0 %v6230_v13  ;;  %v1513_v12 = vld [vmem:[#allocation11 + $0xee8] sm:$0xff]  ;;  %v6151_v13 = vcombine.high %v1357_v6, %v1361_v7  ;;  %v1054_v7 = vld [vmem:[#allocation11 + $0x90] sm:$0xff] }
 0x238   : > { %4463 = vmatprep.subr.bf16.mxu0 %v6223_v16  ;;  %v1098_v16 = vld [vmem:[#allocation11 + $0x1f0] sm:$0xff]  ;;  %v6302_v28 = vcombine.low %v1509_v11, %v1513_v12 }
 0x239   : > { %v5888_v33 = vcombine.low %v1094_v15, %v1098_v16 }
 0x23a   : > { %4427 = vmatpush2.bf16.msra.mxu1 %v6198_v25  ;;  %v6303_v25 = vcombine.high %v1509_v11, %v1513_v12  ;;  %v1206_v12 = vld [vmem:[#allocation11 + $0x550] sm:$0xff] }
 0x23b   : > { %4428 = vmatprep.subr.bf16.mxu1 %v6191_v24  ;;  %4464 = vmatpush1.bf16.msra.mxu0 %v6222_v0  ;;  %v1505_v24 = vld [vmem:[#allocation11 + $0xea8] sm:$0xff]  ;;  %v5889_v0 = vcombine.high %v1094_v15, %v1098_v16  ;;  %v1046_v16 = vld [vmem:[#allocation11 + $0x50] sm:$0xff] }
 0x23c   : > { %4465 = vmatprep.subr.bf16.mxu0 %v6215_v30  ;;  %v1090_v30 = vld [vmem:[#allocation11 + $0x1b0] sm:$0xff]  ;;  %v6294_v39 = vcombine.low %v1501_v21, %v1505_v24 }
 0x23d   : > { %v5880_v43 = vcombine.low %v1086_v29, %v1090_v30 }
 0x23e   : > { %4429 = vmatpush2.bf16.msra.mxu1 %v6190_v32  ;;  %v6295_v32 = vcombine.high %v1501_v21, %v1505_v24  ;;  %v1198_v24 = vld [vmem:[#allocation11 + $0x510] sm:$0xff] }
 0x23f   : > { %4430 = vmatprep.subr.bf16.mxu1 %v6183_v37  ;;  %4466 = vmatpush1.bf16.msra.mxu0 %v6214_v54  ;;  %v1497_v37 = vld [vmem:[#allocation11 + $0xe68] sm:$0xff]  ;;  %v5881_v54 = vcombine.high %v1086_v29, %v1090_v30  ;;  %v1038_v30 = vld [vmem:[#allocation11 + $0x10] sm:$0xff] }
 0x240   : > { %4467 = vmatprep.subr.bf16.mxu0 %v6335_v40  ;;  %v1082_v40 = vld [vmem:[#allocation11 + $0x170] sm:$0xff]  ;;  %v6286_v53 = vcombine.low %v1493_v34, %v1497_v37 }
 0x241   : > { %v5872_v56 = vcombine.low %v1078_v62, %v1082_v40 }
 0x242   : > { %4431 = vmatpush2.bf16.msra.mxu1 %v6182_v41  ;;  %v6287_v41 = vcombine.high %v1493_v34, %v1497_v37  ;;  %v1190_v37 = vld [vmem:[#allocation11 + $0x4d0] sm:$0xff] }
 0x243   : > { %4432 = vmatprep.subr.bf16.mxu1 %v6175_v46  ;;  %4468 = vmatpush2.bf16.msra.mxu0 %v6334_v52  ;;  %v1489_v46 = vld [vmem:[#allocation11 + $0xe28] sm:$0xff]  ;;  %v5873_v52 = vcombine.high %v1078_v62, %v1082_v40  ;;  %v1158_v40 = vld [vmem:[#allocation11 + $0x3d0] sm:$0xff] }
 0x244   : > { %4469 = vmatprep.subr.bf16.mxu0 %v6327_v55  ;;  %v1074_v55 = vld [vmem:[#allocation11 + $0x130] sm:$0xff]  ;;  %v6278_v58 = vcombine.low %v1485_v44, %v1489_v46 }
 0x245   : > { %v5864_v1 = vcombine.low %v1070_v61, %v1074_v55 }
 0x246   : > { %4433 = vmatpush2.bf16.msra.mxu1 %v6174_v10  ;;  %v6279_v10 = vcombine.high %v1485_v44, %v1489_v46  ;;  %v1182_v46 = vld [vmem:[#allocation11 + $0x490] sm:$0xff] }
 0x247   : > { %4434 = vmatprep.subr.bf16.mxu1 %v6167_v17  ;;  %4470 = vmatpush2.bf16.msra.mxu0 %v6326_v18  ;;  %v1226_v17 = vld [vmem:[#allocation11 + $0x5f0] sm:$0xff]  ;;  %v5865_v18 = vcombine.high %v1070_v61, %v1074_v55 }
 0x248   : > { %4471 = vmatprep.subr.bf16.mxu0 %v6319_v60  ;;  %v1066_v60 = vld [vmem:[#allocation11 + $0xf0] sm:$0xff]  ;;  %v6016_v6 = vcombine.low %v1222_v57, %v1226_v17 }
 0x249   : > { %v5856_v11 = vcombine.low %v1062_v59, %v1066_v60  ;;  %v1150_v55 = vld [vmem:[#allocation11 + $0x390] sm:$0xff] }
 0x24a   : > { %4435 = vmatpush2.bf16.msra.mxu1 %v6166_v63  ;;  %v6017_v63 = vcombine.high %v1222_v57, %v1226_v17  ;;  %v1174_v17 = vld [vmem:[#allocation11 + $0x450] sm:$0xff] }
 0x24b   : > { %4436 = vmatprep.subr.bf16.mxu1 %v6159_v3  ;;  %4472 = vmatpush2.bf16.msra.mxu0 %v6318_v4  ;;  %v1218_v3 = vld [vmem:[#allocation11 + $0x5b0] sm:$0xff]  ;;  %v5857_v4 = vcombine.high %v1062_v59, %v1066_v60 }
 0x24c   : > { %4473 = vmatprep.subr.bf16.mxu0 %v6311_v8  ;;  %v1058_v8 = vld [vmem:[#allocation11 + $0xb0] sm:$0xff]  ;;  %v6008_v15 = vcombine.low %v1214_v2, %v1218_v3 }
 0x24d   : > { %v5848_v21 = vcombine.low %v1054_v7, %v1058_v8  ;;  %v1142_v60 = vld [vmem:[#allocation11 + $0x350] sm:$0xff] }
 0x24e   : > { %4437 = vmatpush2.bf16.msra.mxu1 %v6158_v9  ;;  %v6009_v9 = vcombine.high %v1214_v2, %v1218_v3  ;;  %v1166_v3 = vld [vmem:[#allocation11 + $0x410] sm:$0xff] }
 0x24f   : > { %4438 = vmatprep.subr.bf16.mxu1 %v6151_v13  ;;  %4474 = vmatpush2.bf16.msra.mxu0 %v6310_v14  ;;  %v1210_v13 = vld [vmem:[#allocation11 + $0x570] sm:$0xff]  ;;  %v5849_v14 = vcombine.high %v1054_v7, %v1058_v8 }
 0x250   : > { %4475 = vmatprep.subr.bf16.mxu0 %v6303_v25  ;;  %v1050_v25 = vld [vmem:[#allocation11 + $0x70] sm:$0xff]  ;;  %v6000_v29 = vcombine.low %v1206_v12, %v1210_v13 }
 0x251   : > { %v5840_v34 = vcombine.low %v1046_v16, %v1050_v25  ;;  %v1134_v8 = vld [vmem:[#allocation11 + $0x310] sm:$0xff] }
 0x252   : > { %4439 = vmatpush2.bf16.msra.mxu1 %v6150_v19  ;;  %v6001_v19 = vcombine.high %v1206_v12, %v1210_v13  ;;  %v1286_v13 = vld [vmem:[#allocation11 + $0x7d0] sm:$0xff] }
 0x253   : > { %4494 = vmatprep.subr.bf16.mxu1 %v5889_v0  ;;  %4476 = vmatpush2.bf16.msra.mxu0 %v6302_v28  ;;  %v1202_v0 = vld [vmem:[#allocation11 + $0x530] sm:$0xff]  ;;  %v5841_v28 = vcombine.high %v1046_v16, %v1050_v25 }
 0x254   : > { %4477 = vmatprep.subr.bf16.mxu0 %v6295_v32  ;;  %v1042_v32 = vld [vmem:[#allocation11 + $0x30] sm:$0xff]  ;;  %v5992_v62 = vcombine.low %v1198_v24, %v1202_v0 }
 0x255   : > { %4441 = vmatmul.mubr.bf16.vlgmr.msra.gmra.mxu1 %v7486_v20  ;;  %v5832_v44 = vcombine.low %v1038_v30, %v1042_v32  ;;  %v1126_v25 = vld [vmem:[#allocation11 + $0x2d0] sm:$0xff] }
 0x256   : > { %4495 = vmatpush1.bf16.msra.mxu1 %v5888_v33  ;;  %4526 = vmatprep.mubr.bf16.mxu1 %v7434_v48  ;;  %v5993_v33 = vcombine.high %v1198_v24, %v1202_v0  ;;  %v1278_v0 = vld [vmem:[#allocation11 + $0x790] sm:$0xff] }
 0x257   : > { %4496 = vmatprep.subr.bf16.mxu1 %v5881_v54  ;;  %4478 = vmatpush2.bf16.msra.mxu0 %v6294_v39  ;;  %v1194_v54 = vld [vmem:[#allocation11 + $0x4f0] sm:$0xff]  ;;  %v5833_v39 = vcombine.high %v1038_v30, %v1042_v32 }
 0x258   : > { %4479 = vmatprep.subr.bf16.mxu0 %v6287_v41  ;;  %v1162_v41 = vld [vmem:[#allocation11 + $0x3f0] sm:$0xff]  ;;  %v5984_v61 = vcombine.low %v1190_v37, %v1194_v54 }
 0x259   : > { %v5952_v57 = vcombine.low %v1158_v40, %v1162_v41  ;;  %v1118_v32 = vld [vmem:[#allocation11 + $0x290] sm:$0xff] }
 0x25a   : > { %4497 = vmatpush1.bf16.msra.mxu1 %v5880_v43  ;;  %v5985_v43 = vcombine.high %v1190_v37, %v1194_v54  ;;  %v1270_v54 = vld [vmem:[#allocation11 + $0x750] sm:$0xff] }
 0x25b   : > { %4498 = vmatprep.subr.bf16.mxu1 %v5873_v52  ;;  %4480 = vmatpush2.bf16.msra.mxu0 %v6286_v53  ;;  %v1186_v52 = vld [vmem:[#allocation11 + $0x4b0] sm:$0xff]  ;;  %v5953_v53 = vcombine.high %v1158_v40, %v1162_v41 }
 0x25c   : > { %4481 = vmatprep.subr.bf16.mxu0 %v6279_v10  ;;  %v1154_v10 = vld [vmem:[#allocation11 + $0x3b0] sm:$0xff]  ;;  %v5976_v59 = vcombine.low %v1182_v46, %v1186_v52 }
 0x25d   : > { %v5944_v2 = vcombine.low %v1150_v55, %v1154_v10  ;;  %v1110_v41 = vld [vmem:[#allocation11 + $0x250] sm:$0xff] }
 0x25e   : > { %4499 = vmatpush1.bf16.msra.mxu1 %v5872_v56  ;;  %v5977_v56 = vcombine.high %v1182_v46, %v1186_v52  ;;  %v1262_v52 = vld [vmem:[#allocation11 + $0x710] sm:$0xff] }
 0x25f   : > { %4500 = vmatprep.subr.bf16.mxu1 %v5865_v18  ;;  %4482 = vmatpush2.bf16.msra.mxu0 %v6278_v58  ;;  %v1178_v18 = vld [vmem:[#allocation11 + $0x470] sm:$0xff]  ;;  %v5945_v58 = vcombine.high %v1150_v55, %v1154_v10 }
 0x260   : > { %4537 = vmatprep.subr.bf16.mxu0 %v6017_v63  ;;  %v1146_v63 = vld [vmem:[#allocation11 + $0x370] sm:$0xff]  ;;  %v5968_v7 = vcombine.low %v1174_v17, %v1178_v18 }
 0x261   : > { %v5936_v12 = vcombine.low %v1142_v60, %v1146_v63  ;;  %v1102_v10 = vld [vmem:[#allocation11 + $0x210] sm:$0xff] }
 0x262   : > { %4501 = vmatpush1.bf16.msra.mxu1 %v5864_v1  ;;  %4484 = vmatmul.mubr.bf16.vlgmr.msra.gmra.mxu0 %v7496_v45  ;;  %v5969_v1 = vcombine.high %v1174_v17, %v1178_v18  ;;  %v1254_v18 = vld [vmem:[#allocation11 + $0x6d0] sm:$0xff] }
 0x263   : > { %4502 = vmatprep.subr.bf16.mxu1 %v5857_v4  ;;  %4538 = vmatpush1.bf16.msra.mxu0 %v6016_v6  ;;  %v1170_v4 = vld [vmem:[#allocation11 + $0x430] sm:$0xff]  ;;  %v5937_v6 = vcombine.high %v1142_v60, %v1146_v63 }
 0x264   : > { %4569 = vmatprep.mubr.bf16.mxu0 %v7457_v31  ;;  %4539 = vmatprep.subr.bf16.mxu0 %v6009_v9  ;;  %v1138_v9 = vld [vmem:[#allocation11 + $0x330] sm:$0xff]  ;;  %v5960_v16 = vcombine.low %v1166_v3, %v1170_v4 }
 0x265   : > { %v5928_v24 = vcombine.low %v1134_v8, %v1138_v9  ;;  %v1350_v63 = vld [vmem:[#allocation11 + $0x9d0] sm:$0xff] }
 0x266   : > { %4503 = vmatpush1.bf16.msra.mxu1 %v5856_v11  ;;  %v5961_v11 = vcombine.high %v1166_v3, %v1170_v4  ;;  %v1246_v4 = vld [vmem:[#allocation11 + $0x690] sm:$0xff] }
 0x267   : > { %4504 = vmatprep.subr.bf16.mxu1 %v5849_v14  ;;  %4540 = vmatpush1.bf16.msra.mxu0 %v6008_v15  ;;  %v1290_v14 = vld [vmem:[#allocation11 + $0x7f0] sm:$0xff]  ;;  %v5929_v15 = vcombine.high %v1134_v8, %v1138_v9 }
 0x268   : > { %4541 = vmatprep.subr.bf16.mxu0 %v6001_v19  ;;  %v1130_v19 = vld [vmem:[#allocation11 + $0x2f0] sm:$0xff]  ;;  %v6080_v30 = vcombine.low %v1286_v13, %v1290_v14 }
 0x269   : > { %v5920_v37 = vcombine.low %v1126_v25, %v1130_v19  ;;  %v1342_v9 = vld [vmem:[#allocation11 + $0x990] sm:$0xff] }
 0x26a   : > { %4505 = vmatpush1.bf16.msra.mxu1 %v5848_v21  ;;  %v6081_v21 = vcombine.high %v1286_v13, %v1290_v14  ;;  %v1238_v14 = vld [vmem:[#allocation11 + $0x650] sm:$0xff] }
 0x26b   : > { %4506 = vmatprep.subr.bf16.mxu1 %v5841_v28  ;;  %4542 = vmatpush1.bf16.msra.mxu0 %v6000_v29  ;;  %v1282_v28 = vld [vmem:[#allocation11 + $0x7b0] sm:$0xff]  ;;  %v5921_v29 = vcombine.high %v1126_v25, %v1130_v19 }
 0x26c   : > { %4543 = vmatprep.subr.bf16.mxu0 %v5993_v33  ;;  %v1122_v33 = vld [vmem:[#allocation11 + $0x2b0] sm:$0xff]  ;;  %v6072_v40 = vcombine.low %v1278_v0, %v1282_v28 }
 0x26d   : > { %v5912_v46 = vcombine.low %v1118_v32, %v1122_v33  ;;  %v1334_v19 = vld [vmem:[#allocation11 + $0x950] sm:$0xff] }
 0x26e   : > { %4507 = vmatpush1.bf16.msra.mxu1 %v5840_v34  ;;  %v6073_v34 = vcombine.high %v1278_v0, %v1282_v28  ;;  %v1230_v28 = vld [vmem:[#allocation11 + $0x610] sm:$0xff] }
 0x26f   : > { %4508 = vmatprep.subr.bf16.mxu1 %v5833_v39  ;;  %4544 = vmatpush1.bf16.msra.mxu0 %v5992_v62  ;;  %v1274_v39 = vld [vmem:[#allocation11 + $0x770] sm:$0xff]  ;;  %v5913_v62 = vcombine.high %v1118_v32, %v1122_v33 }
 0x270   : > { %4545 = vmatprep.subr.bf16.mxu0 %v5985_v43  ;;  %v1114_v43 = vld [vmem:[#allocation11 + $0x270] sm:$0xff]  ;;  %v6064_v55 = vcombine.low %v1270_v54, %v1274_v39 }
 0x271   : > { %v5904_v17 = vcombine.low %v1110_v41, %v1114_v43  ;;  %v1326_v33 = vld [vmem:[#allocation11 + $0x910] sm:$0xff] }
 0x272   : > { %4509 = vmatpush1.bf16.msra.mxu1 %v5832_v44  ;;  %v6065_v44 = vcombine.high %v1270_v54, %v1274_v39  ;;  %v1478_v39 = vld [vmem:[#allocation11 + $0xdd0] sm:$0xff] }
 0x273   : > { %4510 = vmatprep.subr.bf16.mxu1 %v5953_v53  ;;  %4546 = vmatpush1.bf16.msra.mxu0 %v5984_v61  ;;  %v1266_v53 = vld [vmem:[#allocation11 + $0x730] sm:$0xff]  ;;  %v5905_v61 = vcombine.high %v1110_v41, %v1114_v43 }
 0x274   : > { %4547 = vmatprep.subr.bf16.mxu0 %v5977_v56  ;;  %v1106_v56 = vld [vmem:[#allocation11 + $0x230] sm:$0xff]  ;;  %v6056_v60 = vcombine.low %v1262_v52, %v1266_v53 }
 0x275   : > { %v5896_v3 = vcombine.low %v1102_v10, %v1106_v56  ;;  %v1318_v43 = vld [vmem:[#allocation11 + $0x8d0] sm:$0xff] }
 0x276   : > { %4511 = vmatpush2.bf16.msra.mxu1 %v5952_v57  ;;  %v6057_v57 = vcombine.high %v1262_v52, %v1266_v53  ;;  %v1470_v53 = vld [vmem:[#allocation11 + $0xd90] sm:$0xff] }
 0x277   : > { %4512 = vmatprep.subr.bf16.mxu1 %v5945_v58  ;;  %4548 = vmatpush1.bf16.msra.mxu0 %v5976_v59  ;;  %v1258_v58 = vld [vmem:[#allocation11 + $0x6f0] sm:$0xff]  ;;  %v5897_v59 = vcombine.high %v1102_v10, %v1106_v56 }
 0x278   : > { %4549 = vmatprep.subr.bf16.mxu0 %v5969_v1  ;;  %v1354_v1 = vld [vmem:[#allocation11 + $0x9f0] sm:$0xff]  ;;  %v6048_v8 = vcombine.low %v1254_v18, %v1258_v58 }
 0x279   : > { %v6144_v13 = vcombine.low %v1350_v63, %v1354_v1  ;;  %v1310_v56 = vld [vmem:[#allocation11 + $0x890] sm:$0xff] }
 0x27a   : > { %4513 = vmatpush2.bf16.msra.mxu1 %v5944_v2  ;;  %v6049_v2 = vcombine.high %v1254_v18, %v1258_v58  ;;  %v1462_v58 = vld [vmem:[#allocation11 + $0xd50] sm:$0xff] }
 0x27b   : > { %4514 = vmatprep.subr.bf16.mxu1 %v5937_v6  ;;  %4550 = vmatpush1.bf16.msra.mxu0 %v5968_v7  ;;  %v1250_v6 = vld [vmem:[#allocation11 + $0x6b0] sm:$0xff]  ;;  %v6145_v7 = vcombine.high %v1350_v63, %v1354_v1 }
 0x27c   : > { %4551 = vmatprep.subr.bf16.mxu0 %v5961_v11  ;;  %v1346_v11 = vld [vmem:[#allocation11 + $0x9b0] sm:$0xff]  ;;  %v6040_v25 = vcombine.low %v1246_v4, %v1250_v6 }
 0x27d   : > { %v6136_v0 = vcombine.low %v1342_v9, %v1346_v11  ;;  %v1302_v1 = vld [vmem:[#allocation11 + $0x850] sm:$0xff] }
 0x27e   : > { %4515 = vmatpush2.bf16.msra.mxu1 %v5936_v12  ;;  %v6041_v12 = vcombine.high %v1246_v4, %v1250_v6  ;;  %v1454_v6 = vld [vmem:[#allocation11 + $0xd10] sm:$0xff] }
 0x27f   : > { %4516 = vmatprep.subr.bf16.mxu1 %v5929_v15  ;;  %4552 = vmatpush1.bf16.msra.mxu0 %v5960_v16  ;;  %v1242_v15 = vld [vmem:[#allocation11 + $0x670] sm:$0xff]  ;;  %v6137_v16 = vcombine.high %v1342_v9, %v1346_v11 }
 0x280   : > { %4553 = vmatprep.subr.bf16.mxu0 %v6081_v21  ;;  %v1338_v21 = vld [vmem:[#allocation11 + $0x970] sm:$0xff]  ;;  %v6032_v32 = vcombine.low %v1238_v14, %v1242_v15 }
 0x281   : > { %v6128_v54 = vcombine.low %v1334_v19, %v1338_v21  ;;  %v1294_v11 = vld [vmem:[#allocation11 + $0x810] sm:$0xff] }
 0x282   : > { %4517 = vmatpush2.bf16.msra.mxu1 %v5928_v24  ;;  %v6033_v24 = vcombine.high %v1238_v14, %v1242_v15  ;;  %v1446_v15 = vld [vmem:[#allocation11 + $0xcd0] sm:$0xff] }
 0x283   : > { %4518 = vmatprep.subr.bf16.mxu1 %v5921_v29  ;;  %4554 = vmatpush2.bf16.msra.mxu0 %v6080_v30  ;;  %v1234_v29 = vld [vmem:[#allocation11 + $0x630] sm:$0xff]  ;;  %v6129_v30 = vcombine.high %v1334_v19, %v1338_v21 }
 0x284   : > { %4555 = vmatprep.subr.bf16.mxu0 %v6073_v34  ;;  %v1330_v34 = vld [vmem:[#allocation11 + $0x930] sm:$0xff]  ;;  %v6024_v41 = vcombine.low %v1230_v28, %v1234_v29 }
 0x285   : > { %v6120_v52 = vcombine.low %v1326_v33, %v1330_v34  ;;  %v1414_v21 = vld [vmem:[#allocation11 + $0xbd0] sm:$0xff] }
 0x286   : > { %4519 = vmatpush2.bf16.msra.mxu1 %v5920_v37  ;;  %v6025_v37 = vcombine.high %v1230_v28, %v1234_v29  ;;  %v1438_v29 = vld [vmem:[#allocation11 + $0xc90] sm:$0xff] }
 0x287   : > { %4520 = vmatprep.subr.bf16.mxu1 %v5913_v62  ;;  %4556 = vmatpush2.bf16.msra.mxu0 %v6072_v40  ;;  %v1482_v62 = vld [vmem:[#allocation11 + $0xdf0] sm:$0xff]  ;;  %v6121_v40 = vcombine.high %v1326_v33, %v1330_v34 }
 0x288   : > { %4557 = vmatprep.subr.bf16.mxu0 %v6065_v44  ;;  %v1322_v44 = vld [vmem:[#allocation11 + $0x8f0] sm:$0xff]  ;;  %v6272_v10 = vcombine.low %v1478_v39, %v1482_v62 }
 0x289   : > { %v6112_v18 = vcombine.low %v1318_v43, %v1322_v44  ;;  %v1406_v34 = vld [vmem:[#allocation11 + $0xb90] sm:$0xff] }
 0x28a   : > { %4521 = vmatpush2.bf16.msra.mxu1 %v5912_v46  ;;  %v6273_v46 = vcombine.high %v1478_v39, %v1482_v62  ;;  %v1430_v62 = vld [vmem:[#allocation11 + $0xc50] sm:$0xff] }
 0x28b   : > { %4522 = vmatprep.subr.bf16.mxu1 %v5905_v61  ;;  %4558 = vmatpush2.bf16.msra.mxu0 %v6064_v55  ;;  %v1474_v61 = vld [vmem:[#allocation11 + $0xdb0] sm:$0xff]  ;;  %v6113_v55 = vcombine.high %v1318_v43, %v1322_v44 }
 0x28c   : > { %4559 = vmatprep.subr.bf16.mxu0 %v6057_v57  ;;  %v1314_v57 = vld [vmem:[#allocation11 + $0x8b0] sm:$0xff]  ;;  %v6264_v63 = vcombine.low %v1470_v53, %v1474_v61 }
 0x28d   : > { %v6104_v4 = vcombine.low %v1310_v56, %v1314_v57  ;;  %v1398_v44 = vld [vmem:[#allocation11 + $0xb50] sm:$0xff] }
 0x28e   : > { %4523 = vmatpush2.bf16.msra.mxu1 %v5904_v17  ;;  %v6265_v17 = vcombine.high %v1470_v53, %v1474_v61  ;;  %v1422_v61 = vld [vmem:[#allocation11 + $0xc10] sm:$0xff] }
 0x28f   : > { %4524 = vmatprep.subr.bf16.mxu1 %v5897_v59  ;;  %4560 = vmatpush2.bf16.msra.mxu0 %v6056_v60  ;;  %v1466_v59 = vld [vmem:[#allocation11 + $0xd70] sm:$0xff]  ;;  %v6105_v60 = vcombine.high %v1310_v56, %v1314_v57 }
 0x290   : > { %4561 = vmatprep.subr.bf16.mxu0 %v6049_v2  ;;  %v1306_v2 = vld [vmem:[#allocation11 + $0x870] sm:$0xff]  ;;  %v6256_v9 = vcombine.low %v1462_v58, %v1466_v59 }
 0x291   : > { %v6096_v14 = vcombine.low %v1302_v1, %v1306_v2  ;;  %v1390_v57 = vld [vmem:[#allocation11 + $0xb10] sm:$0xff] }
 0x292   : > { %4525 = vmatpush2.bf16.msra.mxu1 %v5896_v3  ;;  %v6257_v3 = vcombine.high %v1462_v58, %v1466_v59  ;;  %v1542_v59 = vld [vmem:[#allocation11 + $0xfd0] sm:$0xff] }
 0x293   : > { %4580 = vmatprep.subr.bf16.mxu1 %v6145_v7  ;;  %4562 = vmatpush2.bf16.msra.mxu0 %v6048_v8  ;;  %v1458_v7 = vld [vmem:[#allocation11 + $0xd30] sm:$0xff]  ;;  %v6097_v8 = vcombine.high %v1302_v1, %v1306_v2 }
 0x294   : > { %4563 = vmatprep.subr.bf16.mxu0 %v6041_v12  ;;  %v1298_v12 = vld [vmem:[#allocation11 + $0x830] sm:$0xff]  ;;  %v6248_v19 = vcombine.low %v1454_v6, %v1458_v7 }
 0x295   : > { %4527 = vmatmul.mubr.bf16.vlgmr.msra.gmra.mxu1 %v7432_v47  ;;  %v6088_v28 = vcombine.low %v1294_v11, %v1298_v12  ;;  %v1382_v2 = vld [vmem:[#allocation11 + $0xad0] sm:$0xff] }
 0x296   : > { %4581 = vmatpush1.bf16.msra.mxu1 %v6144_v13  ;;  %4612 = vmatprep.mubr.bf16.mxu1 %v7463_v42  ;;  %v6249_v13 = vcombine.high %v1454_v6, %v1458_v7  ;;  %v1534_v7 = vld [vmem:[#allocation11 + $0xf90] sm:$0xff] }
 0x297   : > { %4582 = vmatprep.subr.bf16.mxu1 %v6137_v16  ;;  %4564 = vmatpush2.bf16.msra.mxu0 %v6040_v25  ;;  %v1450_v16 = vld [vmem:[#allocation11 + $0xcf0] sm:$0xff]  ;;  %v6089_v25 = vcombine.high %v1294_v11, %v1298_v12 }
 0x298   : > { %4565 = vmatprep.subr.bf16.mxu0 %v6033_v24  ;;  %v1418_v24 = vld [vmem:[#allocation11 + $0xbf0] sm:$0xff]  ;;  %v6240_v33 = vcombine.low %v1446_v15, %v1450_v16 }
 0x299   : > { %v6208_v39 = vcombine.low %v1414_v21, %v1418_v24  ;;  %v1374_v12 = vld [vmem:[#allocation11 + $0xa90] sm:$0xff] }
 0x29a   : > { %4583 = vmatpush1.bf16.msra.mxu1 %v6136_v0  ;;  %v6241_v0 = vcombine.high %v1446_v15, %v1450_v16  ;;  %v1526_v16 = vld [vmem:[#allocation11 + $0xf50] sm:$0xff] }
 0x29b   : > { %4584 = vmatprep.subr.bf16.mxu1 %v6129_v30  ;;  %4566 = vmatpush2.bf16.msra.mxu0 %v6032_v32  ;;  %v1442_v30 = vld [vmem:[#allocation11 + $0xcb0] sm:$0xff]  ;;  %v6209_v32 = vcombine.high %v1414_v21, %v1418_v24 }
 0x29c   : > { %4567 = vmatprep.subr.bf16.mxu0 %v6025_v37  ;;  %v1410_v37 = vld [vmem:[#allocation11 + $0xbb0] sm:$0xff]  ;;  %v6232_v43 = vcombine.low %v1438_v29, %v1442_v30 }
 0x29d   : > { %v6200_v53 = vcombine.low %v1406_v34, %v1410_v37  ;;  %v1366_v24 = vld [vmem:[#allocation11 + $0xa50] sm:$0xff] }
 0x29e   : > { %4585 = vmatpush1.bf16.msra.mxu1 %v6128_v54  ;;  %v6233_v54 = vcombine.high %v1438_v29, %v1442_v30  ;;  %v1518_v30 = vld [vmem:[#allocation11 + $0xf10] sm:$0xff] }
 0x29f   : > { %4586 = vmatprep.subr.bf16.mxu1 %v6121_v40  ;;  %4568 = vmatpush2.bf16.msra.mxu0 %v6024_v41  ;;  %v1434_v40 = vld [vmem:[#allocation11 + $0xc70] sm:$0xff]  ;;  %v6201_v41 = vcombine.high %v1406_v34, %v1410_v37 }
 0x2a0   : > { %4623 = vmatprep.subr.bf16.mxu0 %v6273_v46  ;;  %v1402_v46 = vld [vmem:[#allocation11 + $0xb70] sm:$0xff]  ;;  %v6224_v56 = vcombine.low %v1430_v62, %v1434_v40 }
 0x2a1   : > { %v6192_v58 = vcombine.low %v1398_v44, %v1402_v46  ;;  %v1358_v37 = vld [vmem:[#allocation11 + $0xa10] sm:$0xff] }
 0x2a2   : > { %4587 = vmatpush1.bf16.msra.mxu1 %v6120_v52  ;;  %4570 = vmatmul.mubr.bf16.vlgmr.msra.gmra.mxu0 %v7460_v36  ;;  %v6225_v52 = vcombine.high %v1430_v62, %v1434_v40  ;;  %v1510_v40 = vld [vmem:[#allocation11 + $0xed0] sm:$0xff] }
 0x2a3   : > { %4588 = vmatprep.subr.bf16.mxu1 %v6113_v55  ;;  %4624 = vmatpush1.bf16.msra.mxu0 %v6272_v10  ;;  %v1426_v55 = vld [vmem:[#allocation11 + $0xc30] sm:$0xff]  ;;  %v6193_v10 = vcombine.high %v1398_v44, %v1402_v46  ;;  %v1095_v46 = vld [vmem:[#allocation11 + $0x1d8] sm:$0xff] }
 0x2a4   : > { %4655 = vmatprep.mubr.bf16.mxu0 %v7477_v27  ;;  %4625 = vmatprep.subr.bf16.mxu0 %v6265_v17  ;;  %v1394_v17 = vld [vmem:[#allocation11 + $0xb30] sm:$0xff]  ;;  %v6216_v1 = vcombine.low %v1422_v61, %v1426_v55 }
 0x2a5   : > { %v6184_v6 = vcombine.low %v1390_v57, %v1394_v17 }
 0x2a6   : > { %4589 = vmatpush1.bf16.msra.mxu1 %v6112_v18  ;;  %v6217_v18 = vcombine.high %v1422_v61, %v1426_v55  ;;  %v1502_v55 = vld [vmem:[#allocation11 + $0xe90] sm:$0xff] }
 0x2a7   : > { %4590 = vmatprep.subr.bf16.mxu1 %v6105_v60  ;;  %4626 = vmatpush1.bf16.msra.mxu0 %v6264_v63  ;;  %v1546_v60 = vld [vmem:[#allocation11 + $0xff0] sm:$0xff]  ;;  %v6185_v63 = vcombine.high %v1390_v57, %v1394_v17  ;;  %v1087_v17 = vld [vmem:[#allocation11 + $0x198] sm:$0xff] }
 0x2a8   : > { %4627 = vmatprep.subr.bf16.mxu0 %v6257_v3  ;;  %v1386_v3 = vld [vmem:[#allocation11 + $0xaf0] sm:$0xff]  ;;  %v6336_v11 = vcombine.low %v1542_v59, %v1546_v60 }
 0x2a9   : > { %v6176_v15 = vcombine.low %v1382_v2, %v1386_v3 }
 0x2aa   : > { %4591 = vmatpush1.bf16.msra.mxu1 %v6104_v4  ;;  %v6337_v4 = vcombine.high %v1542_v59, %v1546_v60  ;;  %v1494_v60 = vld [vmem:[#allocation11 + $0xe50] sm:$0xff] }
 0x2ab   : > { %4592 = vmatprep.subr.bf16.mxu1 %v6097_v8  ;;  %4628 = vmatpush1.bf16.msra.mxu0 %v6256_v9  ;;  %v1538_v8 = vld [vmem:[#allocation11 + $0xfb0] sm:$0xff]  ;;  %v6177_v9 = vcombine.high %v1382_v2, %v1386_v3  ;;  %v1079_v3 = vld [vmem:[#allocation11 + $0x158] sm:$0xff] }
 0x2ac   : > { %4629 = vmatprep.subr.bf16.mxu0 %v6249_v13  ;;  %v1378_v13 = vld [vmem:[#allocation11 + $0xab0] sm:$0xff]  ;;  %v6328_v21 = vcombine.low %v1534_v7, %v1538_v8 }
 0x2ad   : > { %v6168_v29 = vcombine.low %v1374_v12, %v1378_v13 }
 0x2ae   : > { %4593 = vmatpush1.bf16.msra.mxu1 %v6096_v14  ;;  %v6329_v14 = vcombine.high %v1534_v7, %v1538_v8  ;;  %v1486_v8 = vld [vmem:[#allocation11 + $0xe10] sm:$0xff] }
 0x2af   : > { %4594 = vmatprep.subr.bf16.mxu1 %v6089_v25  ;;  %4630 = vmatpush1.bf16.msra.mxu0 %v6248_v19  ;;  %v1530_v25 = vld [vmem:[#allocation11 + $0xf70] sm:$0xff]  ;;  %v6169_v19 = vcombine.high %v1374_v12, %v1378_v13  ;;  %v1071_v13 = vld [vmem:[#allocation11 + $0x118] sm:$0xff] }
 0x2b0   : > { %4631 = vmatprep.subr.bf16.mxu0 %v6241_v0  ;;  %v1370_v0 = vld [vmem:[#allocation11 + $0xa70] sm:$0xff]  ;;  %v6320_v34 = vcombine.low %v1526_v16, %v1530_v25 }
 0x2b1   : > { %v6160_v62 = vcombine.low %v1366_v24, %v1370_v0 }
 0x2b2   : > { %4595 = vmatpush1.bf16.msra.mxu1 %v6088_v28  ;;  %v6321_v28 = vcombine.high %v1526_v16, %v1530_v25  ;;  %v1223_v25 = vld [vmem:[#allocation11 + $0x5d8] sm:$0xff] }
 0x2b3   : > { %4596 = vmatprep.subr.bf16.mxu1 %v6209_v32  ;;  %4632 = vmatpush1.bf16.msra.mxu0 %v6240_v33  ;;  %v1522_v32 = vld [vmem:[#allocation11 + $0xf30] sm:$0xff]  ;;  %v6161_v33 = vcombine.high %v1366_v24, %v1370_v0  ;;  %v1067_v0 = vld [vmem:[#allocation11 + $0xf8] sm:$0xff] }
 0x2b4   : > { %4633 = vmatprep.subr.bf16.mxu0 %v6233_v54  ;;  %v1362_v54 = vld [vmem:[#allocation11 + $0xa30] sm:$0xff]  ;;  %v6312_v44 = vcombine.low %v1518_v30, %v1522_v32 }
 0x2b5   : > { %v6152_v61 = vcombine.low %v1358_v37, %v1362_v54 }
 0x2b6   : > { %4597 = vmatpush2.bf16.msra.mxu1 %v6208_v39  ;;  %v6313_v39 = vcombine.high %v1518_v30, %v1522_v32  ;;  %v1215_v30 = vld [vmem:[#allocation11 + $0x598] sm:$0xff] }
 0x2b7   : > { %4598 = vmatprep.subr.bf16.mxu1 %v6201_v41  ;;  %4634 = vmatpush1.bf16.msra.mxu0 %v6232_v43  ;;  %v1514_v41 = vld [vmem:[#allocation11 + $0xef0] sm:$0xff]  ;;  %v6153_v43 = vcombine.high %v1358_v37, %v1362_v54  ;;  %v1219_v32 = vld [vmem:[#allocation11 + $0x5b8] sm:$0xff] }
 0x2b8   : > { %4635 = vmatprep.subr.bf16.mxu0 %v6225_v52  ;;  %v1099_v52 = vld [vmem:[#allocation11 + $0x1f8] sm:$0xff]  ;;  %v6304_v57 = vcombine.low %v1510_v40, %v1514_v41 }
 0x2b9   : > { %v5890_v59 = vcombine.low %v1095_v46, %v1099_v52  ;;  %v1055_v37 = vld [vmem:[#allocation11 + $0x98] sm:$0xff] }
 0x2ba   : > { %4599 = vmatpush2.bf16.msra.mxu1 %v6200_v53  ;;  %v6305_v53 = vcombine.high %v1510_v40, %v1514_v41  ;;  %v1059_v54 = vld [vmem:[#allocation11 + $0xb8] sm:$0xff] }
 0x2bb   : > { %4600 = vmatprep.subr.bf16.mxu1 %v6193_v10  ;;  %4636 = vmatpush1.bf16.msra.mxu0 %v6224_v56  ;;  %v1506_v10 = vld [vmem:[#allocation11 + $0xeb0] sm:$0xff]  ;;  %v5891_v56 = vcombine.high %v1095_v46, %v1099_v52  ;;  %v1207_v40 = vld [vmem:[#allocation11 + $0x558] sm:$0xff] }
 0x2bc   : > { %4637 = vmatprep.subr.bf16.mxu0 %v6217_v18  ;;  %v1091_v18 = vld [vmem:[#allocation11 + $0x1b8] sm:$0xff]  ;;  %v6296_v2 = vcombine.low %v1502_v55, %v1506_v10 }
 0x2bd   : > { %v5882_v7 = vcombine.low %v1087_v17, %v1091_v18  ;;  %v1211_v41 = vld [vmem:[#allocation11 + $0x578] sm:$0xff] }
 0x2be   : > { %4601 = vmatpush2.bf16.msra.mxu1 %v6192_v58  ;;  %v6297_v58 = vcombine.high %v1502_v55, %v1506_v10  ;;  %v1047_v46 = vld [vmem:[#allocation11 + $0x58] sm:$0xff] }
 0x2bf   : > { %4602 = vmatprep.subr.bf16.mxu1 %v6185_v63  ;;  %4638 = vmatpush1.bf16.msra.mxu0 %v6216_v1  ;;  %v1498_v63 = vld [vmem:[#allocation11 + $0xe70] sm:$0xff]  ;;  %v5883_v1 = vcombine.high %v1087_v17, %v1091_v18  ;;  %v1051_v52 = vld [vmem:[#allocation11 + $0x78] sm:$0xff] }
 0x2c0   : > { %4639 = vmatprep.subr.bf16.mxu0 %v6337_v4  ;;  %v1083_v4 = vld [vmem:[#allocation11 + $0x178] sm:$0xff]  ;;  %v6288_v12 = vcombine.low %v1494_v60, %v1498_v63 }
 0x2c1   : > { %v5874_v16 = vcombine.low %v1079_v3, %v1083_v4  ;;  %v1199_v55 = vld [vmem:[#allocation11 + $0x518] sm:$0xff] }
 0x2c2   : > { %4603 = vmatpush2.bf16.msra.mxu1 %v6184_v6  ;;  %v6289_v6 = vcombine.high %v1494_v60, %v1498_v63  ;;  %v1203_v10 = vld [vmem:[#allocation11 + $0x538] sm:$0xff] }
 0x2c3   : > { %4604 = vmatprep.subr.bf16.mxu1 %v6177_v9  ;;  %4640 = vmatpush2.bf16.msra.mxu0 %v6336_v11  ;;  %v1490_v9 = vld [vmem:[#allocation11 + $0xe30] sm:$0xff]  ;;  %v5875_v11 = vcombine.high %v1079_v3, %v1083_v4  ;;  %v1039_v17 = vld [vmem:[#allocation11 + $0x18] sm:$0xff] }
 0x2c4   : > { %4641 = vmatprep.subr.bf16.mxu0 %v6329_v14  ;;  %v1075_v14 = vld [vmem:[#allocation11 + $0x138] sm:$0xff]  ;;  %v6280_v24 = vcombine.low %v1486_v8, %v1490_v9 }
 0x2c5   : > { %v1043_v18 = vld [vmem:[#allocation11 + $0x38] sm:$0xff] }
 0x2c6   : > { %4605 = vmatpush2.bf16.msra.mxu1 %v6176_v15  ;;  %v6281_v15 = vcombine.high %v1486_v8, %v1490_v9  ;;  %v1195_v60 = vld [vmem:[#allocation11 + $0x4f8] sm:$0xff]  ;;  %v5835_v63 = vcombine.high %v1039_v17, %v1043_v18 }
 0x2c7   : > { %4606 = vmatprep.subr.bf16.mxu1 %v6169_v19  ;;  %4642 = vmatpush2.bf16.msra.mxu0 %v6328_v21  ;;  %v1227_v19 = vld [vmem:[#allocation11 + $0x5f8] sm:$0xff]  ;;  %v5867_v21 = vcombine.high %v1071_v13, %v1075_v14 }
 0x2c8   : > { %4643 = vmatprep.subr.bf16.mxu0 %v6321_v28  ;;  %v6019_v28 = vcombine.high %v1223_v25, %v1227_v19  ;;  %v1163_v3 = vld [vmem:[#allocation11 + $0x3f8] sm:$0xff] }
 0x2c9   : > { %v1187_v8 = vld [vmem:[#allocation11 + $0x4b8] sm:$0xff] }
 0x2ca   : > { %4607 = vmatpush2.bf16.msra.mxu1 %v6168_v29  ;;  %v5866_v29 = vcombine.low %v1071_v13, %v1075_v14  ;;  %v1155_v13 = vld [vmem:[#allocation11 + $0x3b8] sm:$0xff] }
 0x2cb   : > { %4608 = vmatprep.subr.bf16.mxu1 %v6161_v33  ;;  %4644 = vmatpush2.bf16.msra.mxu0 %v6320_v34  ;;  %v6018_v34 = vcombine.low %v1223_v25, %v1227_v19  ;;  %v1179_v25 = vld [vmem:[#allocation11 + $0x478] sm:$0xff] }
 0x2cc   : > { %4645 = vmatprep.subr.bf16.mxu0 %v6313_v39  ;;  %v6011_v39 = vcombine.high %v1215_v30, %v1219_v32 }
 0x2ce   : > { %4609 = vmatpush2.bf16.msra.mxu1 %v6160_v62 }
 0x2cf   : > { %4610 = vmatprep.subr.bf16.mxu1 %v6153_v43  ;;  %4646 = vmatpush2.bf16.msra.mxu0 %v6312_v44  ;;  %v5851_v43 = vcombine.high %v1055_v37, %v1059_v54  ;;  %v6010_v44 = vcombine.low %v1215_v30, %v1219_v32  ;;  %v1171_v30 = vld [vmem:[#allocation11 + $0x438] sm:$0xff] }
 0x2d0   : > { %4647 = vmatprep.subr.bf16.mxu0 %v6305_v53  ;;  %v6003_v53 = vcombine.high %v1207_v40, %v1211_v41 }
 0x2d2   : > { %4611 = vmatpush2.bf16.msra.mxu1 %v6152_v61  ;;  %v5850_v61 = vcombine.low %v1055_v37, %v1059_v54  ;;  %v1139_v37 = vld [vmem:[#allocation11 + $0x338] sm:$0xff] }
 0x2d3   : > { %4666 = vmatprep.subr.bf16.mxu1 %v5891_v56  ;;  %4648 = vmatpush2.bf16.msra.mxu0 %v6304_v57  ;;  %v5843_v56 = vcombine.high %v1047_v46, %v1051_v52  ;;  %v6002_v57 = vcombine.low %v1207_v40, %v1211_v41  ;;  %v1291_v40 = vld [vmem:[#allocation11 + $0x7f8] sm:$0xff] }
 0x2d4   : > { %4649 = vmatprep.subr.bf16.mxu0 %v6297_v58  ;;  %v5995_v58 = vcombine.high %v1199_v55, %v1203_v10 }
 0x2d5   : > { %4613 = vmatmul.mubr.bf16.vlgmr.msra.gmra.mxu1 %v7486_v20 }
 0x2d6   : > { %4667 = vmatpush1.bf16.msra.mxu1 %v5890_v59  ;;  %4698 = vmatprep.mubr.bf16.mxu1 %v7434_v48  ;;  %v1063_v48 = vld [vmem:[#allocation11 + $0xd8] sm:$0xff]  ;;  %v5842_v59 = vcombine.low %v1047_v46, %v1051_v52 }
 0x2d7   : > { %4668 = vmatprep.subr.bf16.mxu1 %v5883_v1  ;;  %4650 = vmatpush2.bf16.msra.mxu0 %v6296_v2  ;;  %v5859_v33 = vcombine.high %v1063_v48, %v1067_v0  ;;  %v5858_v62 = vcombine.low %v1063_v48, %v1067_v0  ;;  %v5994_v1 = vcombine.low %v1199_v55, %v1203_v10  ;;  %v1159_v2 = vld [vmem:[#allocation11 + $0x3d8] sm:$0xff] }
 0x2d8   : > { %4651 = vmatprep.subr.bf16.mxu0 %v6289_v6  ;;  %v5834_v6 = vcombine.low %v1039_v17, %v1043_v18  ;;  %v5955_v9 = vcombine.high %v1159_v2, %v1163_v3  ;;  %v1147_v48 = vld [vmem:[#allocation11 + $0x378] sm:$0xff] }
 0x2d9   : > { %v1131_v46 = vld [vmem:[#allocation11 + $0x2f8] sm:$0xff] }
 0x2da   : > { %4669 = vmatpush1.bf16.msra.mxu1 %v5882_v7  ;;  %v1183_v7 = vld [vmem:[#allocation11 + $0x498] sm:$0xff] }
 0x2db   : > { %4670 = vmatprep.subr.bf16.mxu1 %v5875_v11  ;;  %4652 = vmatpush2.bf16.msra.mxu0 %v6288_v12  ;;  %v1151_v12 = vld [vmem:[#allocation11 + $0x398] sm:$0xff]  ;;  %v5979_v14 = vcombine.high %v1183_v7, %v1187_v8 }
 0x2dc   : > { %4653 = vmatprep.subr.bf16.mxu0 %v6281_v15  ;;  %v5954_v15 = vcombine.low %v1159_v2, %v1163_v3  ;;  %v5947_v19 = vcombine.high %v1151_v12, %v1155_v13  ;;  %v1283_v55 = vld [vmem:[#allocation11 + $0x7b8] sm:$0xff] }
 0x2dd   : > { %v1123_v17 = vld [vmem:[#allocation11 + $0x2b8] sm:$0xff] }
 0x2de   : > { %4671 = vmatpush1.bf16.msra.mxu1 %v5874_v16  ;;  %v1175_v16 = vld [vmem:[#allocation11 + $0x458] sm:$0xff] }
 0x2df   : > { %4672 = vmatprep.subr.bf16.mxu1 %v5867_v21  ;;  %4654 = vmatpush2.bf16.msra.mxu0 %v6280_v24  ;;  %v5978_v21 = vcombine.low %v1183_v7, %v1187_v8  ;;  %v1143_v24 = vld [vmem:[#allocation11 + $0x358] sm:$0xff]  ;;  %v5971_v0 = vcombine.high %v1175_v16, %v1179_v25 }
 0x2e0   : > { %4709 = vmatprep.subr.bf16.mxu0 %v6019_v28  ;;  %v5946_v28 = vcombine.low %v1151_v12, %v1155_v13  ;;  %v5939_v32 = vcombine.high %v1143_v24, %v1147_v48  ;;  %v1115_v2 = vld [vmem:[#allocation11 + $0x278] sm:$0xff] }
 0x2e1   : > { %v1267_v7 = vld [vmem:[#allocation11 + $0x738] sm:$0xff] }
 0x2e2   : > { %4673 = vmatpush1.bf16.msra.mxu1 %v5866_v29  ;;  %4656 = vmatmul.mubr.bf16.vlgmr.msra.gmra.mxu0 %v7496_v45  ;;  %v1167_v29 = vld [vmem:[#allocation11 + $0x418] sm:$0xff] }
 0x2e3   : > { %4674 = vmatprep.subr.bf16.mxu1 %v5859_v33  ;;  %4710 = vmatpush1.bf16.msra.mxu0 %v6018_v34  ;;  %v5970_v33 = vcombine.low %v1175_v16, %v1179_v25  ;;  %v1135_v34 = vld [vmem:[#allocation11 + $0x318] sm:$0xff]  ;;  %v5963_v54 = vcombine.high %v1167_v29, %v1171_v30 }
 0x2e4   : > { %4741 = vmatprep.mubr.bf16.mxu0 %v7457_v31  ;;  %4711 = vmatprep.subr.bf16.mxu0 %v6011_v39  ;;  %v1191_v31 = vld [vmem:[#allocation11 + $0x4d8] sm:$0xff]  ;;  %v5938_v39 = vcombine.low %v1143_v24, %v1147_v48  ;;  %v5931_v41 = vcombine.high %v1135_v34, %v1139_v37 }
 0x2e5   : > { %v5987_v4 = vcombine.high %v1191_v31, %v1195_v60  ;;  %v5986_v11 = vcombine.low %v1191_v31, %v1195_v60  ;;  %v1275_v31 = vld [vmem:[#allocation11 + $0x778] sm:$0xff] }
 0x2e6   : > { %4675 = vmatpush1.bf16.msra.mxu1 %v5858_v62  ;;  %v1287_v62 = vld [vmem:[#allocation11 + $0x7d8] sm:$0xff] }
 0x2e7   : > { %4676 = vmatprep.subr.bf16.mxu1 %v5851_v43  ;;  %4712 = vmatpush1.bf16.msra.mxu0 %v6010_v44  ;;  %v5962_v43 = vcombine.low %v1167_v29, %v1171_v30  ;;  %v1127_v44 = vld [vmem:[#allocation11 + $0x2d8] sm:$0xff]  ;;  %v6083_v52 = vcombine.high %v1287_v62, %v1291_v40 }
 0x2e8   : > { %4713 = vmatprep.subr.bf16.mxu0 %v6003_v53  ;;  %v5930_v53 = vcombine.low %v1135_v34, %v1139_v37  ;;  %v5923_v10 = vcombine.high %v1127_v44, %v1131_v46  ;;  %v1107_v12 = vld [vmem:[#allocation11 + $0x238] sm:$0xff] }
 0x2e9   : > { %v1259_v16 = vld [vmem:[#allocation11 + $0x6f8] sm:$0xff] }
 0x2ea   : > { %4677 = vmatpush1.bf16.msra.mxu1 %v5850_v61  ;;  %v1279_v61 = vld [vmem:[#allocation11 + $0x798] sm:$0xff] }
 0x2eb   : > { %4678 = vmatprep.subr.bf16.mxu1 %v5843_v56  ;;  %4714 = vmatpush1.bf16.msra.mxu0 %v6002_v57  ;;  %v6082_v56 = vcombine.low %v1287_v62, %v1291_v40  ;;  %v1119_v57 = vld [vmem:[#allocation11 + $0x298] sm:$0xff]  ;;  %v6075_v18 = vcombine.high %v1279_v61, %v1283_v55 }
 0x2ec   : > { %4715 = vmatprep.subr.bf16.mxu0 %v5995_v58  ;;  %v5922_v58 = vcombine.low %v1127_v44, %v1131_v46  ;;  %v5915_v60 = vcombine.high %v1119_v57, %v1123_v17  ;;  %v1355_v24 = vld [vmem:[#allocation11 + $0x9f8] sm:$0xff] }
 0x2ed   : > { %v1251_v29 = vld [vmem:[#allocation11 + $0x6b8] sm:$0xff] }
 0x2ee   : > { %4679 = vmatpush1.bf16.msra.mxu1 %v5842_v59  ;;  %v1271_v59 = vld [vmem:[#allocation11 + $0x758] sm:$0xff] }
 0x2ef   : > { %4680 = vmatprep.subr.bf16.mxu1 %v5835_v63  ;;  %4716 = vmatpush1.bf16.msra.mxu0 %v5994_v1  ;;  %v6074_v63 = vcombine.low %v1279_v61, %v1283_v55  ;;  %v1111_v1 = vld [vmem:[#allocation11 + $0x258] sm:$0xff]  ;;  %v6067_v3 = vcombine.high %v1271_v59, %v1275_v31 }
 0x2f0   : > { %4717 = vmatprep.subr.bf16.mxu0 %v5987_v4  ;;  %v5914_v4 = vcombine.low %v1119_v57, %v1123_v17  ;;  %v5907_v8 = vcombine.high %v1111_v1, %v1115_v2  ;;  %v1347_v34 = vld [vmem:[#allocation11 + $0x9b8] sm:$0xff] }
 0x2f1   : > { %v1243_v62 = vld [vmem:[#allocation11 + $0x678] sm:$0xff] }
 0x2f2   : > { %4681 = vmatpush1.bf16.msra.mxu1 %v5834_v6  ;;  %v1263_v6 = vld [vmem:[#allocation11 + $0x718] sm:$0xff] }
 0x2f3   : > { %4682 = vmatprep.subr.bf16.mxu1 %v5955_v9  ;;  %4718 = vmatpush1.bf16.msra.mxu0 %v5986_v11  ;;  %v6066_v9 = vcombine.low %v1271_v59, %v1275_v31  ;;  %v1103_v11 = vld [vmem:[#allocation11 + $0x218] sm:$0xff]  ;;  %v6059_v13 = vcombine.high %v1263_v6, %v1267_v7 }
 0x2f4   : > { %4719 = vmatprep.subr.bf16.mxu0 %v5979_v14  ;;  %v5906_v14 = vcombine.low %v1111_v1, %v1115_v2  ;;  %v5899_v25 = vcombine.high %v1103_v11, %v1107_v12  ;;  %v1339_v44 = vld [vmem:[#allocation11 + $0x978] sm:$0xff] }
 0x2f5   : > { %v1235_v61 = vld [vmem:[#allocation11 + $0x638] sm:$0xff] }
 0x2f6   : > { %4683 = vmatpush2.bf16.msra.mxu1 %v5954_v15  ;;  %v1255_v15 = vld [vmem:[#allocation11 + $0x6d8] sm:$0xff] }
 0x2f7   : > { %4684 = vmatprep.subr.bf16.mxu1 %v5947_v19  ;;  %4720 = vmatpush1.bf16.msra.mxu0 %v5978_v21  ;;  %v6058_v19 = vcombine.low %v1263_v6, %v1267_v7  ;;  %v1351_v21 = vld [vmem:[#allocation11 + $0x9d8] sm:$0xff]  ;;  %v6051_v48 = vcombine.high %v1255_v15, %v1259_v16 }
 0x2f8   : > { %4721 = vmatprep.subr.bf16.mxu0 %v5971_v0  ;;  %v5898_v0 = vcombine.low %v1103_v11, %v1107_v12  ;;  %v6147_v30 = vcombine.high %v1351_v21, %v1355_v24  ;;  %v1331_v57 = vld [vmem:[#allocation11 + $0x938] sm:$0xff]  ;;  %v7520_v11 = vpop.f32.mrf.mxu0 }
 0x2f9   : > { %v1471_v2 = vld [vmem:[#allocation11 + $0xd98] sm:$0xff] }
 0x2fa   : > { %4685 = vmatpush2.bf16.msra.mxu1 %v5946_v28  ;;  %v1247_v28 = vld [vmem:[#allocation11 + $0x698] sm:$0xff] }
 0x2fb   : > { %4686 = vmatprep.subr.bf16.mxu1 %v5939_v32  ;;  %4722 = vmatpush1.bf16.msra.mxu0 %v5970_v33  ;;  %v6050_v32 = vcombine.low %v1255_v15, %v1259_v16  ;;  %v1343_v33 = vld [vmem:[#allocation11 + $0x998] sm:$0xff]  ;;  %v6043_v37 = vcombine.high %v1247_v28, %v1251_v29 }
 0x2fc   : > { %4723 = vmatprep.subr.bf16.mxu0 %v5963_v54  ;;  %v6146_v54 = vcombine.low %v1351_v21, %v1355_v24  ;;  %v6139_v40 = vcombine.high %v1343_v33, %v1347_v34  ;;  %v1467_v15 = vld [vmem:[#allocation11 + $0xd78] sm:$0xff] }
 0x2fd   : > { %v1303_v21 = vld [vmem:[#allocation11 + $0x858] sm:$0xff] }
 0x2fe   : > { %4687 = vmatpush2.bf16.msra.mxu1 %v5938_v39  ;;  %v1239_v39 = vld [vmem:[#allocation11 + $0x658] sm:$0xff] }
 0x2ff   : > { %4688 = vmatprep.subr.bf16.mxu1 %v5931_v41  ;;  %4724 = vmatpush1.bf16.msra.mxu0 %v5962_v43  ;;  %v6042_v41 = vcombine.low %v1247_v28, %v1251_v29  ;;  %v1335_v43 = vld [vmem:[#allocation11 + $0x958] sm:$0xff]  ;;  %v6035_v46 = vcombine.high %v1239_v39, %v1243_v62 }
 0x300   : > { %4725 = vmatprep.subr.bf16.mxu0 %v6083_v52  ;;  %v6138_v52 = vcombine.low %v1343_v33, %v1347_v34  ;;  %v6131_v55 = vcombine.high %v1335_v43, %v1339_v44  ;;  %v1307_v24 = vld [vmem:[#allocation11 + $0x878] sm:$0xff] }
 0x301   : > { %v1455_v29 = vld [vmem:[#allocation11 + $0xd18] sm:$0xff] }
 0x302   : > { %4689 = vmatpush2.bf16.msra.mxu1 %v5930_v53  ;;  %v1231_v53 = vld [vmem:[#allocation11 + $0x618] sm:$0xff] }
 0x303   : > { %4690 = vmatprep.subr.bf16.mxu1 %v5923_v10  ;;  %4726 = vmatpush2.bf16.msra.mxu0 %v6082_v56  ;;  %v6034_v10 = vcombine.low %v1239_v39, %v1243_v62  ;;  %v1327_v56 = vld [vmem:[#allocation11 + $0x918] sm:$0xff]  ;;  %v6027_v17 = vcombine.high %v1231_v53, %v1235_v61  ;;  %v6026_v31 = vcombine.low %v1231_v53, %v1235_v61 }
 0x304   : > { %4727 = vmatprep.subr.bf16.mxu0 %v6075_v18  ;;  %v6130_v18 = vcombine.low %v1335_v43, %v1339_v44  ;;  %v6123_v59 = vcombine.high %v1327_v56, %v1331_v57  ;;  %v6122_v1 = vcombine.low %v1327_v56, %v1331_v57  ;;  %v1295_v34 = vld [vmem:[#allocation11 + $0x818] sm:$0xff]  ;;  %v6098_v39 = vcombine.low %v1303_v21, %v1307_v24 }
 0x305   : > { %v1447_v62 = vld [vmem:[#allocation11 + $0xcd8] sm:$0xff] }
 0x306   : > { %4691 = vmatpush2.bf16.msra.mxu1 %v5922_v58  ;;  %v1479_v58 = vld [vmem:[#allocation11 + $0xdd8] sm:$0xff] }
 0x307   : > { %4692 = vmatprep.subr.bf16.mxu1 %v5915_v60  ;;  %4728 = vmatpush2.bf16.msra.mxu0 %v6074_v63  ;;  %v1323_v60 = vld [vmem:[#allocation11 + $0x8f8] sm:$0xff] }
 0x308   : > { %4729 = vmatprep.subr.bf16.mxu0 %v6067_v3  ;;  %v1475_v3 = vld [vmem:[#allocation11 + $0xdb8] sm:$0xff] }
 0x309   : > { %v6267_v12 = vcombine.high %v1471_v2, %v1475_v3  ;;  %v1439_v56 = vld [vmem:[#allocation11 + $0xc98] sm:$0xff] }
 0x30a   : > { %4693 = vmatpush2.bf16.msra.mxu1 %v5914_v4  ;;  %v7518_v4 = vpop.f32.mrf.mxu1  ;;  %v1443_v57 = vld [vmem:[#allocation11 + $0xcb8] sm:$0xff] }
 0x30b   : > { %4694 = vmatprep.subr.bf16.mxu1 %v5907_v8  ;;  %4730 = vmatpush2.bf16.msra.mxu0 %v6066_v9  ;;  %v1311_v8 = vld [vmem:[#allocation11 + $0x898] sm:$0xff] }
 0x30c   : > { %4731 = vmatprep.subr.bf16.mxu0 %v6059_v13  ;;  %v1315_v9 = vld [vmem:[#allocation11 + $0x8b8] sm:$0xff]  ;;  %v7522_v16 = vpop.f32.mrf.mxu1 }
 0x30d   : > { %v6106_v28 = vcombine.low %v1311_v8, %v1315_v9 }
 0x30e   : > { %4695 = vmatpush2.bf16.msra.mxu1 %v5906_v14  ;;  %v1463_v14 = vld [vmem:[#allocation11 + $0xd58] sm:$0xff] }
 0x30f   : > { %4696 = vmatprep.subr.bf16.mxu1 %v5899_v25  ;;  %4732 = vmatpush2.bf16.msra.mxu0 %v6058_v19  ;;  %v6107_v25 = vcombine.high %v1311_v8, %v1315_v9  ;;  %v6266_v19 = vcombine.low %v1471_v2, %v1475_v3  ;;  %v6258_v33 = vcombine.low %v1463_v14, %v1467_v15  ;;  %v1403_v8 = vld [vmem:[#allocation11 + $0xb78] sm:$0xff] }
 0x310   : > { %4733 = vmatprep.subr.bf16.mxu0 %v6051_v48  ;;  %v7526_v48 = vpop.f32.mrf.mxu0 }
 0x312   : > { %4697 = vmatpush2.bf16.msra.mxu1 %v5898_v0  ;;  %v6259_v0 = vcombine.high %v1463_v14, %v1467_v15  ;;  %v1423_v14 = vld [vmem:[#allocation11 + $0xc18] sm:$0xff] }
 0x313   : > { %4752 = vmatprep.subr.bf16.mxu1 %v6147_v30  ;;  %4734 = vmatpush2.bf16.msra.mxu0 %v6050_v32  ;;  %v1459_v30 = vld [vmem:[#allocation11 + $0xd38] sm:$0xff]  ;;  %v7528_v32 = vpop.f32.mrf.mxu1 }
 0x314   : > { %4735 = vmatprep.subr.bf16.mxu0 %v6043_v37  ;;  %v1299_v37 = vld [vmem:[#allocation11 + $0x838] sm:$0xff]  ;;  %v6250_v44 = vcombine.low %v1455_v29, %v1459_v30 }
 0x315   : > { %4699 = vmatmul.mubr.bf16.vlgmr.msra.gmra.mxu1 %v7432_v47  ;;  %v1483_v47 = vld [vmem:[#allocation11 + $0xdf8] sm:$0xff]  ;;  %v6091_v43 = vcombine.high %v1295_v34, %v1299_v37 }
 0x316   : > { %4753 = vmatpush1.bf16.msra.mxu1 %v6146_v54  ;;  %4784 = vmatprep.mubr.bf16.mxu1 %v7463_v42  ;;  %v1319_v42 = vld [vmem:[#allocation11 + $0x8d8] sm:$0xff]  ;;  %v6275_v63 = vcombine.high %v1479_v58, %v1483_v47  ;;  %v6274_v7 = vcombine.low %v1479_v58, %v1483_v47  ;;  %v6251_v54 = vcombine.high %v1455_v29, %v1459_v30 }
 0x317   : > { %4754 = vmatprep.subr.bf16.mxu1 %v6139_v40  ;;  %4736 = vmatpush2.bf16.msra.mxu0 %v6042_v41  ;;  %v6115_v6 = vcombine.high %v1319_v42, %v1323_v60  ;;  %v6114_v13 = vcombine.low %v1319_v42, %v1323_v60  ;;  %v1451_v40 = vld [vmem:[#allocation11 + $0xcf8] sm:$0xff]  ;;  %v7532_v41 = vpop.f32.mrf.mxu1  ;;  %v6235_v42 = vcombine.high %v1439_v56, %v1443_v57 }
 0x318   : > { %4737 = vmatprep.subr.bf16.mxu0 %v6035_v46  ;;  %v1415_v46 = vld [vmem:[#allocation11 + $0xbd8] sm:$0xff]  ;;  %v6242_v58 = vcombine.low %v1447_v62, %v1451_v40 }
 0x319   : > { %v7536_v61 = vpop.f32.mrf.mxu1  ;;  %v1407_v47 = vld [vmem:[#allocation11 + $0xb98] sm:$0xff] }
 0x31a   : > { %4755 = vmatpush1.bf16.msra.mxu1 %v6138_v52  ;;  %v1419_v52 = vld [vmem:[#allocation11 + $0xbf8] sm:$0xff] }
 0x31b   : > { %4756 = vmatprep.subr.bf16.mxu1 %v6131_v55  ;;  %4738 = vmatpush2.bf16.msra.mxu0 %v6034_v10  ;;  %v6243_v55 = vcombine.high %v1447_v62, %v1451_v40  ;;  %v6090_v10 = vcombine.low %v1295_v34, %v1299_v37  ;;  %v6210_v60 = vcombine.low %v1415_v46, %v1419_v52  ;;  %v1427_v15 = vld [vmem:[#allocation11 + $0xc38] sm:$0xff] }
 0x31c   : > { %4739 = vmatprep.subr.bf16.mxu0 %v6027_v17  ;;  %v6219_v29 = vcombine.high %v1423_v14, %v1427_v15  ;;  %v1383_v62 = vld [vmem:[#allocation11 + $0xad8] sm:$0xff] }
 0x31d   : > { %v1387_v40 = vld [vmem:[#allocation11 + $0xaf8] sm:$0xff] }
 0x31e   : > { %4757 = vmatpush1.bf16.msra.mxu1 %v6130_v18  ;;  %v6211_v18 = vcombine.high %v1415_v46, %v1419_v52  ;;  %v1535_v52 = vld [vmem:[#allocation11 + $0xf98] sm:$0xff] }
 0x31f   : > { %4758 = vmatprep.subr.bf16.mxu1 %v6123_v59  ;;  %4740 = vmatpush2.bf16.msra.mxu0 %v6026_v31  ;;  %v1411_v59 = vld [vmem:[#allocation11 + $0xbb8] sm:$0xff]  ;;  %v7540_v31 = vpop.f32.mrf.mxu1 }
 0x320   : > { %4795 = vmatprep.subr.bf16.mxu0 %v6275_v63  ;;  %v1431_v63 = vld [vmem:[#allocation11 + $0xc58] sm:$0xff]  ;;  %v6203_v3 = vcombine.high %v1407_v47, %v1411_v59 }
 0x321   : > { %v7544_v9 = vpop.f32.mrf.mxu1 }
 0x322   : > { %4759 = vmatpush1.bf16.msra.mxu1 %v6122_v1  ;;  %4742 = vmatmul.mubr.bf16.vlgmr.msra.gmra.mxu0 %v7460_v36  ;;  %v6099_v36 = vcombine.high %v1303_v21, %v1307_v24  ;;  %v1435_v1 = vld [vmem:[#allocation11 + $0xc78] sm:$0xff] }
 0x323   : > { %4760 = vmatprep.subr.bf16.mxu1 %v6115_v6  ;;  %4796 = vmatpush1.bf16.msra.mxu0 %v6274_v7  ;;  %v6234_v6 = vcombine.low %v1439_v56, %v1443_v57  ;;  %v1399_v7 = vld [vmem:[#allocation11 + $0xb58] sm:$0xff]  ;;  %v6226_v21 = vcombine.low %v1431_v63, %v1435_v1  ;;  %v6179_v57 = vcombine.high %v1383_v62, %v1387_v40 }
 0x324   : > { %4827 = vmatprep.mubr.bf16.mxu0 %v7477_v27  ;;  %4797 = vmatprep.subr.bf16.mxu0 %v6267_v12  ;;  %v7530_v27 = vpop.f32.mrf.mxu0  ;;  %v6227_v12 = vcombine.high %v1431_v63, %v1435_v1  ;;  %v1391_v24 = vld [vmem:[#allocation11 + $0xb18] sm:$0xff]  ;;  %v6194_v30 = vcombine.low %v1399_v7, %v1403_v8  ;;  %v6178_v63 = vcombine.low %v1383_v62, %v1387_v40 }
 0x325   : > { %v1527_v1 = vld [vmem:[#allocation11 + $0xf58] sm:$0xff] }
 0x326   : > { %4761 = vmatpush1.bf16.msra.mxu1 %v6114_v13  ;;  %v7534_v53 = vpop.f32.mrf.mxu0  ;;  %v6202_v13 = vcombine.low %v1407_v47, %v1411_v59  ;;  %v1379_v47 = vld [vmem:[#allocation11 + $0xab8] sm:$0xff] }
 0x327   : > { %4762 = vmatprep.subr.bf16.mxu1 %v6107_v25  ;;  %4798 = vmatpush1.bf16.msra.mxu0 %v6266_v19  ;;  %v6195_v19 = vcombine.high %v1399_v7, %v1403_v8 }
 0x328   : > { %4799 = vmatprep.subr.bf16.mxu0 %v6259_v0  ;;  %v7538_v17 = vpop.f32.mrf.mxu0  ;;  %v1395_v0 = vld [vmem:[#allocation11 + $0xb38] sm:$0xff] }
 0x329   : > { %v6186_v46 = vcombine.low %v1391_v24, %v1395_v0 }
 0x32a   : > { %4763 = vmatpush1.bf16.msra.mxu1 %v6106_v28  ;;  %v7542_v2 = vpop.f32.mrf.mxu0  ;;  %v7548_v28 = vpop.f32.mrf.mxu1 }
 0x32b   : > { %4764 = vmatprep.subr.bf16.mxu1 %v6099_v36  ;;  %4800 = vmatpush1.bf16.msra.mxu0 %v6258_v33  ;;  %v1543_v36 = vld [vmem:[#allocation11 + $0xfd8] sm:$0xff] }
 0x32c   : > { %4801 = vmatprep.subr.bf16.mxu0 %v6251_v54  ;;  %v7546_v25 = vpop.f32.mrf.mxu0  ;;  %v1547_v33 = vld [vmem:[#allocation11 + $0xff8] sm:$0xff]  ;;  %v7552_v37 = vpop.f32.mrf.mxu1  ;;  %v6187_v54 = vcombine.high %v1391_v24, %v1395_v0 }
 0x32d   : > { %v1523_v24 = vld [vmem:[#allocation11 + $0xf38] sm:$0xff] }
 0x32e   : > { %4765 = vmatpush1.bf16.msra.mxu1 %v6098_v39  ;;  %v7550_v34 = vpop.f32.mrf.mxu0  ;;  %v6218_v39 = vcombine.low %v1423_v14, %v1427_v15  ;;  %v7558_v56 = vpop.f32.mrf.mxu1 }
 0x32f   : > { %4766 = vmatprep.subr.bf16.mxu1 %v6091_v43  ;;  %4802 = vmatpush1.bf16.msra.mxu0 %v6250_v44  ;;  %v6339_v44 = vcombine.high %v1543_v36, %v1547_v33 }
 0x330   : > { %4803 = vmatprep.subr.bf16.mxu0 %v6243_v55  ;;  %v7554_v43 = vpop.f32.mrf.mxu0  ;;  %v1539_v55 = vld [vmem:[#allocation11 + $0xfb8] sm:$0xff] }
 0x331   : > { %v6330_v8 = vcombine.low %v1535_v52, %v1539_v55 }
 0x332   : > { %4767 = vmatpush1.bf16.msra.mxu1 %v6090_v10  ;;  %v7556_v10 = vld [vmem:[#allocation13] sm:$0xff]  ;;  %v7560_v59 = vpop.f32.mrf.mxu0 }
 0x333   : > { %4768 = vmatprep.subr.bf16.mxu1 %v6211_v18  ;;  %4804 = vmatpush1.bf16.msra.mxu0 %v6242_v58  ;;  %v6338_v18 = vcombine.low %v1543_v36, %v1547_v33  ;;  %v1375_v58 = vld [vmem:[#allocation11 + $0xa98] sm:$0xff] }
 0x334   : > { %4805 = vmatprep.subr.bf16.mxu0 %v6235_v42  ;;  %v6331_v42 = vcombine.high %v1535_v52, %v1539_v55  ;;  %v6171_v7 = vcombine.high %v1375_v58, %v1379_v47  ;;  %v7567_v14 = vpop.f32.mrf.mxu0  ;;  %v1511_v55 = vld [vmem:[#allocation11 + $0xed8] sm:$0xff] }
 0x336   : > { %4769 = vmatpush2.bf16.msra.mxu1 %v6210_v60  ;;  %v1557_v60 = vrot.slane %v7556_v10, %v643_v26  ;;  %v6170_v26 = vcombine.low %v1375_v58, %v1379_v47  ;;  %v4405_v62 = vpop.f32.mrf.mxu0 }
 0x337   : > { %4770 = vmatprep.subr.bf16.mxu1 %v6203_v3  ;;  %4806 = vmatpush1.bf16.msra.mxu0 %v6234_v6  ;;  %v1531_v3 = vld [vmem:[#allocation11 + $0xf78] sm:$0xff]  ;;  %v7565_v6 = vpop.f32.mrf.mxu1 }
 0x338   : > { %4807 = vmatprep.subr.bf16.mxu0 %v6227_v12  ;;  %v1367_v12 = vld [vmem:[#allocation11 + $0xa58] sm:$0xff]  ;;  %v6323_v15 = vcombine.high %v1527_v1, %v1531_v3  ;;  %v6322_v33 = vcombine.low %v1527_v1, %v1531_v3 }
 0x339   : > { %v4362_v0 = vpop.f32.mrf.mxu1  ;;  %v1507_v1 = vld [vmem:[#allocation11 + $0xeb8] sm:$0xff] }
 0x33a   : > { %4771 = vmatpush2.bf16.msra.mxu1 %v6202_v13  ;;  %v1371_v13 = vld [vmem:[#allocation11 + $0xa78] sm:$0xff] }
 0x33b   : > { %4772 = vmatprep.subr.bf16.mxu1 %v6195_v19  ;;  %4808 = vmatpush1.bf16.msra.mxu0 %v6226_v21  ;;  %v4191_v19 = vadd.f32 %v7532_v41, %v1557_v60  ;;  %v1519_v21 = vld [vmem:[#allocation11 + $0xf18] sm:$0xff]  ;;  %v7572_v40 = vpop.f32.mrf.mxu1  ;;  %v6162_v52 = vcombine.low %v1367_v12, %v1371_v13 }
 0x33c   : > { %4809 = vmatprep.subr.bf16.mxu0 %v6219_v29  ;;  %v6163_v29 = vcombine.high %v1367_v12, %v1371_v13  ;;  %v6315_v41 = vcombine.high %v1519_v21, %v1523_v24  ;;  %v6314_v47 = vcombine.low %v1519_v21, %v1523_v24  ;;  %v6676_v24 = vld [vmem:[#allocation14 + $0x70] sm:$0xff]  }
 0x33d   : > { %v4234_v36 = vadd.f32 %v7534_v53, %v4191_v19  ;;  %v1495_v19 = vld [vmem:[#allocation11 + $0xe58] sm:$0xff] }
 0x33e   : > { %4773 = vmatpush2.bf16.msra.mxu1 %v6194_v30  ;;  %v4187_v30 = vadd.f32 %v7522_v16, %v1557_v60  ;;  %v7576_v16 = vpop.f32.mrf.mxu0 }
 0x33f   : > { %4774 = vmatprep.subr.bf16.mxu1 %v6187_v54  ;;  %4810 = vmatpush1.bf16.msra.mxu0 %v6218_v39  ;;  %v1359_v54 = vld [vmem:[#allocation11 + $0xa18] sm:$0xff] }
 0x340   : > { %4811 = vmatprep.subr.bf16.mxu0 %v6339_v44  ;;  %v1363_v39 = vld [vmem:[#allocation11 + $0xa38] sm:$0xff]  ;;  %v4230_v44 = vadd.f32 %v7526_v48, %v4187_v30  ;;  %v4487_v3 = vpop.f32.mrf.mxu0 }
 0x341   : > { %v6155_v53 = vcombine.high %v1359_v54, %v1363_v39 }
 0x342   : > { %4775 = vmatpush2.bf16.msra.mxu1 %v6186_v46  ;;  %v4277_v46 = vadd.f32 %v7548_v28, %v4234_v36  ;;  %v6154_v28 = vcombine.low %v1359_v54, %v1363_v39  ;;  %v7586_v21 = vpop.f32.mrf.mxu0 }
 0x343   : > { %4776 = vmatprep.subr.bf16.mxu1 %v6179_v57  ;;  %4812 = vmatpush2.bf16.msra.mxu0 %v6338_v18  ;;  %v1515_v57 = vld [vmem:[#allocation11 + $0xef8] sm:$0xff]  ;;  %v4273_v18 = vadd.f32 %v7540_v31, %v4230_v44 }
 0x344   : > { %4813 = vmatprep.subr.bf16.mxu0 %v6331_v42  ;;  %v4320_v58 = vadd.f32 %v7550_v34, %v4277_v46  ;;  %v4444_v42 = vpop.f32.mrf.mxu1  ;;  %v6307_v60 = vcombine.high %v1511_v55, %v1515_v57  ;;  %v6306_v12 = vcombine.low %v1511_v55, %v1515_v57  ;;  %v1487_v44 = vld [vmem:[#allocation11 + $0xe18] sm:$0xff]  ;;  %v6678_v55 = vld [vmem:[#allocation14 + $0x68] sm:$0xff]  }
 0x345   : > { %v4316_v48 = vadd.f32 %v7542_v2, %v4273_v18  ;;  %v6675_v2 = vld [vmem:[#allocation14 + $0x38] sm:$0xff]   ;;  %v1491_v46 = vld [vmem:[#allocation11 + $0xe38] sm:$0xff] }
 0x346   : > { %4777 = vmatpush2.bf16.msra.mxu1 %v6178_v63  ;;  %v1503_v63 = vld [vmem:[#allocation11 + $0xe98] sm:$0xff]  ;;  %v7581_v31 = vpop.f32.mrf.mxu1 }
 0x347   : > { %4778 = vmatprep.subr.bf16.mxu1 %v6171_v7  ;;  %4814 = vmatpush2.bf16.msra.mxu0 %v6330_v8  ;;  %v6674_v7 = vld [vmem:[#allocation14 + $0x78] sm:$0xff]   ;;  %v4847_v8 = vmax.f32 %v4320_v58, 0.0  ;;  %v6299_v34 = vcombine.high %v1503_v63, %v1507_v1  ;;  %v4839_v13 = vmax.f32 %v4316_v48, 0.0  ;;  %v6298_v36 = vcombine.low %v1503_v63, %v1507_v1  ;;  %v6681_v63 = vld [vmem:[#allocation14 + $0x20] sm:$0xff]  }
 0x348   : > { %4815 = vmatprep.subr.bf16.mxu0 %v6323_v15  ;;  %v1565_v15 = vrot.slane %v7556_v10, %v651_v49  ;;  %v6682_v48 = vld [vmem:[#allocation14 + $0xf8] sm:$0xff]  }
 0x34a   : > { %4779 = vmatpush2.bf16.msra.mxu1 %v6170_v26  ;;  %v1499_v26 = vld [vmem:[#allocation11 + $0xe78] sm:$0xff]  ;;  %v4363_v30 = vadd.f32 %v4362_v0, %v1565_v15  ;;  %v4359_v39 = vadd.f32 %v7558_v56, %v1565_v15  ;;  %v6679_v56 = vld [vmem:[#allocation14 + $0x28] sm:$0xff]  }
 0x34b   : > { %4780 = vmatprep.subr.bf16.mxu1 %v6163_v29  ;;  %4816 = vmatpush2.bf16.msra.mxu0 %v6322_v33  ;;  %v4855_v29 = vpack.c.bf16 %v4847_v8, %v4839_v13  ;;  %v4448_v33 = vpop.f32.mrf.mxu1  ;;  %v6291_v54 = vcombine.high %v1495_v19, %v1499_v26  ;;  %v6686_v8 = vld [vmem:[#allocation14 + $0xf0] sm:$0xff]  }
 0x34c   : > { %4817 = vmatprep.subr.bf16.mxu0 %v6315_v41  ;;  %v4406_v49 = vadd.f32 %v4405_v62, %v4363_v30  ;;  %v6677_v41 = vld [vmem:[#allocation14 + $0x30] sm:$0xff]   ;;  %v4402_v0 = vadd.f32 %v7560_v59, %v4359_v39  ;;  %v6680_v62 = vld [vmem:[#allocation14 + $0x60] sm:$0xff]   ;;  %v6684_v59 = vld [vmem:[#allocation14 + $0x58] sm:$0xff]  }
 0x34d   : > { %v6687_v13 = vld [vmem:[#allocation14 + $0xb0] sm:$0xff]  }
 0x34e   : > { %4781 = vmatpush2.bf16.msra.mxu1 %v6162_v52  ;;  %v4491_v52 = vpop.f32.mrf.mxu0  ;;  %v4449_v57 = vadd.f32 %v4448_v33, %v4406_v49  ;;  %v4445_v18 = vadd.f32 %v4444_v42, %v4402_v0  ;;  %v1553_v42 = vrot.slane %v7556_v10, %v639_v23  ;;  %v6698_v49 = vld [vmem:[#allocation14 + $0xd8] sm:$0xff]   ;;  %v6708_v0 = vld [vmem:[#allocation14 + $0x170] sm:$0xff]  }
 0x34f   : > { %4782 = vmatprep.subr.bf16.mxu1 %v6155_v53  ;;  %4818 = vmatpush2.bf16.msra.mxu0 %v6314_v47  ;;  %v6290_v53 = vcombine.low %v1495_v19, %v1499_v26  ;;  %v6689_v19 = vld [vmem:[#allocation14 + $0x10] sm:$0xff]  }
 0x350   : > { %4819 = vmatprep.subr.bf16.mxu0 %v6307_v60  ;;  %v4492_v58 = vadd.f32 %v4491_v52, %v4449_v57  ;;  %v4488_v47 = vadd.f32 %v4487_v3, %v4445_v18  ;;  %v6282_v60 = vcombine.low %v1487_v44, %v1491_v46  ;;  %v6685_v3 = vld [vmem:[#allocation14 + $0x18] sm:$0xff]   ;;  %v4189_v15 = vadd.f32 %v7528_v32, %v1553_v42  ;;  %v6693_v32 = vld [vmem:[#allocation14 + $0x8] sm:$0xff]   ;;  %v6701_v57 = vld [vmem:[#allocation14 + $0x90] sm:$0xff]  }
 0x351   : > { %v4185_v23 = vadd.f32 %v7518_v4, %v1553_v42  ;;  %v6696_v4 = vld [vmem:[#allocation14 + $0x40] sm:$0xff]   ;;  %v6707_v52 = vld [vmem:[#allocation14 + $0x138] sm:$0xff]   ;;  %v6702_v18 = vld [vmem:[#allocation14 + $0xc8] sm:$0xff]  }
 0x352   : > { %4783 = vmatpush2.bf16.msra.mxu1 %v6154_v28  ;;  %v4849_v28 = vmax.f32 %v4492_v58, 0.0  ;;  %v4841_v1 = vmax.f32 %v4488_v47, 0.0  ;;  %v4232_v26 = vadd.f32 %v7530_v27, %v4189_v15  ;;  %v6695_v27 = vld [vmem:[#allocation14 + $0xa0] sm:$0xff]   ;;  %v6715_v42 = vld [vmem:[#allocation14 + $0x118] sm:$0xff]  }
 0x353   : > { %6426 = vmatprep.subr.bf16.mxu1 %v6674_v7  ;;  %4820 = vmatpush2.bf16.msra.mxu0 %v6306_v12  ;;  %v6683_v7 = vld [vmem:[#allocation14 + $0xb8] sm:$0xff]   ;;  %v6721_v15 = vld [vmem:[#allocation14 + $0x100] sm:$0xff]  }
 0x354   : > { %4821 = vmatprep.subr.bf16.mxu0 %v6299_v34  ;;  %v4857_v12 = vpack.c.bf16 %v4849_v28, %v4841_v1  ;;  %v6688_v34 = vld [vmem:[#allocation14 + $0x50] sm:$0xff]   ;;  %v4275_v30 = vadd.f32 %v7544_v9, %v4232_v26  ;;  %v6706_v9 = vld [vmem:[#allocation14 + $0x178] sm:$0xff]   ;;  %v6712_v28 = vld [vmem:[#allocation14 + $0x160] sm:$0xff]  }
 0x355   : > { %4785 = vmatmul.mubr.bf16.vlgmr.msra.gmra.mxu1 %v7486_v20  ;;  %v6283_v20 = vcombine.high %v1487_v44, %v1491_v46  ;;  %v6699_v44 = vld [vmem:[#allocation14 + $0x98] sm:$0xff]   ;;  %v6725_v26 = vld [vmem:[#allocation14 + $0x1b0] sm:$0xff]  }
 0x356   : > { %6427 = vmatpush3.bf16.msra.mxu1 %v6675_v2  ;;  %5413 = vmatprep.mubr.bf16.mxu1 %v4855_v29  ;;  %v6690_v2 = vld [vmem:[#allocation14 + $0xe8] sm:$0xff]  }
 0x357   : > { %6428 = vmatprep.subr.bf16.mxu1 %v6676_v24  ;;  %4822 = vmatpush2.bf16.msra.mxu0 %v6298_v36  ;;  %v6692_v24 = vld [vmem:[#allocation14 + $0x48] sm:$0xff]   ;;  %v6694_v36 = vld [vmem:[#allocation14 + $0xe0] sm:$0xff]  }
 0x358   : > { %4823 = vmatprep.subr.bf16.mxu0 %v6291_v54  ;;  %v6691_v29 = vld [vmem:[#allocation14 + $0xa8] sm:$0xff]   ;;  %v4318_v54 = vadd.f32 %v7546_v25, %v4275_v30  ;;  %v6700_v25 = vld [vmem:[#allocation14 + $0xd0] sm:$0xff]  }
 0x359   : > { %v6727_v30 = vld [vmem:[#allocation14 + $0x1a8] sm:$0xff]  }
 0x35a   : > { %6429 = vmatpush3.bf16.msra.mxu1 %v6677_v41  ;;  %v4846_v41 = vmax.f32 %v4318_v54, 0.0  ;;  %v6729_v54 = vld [vmem:[#allocation14 + $0x1a0] sm:$0xff]  }
 0x35b   : > { %6430 = vmatprep.subr.bf16.mxu1 %v6678_v55  ;;  %4824 = vmatpush2.bf16.msra.mxu0 %v6290_v53 }
 0x35c   : > { %4825 = vmatprep.subr.bf16.mxu0 %v6283_v20 }
 0x35e   : > { %6431 = vmatpush3.bf16.msra.mxu1 %v6679_v56 }
 0x35f   : > { %6432 = vmatprep.subr.bf16.mxu1 %v6680_v62  ;;  %4826 = vmatpush2.bf16.msra.mxu0 %v6282_v60  ;;  %v6710_v62 = vld [vmem:[#allocation14 + $0x168] sm:$0xff]  }
 0x360   : > { %6448 = vmatprep.subr.bf16.mxu0 %v6682_v48 }
 0x362   : > { %6433 = vmatpush3.bf16.msra.mxu1 %v6681_v63  ;;  %4828 = vmatmul.mubr.bf16.vlgmr.msra.gmra.mxu0 %v7496_v45  ;;  %v4228_v45 = vadd.f32 %v7520_v11, %v4185_v23  ;;  %v6697_v11 = vld [vmem:[#allocation14] sm:$0xff]   ;;  %v6724_v23 = vld [vmem:[#allocation14 + $0x1f0] sm:$0xff]  }
 0x363   : > { %6434 = vmatprep.subr.bf16.mxu1 %v6684_v59  ;;  %6449 = vmatpush3.bf16.msra.mxu0 %v6683_v7  ;;  %v6713_v59 = vld [vmem:[#allocation14 + $0x120] sm:$0xff]  }
 0x364   : > { %5454 = vmatprep.mubr.bf16.mxu0 %v4857_v12  ;;  %6450 = vmatprep.subr.bf16.mxu0 %v6686_v8  ;;  %v4271_v33 = vadd.f32 %v7536_v61, %v4228_v45  ;;  %v1561_v61 = vrot.slane %v7556_v10, %v647_v51  ;;  %v6709_v51 = vld [vmem:[#allocation14 + $0x130] sm:$0xff]   ;;  %v6718_v12 = vld [vmem:[#allocation14 + $0x148] sm:$0xff]  }
 0x365   : > { %v6717_v8 = vld [vmem:[#allocation14 + $0x110] sm:$0xff]   ;;  %v6726_v45 = vld [vmem:[#allocation14 + $0x1e8] sm:$0xff]  }
 0x366   : > { %6435 = vmatpush3.bf16.msra.mxu1 %v6685_v3  ;;  %v4314_v39 = vadd.f32 %v7538_v17, %v4271_v33  ;;  %v4361_v17 = vadd.f32 %v7565_v6, %v1561_v61  ;;  %v4357_v53 = vadd.f32 %v7552_v37, %v1561_v61  ;;  %v6703_v6 = vld [vmem:[#allocation14 + $0x88] sm:$0xff]   ;;  %v6704_v37 = vld [vmem:[#allocation14 + $0xc0] sm:$0xff]  }
 0x367   : > { %6436 = vmatprep.subr.bf16.mxu1 %v6688_v34  ;;  %6451 = vmatpush3.bf16.msra.mxu0 %v6687_v13  ;;  %v6719_v3 = vld [vmem:[#allocation14 + $0x108] sm:$0xff]   ;;  %v4528_v34 = vpop.f32.mrf.mxu1  ;;  %v6720_v13 = vld [vmem:[#allocation14 + $0x140] sm:$0xff]  }
 0x368   : > { %6452 = vmatprep.subr.bf16.mxu0 %v6690_v2  ;;  %v4838_v46 = vmax.f32 %v4314_v39, 0.0  ;;  %v4404_v20 = vadd.f32 %v7567_v14, %v4361_v17  ;;  %v4400_v58 = vadd.f32 %v7554_v43, %v4357_v53  ;;  %v6711_v14 = vld [vmem:[#allocation14 + $0x128] sm:$0xff]   ;;  %v6705_v43 = vld [vmem:[#allocation14 + $0x80] sm:$0xff]   ;;  %v6733_v53 = vld [vmem:[#allocation14 + $0x190] sm:$0xff]  }
 0x369   : > { %v4530_v2 = vpop.f32.mrf.mxu1  ;;  %v6728_v33 = vld [vmem:[#allocation14 + $0x1e0] sm:$0xff]  }
 0x36a   : > { %6437 = vmatpush3.bf16.msra.mxu1 %v6689_v19  ;;  %v4854_v55 = vpack.c.bf16 %v4846_v41, %v4838_v46  ;;  %v4447_v56 = vadd.f32 %v7581_v31, %v4404_v20  ;;  %v4443_v47 = vadd.f32 %v7572_v40, %v4400_v58  ;;  %v6722_v31 = vld [vmem:[#allocation14 + $0x1f8] sm:$0xff]   ;;  %v1569_v41 = vrot.slane %v7556_v10, %v655_v5 }
 0x36b   : > { %6438 = vmatprep.subr.bf16.mxu1 %v6692_v24  ;;  %6453 = vmatpush3.bf16.msra.mxu0 %v6691_v29  ;;  %v6714_v40 = vld [vmem:[#allocation14 + $0x158] sm:$0xff]   ;;  %v4532_v19 = vpop.f32.mrf.mxu1  ;;  %v4571_v24 = vpop.f32.mrf.mxu0 }
 0x36c   : > { %6454 = vmatprep.subr.bf16.mxu0 %v6694_v36  ;;  %v4490_v60 = vadd.f32 %v7586_v21, %v4447_v56  ;;  %v4486_v48 = vadd.f32 %v7576_v16, %v4443_v47  ;;  %v6723_v21 = vld [vmem:[#allocation14 + $0x1b8] sm:$0xff]   ;;  %v6716_v16 = vld [vmem:[#allocation14 + $0x150] sm:$0xff]   ;;  %v4533_v61 = vadd.f32 %v4532_v19, %v1569_v41 }
 0x36d   : > { %v4534_v29 = vpop.f32.mrf.mxu1  ;;  %v4573_v36 = vpop.f32.mrf.mxu0 }
 0x36e   : > { %6439 = vmatpush3.bf16.msra.mxu1 %v6693_v32  ;;  %v4848_v63 = vmax.f32 %v4490_v60, 0.0  ;;  %v4840_v1 = vmax.f32 %v4486_v48, 0.0 }
 0x36f   : > { %6440 = vmatprep.subr.bf16.mxu1 %v6696_v4  ;;  %6455 = vmatpush3.bf16.msra.mxu0 %v6695_v27  ;;  %v6730_v4 = vld [vmem:[#allocation14 + $0x1d8] sm:$0xff]   ;;  %v4575_v27 = vpop.f32.mrf.mxu0 }
 0x370   : > { %6456 = vmatprep.subr.bf16.mxu0 %v6698_v49  ;;  %v4856_v7 = vpack.c.bf16 %v4848_v63, %v4840_v1  ;;  %v1573_v49 = vrot.slane %v7556_v10, %v659_v50 }
 0x372   : > { %6441 = vmatpush3.bf16.msra.mxu1 %v6697_v11  ;;  %v6731_v11 = vld [vmem:[#allocation14 + $0x198] sm:$0xff]   ;;  %v4531_v46 = vadd.f32 %v4530_v2, %v1573_v49  ;;  %v4535_v17 = vadd.f32 %v4534_v29, %v1573_v49 }
 0x373   : > { %6470 = vmatprep.subr.bf16.mxu1 %v6706_v9  ;;  %6457 = vmatpush3.bf16.msra.mxu0 %v6699_v44  ;;  %v4577_v9 = vpop.f32.mrf.mxu0 }
 0x374   : > { %6458 = vmatprep.subr.bf16.mxu0 %v6700_v25  ;;  %v4529_v25 = vadd.f32 %v4528_v34, %v1569_v41 }
 0x375   : > { %5414 = vmatmul.mubr.bf16.vlgmr.msra.gmra.mxu1 %v4854_v55  ;;  %v6732_v55 = vld [vmem:[#allocation14 + $0x1d0] sm:$0xff]  }
 0x376   : > { %6471 = vmatpush3.bf16.msra.mxu1 %v6707_v52  ;;  %v4572_v50 = vadd.f32 %v4571_v24, %v4529_v25 }
 0x377   : > { %6472 = vmatprep.subr.bf16.mxu1 %v6708_v0  ;;  %6459 = vmatpush3.bf16.msra.mxu0 %v6701_v57  ;;  %v4574_v0 = vadd.f32 %v4573_v36, %v4531_v46  ;;  %v4576_v57 = vadd.f32 %v4575_v27, %v4533_v61 }
 0x378   : > { %6460 = vmatprep.subr.bf16.mxu0 %v6702_v18 }
 0x37a   : > { %6473 = vmatpush3.bf16.msra.mxu1 %v6709_v51  ;;  %v4578_v51 = vadd.f32 %v4577_v9, %v4535_v17 }
 0x37b   : > { %6474 = vmatprep.subr.bf16.mxu1 %v6710_v62  ;;  %6461 = vmatpush3.bf16.msra.mxu0 %v6703_v6  ;;  %v6734_v6 = vld [vmem:[#allocation14 + $0x1c8] sm:$0xff]  }
 0x37c   : > { %6462 = vmatprep.subr.bf16.mxu0 %v6704_v37 }
 0x37e   : > { %6475 = vmatpush3.bf16.msra.mxu1 %v6711_v14  ;;  %v6735_v14 = vld [vmem:[#allocation14 + $0x188] sm:$0xff]  }
 0x37f   : > { %6476 = vmatprep.subr.bf16.mxu1 %v6712_v28  ;;  %6463 = vmatpush3.bf16.msra.mxu0 %v6705_v43 }
 0x380   : > { %6492 = vmatprep.subr.bf16.mxu0 %v6722_v31  ;;  %v6736_v31 = vld [vmem:[#allocation14 + $0x1c0] sm:$0xff]  }
 0x382   : > { %6477 = vmatpush3.bf16.msra.mxu1 %v6713_v59  ;;  %5455 = vmatmul.mubr.bf16.vlgmr.msra.gmra.mxu0 %v4856_v7 }
 0x383   : > { %6478 = vmatprep.subr.bf16.mxu1 %v6714_v40  ;;  %6493 = vmatpush3.bf16.msra.mxu0 %v6723_v21  ;;  %v6737_v40 = vld [vmem:[#allocation14 + $0x180] sm:$0xff]  }
 0x384   : > { %6494 = vmatprep.subr.bf16.mxu0 %v6724_v23  ;;  %v1581_v23 = vrot.slane %v7556_v10, %v667_v35 }
 0x386   : > { %6479 = vmatpush3.bf16.msra.mxu1 %v6715_v42 }
 0x387   : > { %6480 = vmatprep.subr.bf16.mxu1 %v6716_v16  ;;  %6495 = vmatpush3.bf16.msra.mxu0 %v6725_v26  ;;  %v1577_v26 = vrot.slane %v7556_v10, %v663_v38 }
 0x388   : > { %6496 = vmatprep.subr.bf16.mxu0 %v6726_v45 }
 0x38a   : > { %6481 = vmatpush3.bf16.msra.mxu1 %v6717_v8 }
 0x38b   : > { %6482 = vmatprep.subr.bf16.mxu1 %v6718_v12  ;;  %6497 = vmatpush3.bf16.msra.mxu0 %v6727_v30 }
 0x38c   : > { %6498 = vmatprep.subr.bf16.mxu0 %v6728_v33 }
 0x38e   : > { %6483 = vmatpush3.bf16.msra.mxu1 %v6719_v3 }
 0x38f   : > { %6484 = vmatprep.subr.bf16.mxu1 %v6720_v13  ;;  %6499 = vmatpush3.bf16.msra.mxu0 %v6729_v54 }
 0x390   : > { %6500 = vmatprep.subr.bf16.mxu0 %v6730_v4 }
 0x392   : > { %6485 = vmatpush3.bf16.msra.mxu1 %v6721_v15 }
 0x393   : > { %6501 = vmatpush3.bf16.msra.mxu0 %v6731_v11 }
 0x394   : > { %6502 = vmatprep.subr.bf16.mxu0 %v6732_v55 }
 0x395   : > { %v4614_v32 = vpop.f32.mrf.mxu1 }
 0x396   : > { %v4615_v56 = vadd.f32 %v4614_v32, %v4572_v50 }
 0x397   : > { %v4616_v39 = vpop.f32.mrf.mxu1  ;;  %6503 = vmatpush3.bf16.msra.mxu0 %v6733_v53 }
 0x398   : > { %v4617_v58 = vadd.f32 %v4616_v39, %v4574_v0  ;;  %6504 = vmatprep.subr.bf16.mxu0 %v6734_v6 }
 0x399   : > { %v4618_v44 = vpop.f32.mrf.mxu1 }
 0x39a   : > { %v4619_v5 = vadd.f32 %v4618_v44, %v4576_v57 }
 0x39b   : > { %v4620_v20 = vpop.f32.mrf.mxu1  ;;  %6505 = vmatpush3.bf16.msra.mxu0 %v6735_v14 }
 0x39c   : > { %v4621_v47 = vadd.f32 %v4620_v20, %v4578_v51  ;;  %6506 = vmatprep.subr.bf16.mxu0 %v6736_v31 }
 0x39f   : > { %6507 = vmatpush3.bf16.msra.mxu0 %v6737_v40 }
 0x3a2   : > { %v4657_v52 = vpop.f32.mrf.mxu0 }
 0x3a3   : > { %v4658_v48 = vadd.f32 %v4657_v52, %v4615_v56 }
 0x3a4   : > { %v4659_v18 = vpop.f32.mrf.mxu0 }
 0x3a5   : > { %v4660_v60 = vadd.f32 %v4659_v18, %v4617_v58  ;;  %v4842_v21 = vmax.f32 %v4658_v48, 0.0 }
 0x3a6   : > { %v4661_v62 = vpop.f32.mrf.mxu0 }
 0x3a7   : > { %v4662_v37 = vadd.f32 %v4661_v62, %v4619_v5  ;;  %v4843_v59 = vmax.f32 %v4660_v60, 0.0 }
 0x3a8   : > { %v4663_v28 = vpop.f32.mrf.mxu0 }
 0x3a9   : > { %v4664_v43 = vadd.f32 %v4663_v28, %v4621_v47  ;;  %v4850_v63 = vmax.f32 %v4662_v37, 0.0 }
 0x3ab   : > { %v4851_v1 = vmax.f32 %v4664_v43, 0.0  ;;  %v4858_v42 = vpack.c.bf16 %v4850_v63, %v4842_v21 }
 0x3ad   : > { %v4859_v7 = vpack.c.bf16 %v4851_v1, %v4843_v59 }
 0x3af   : > { %5495 = vmatprep.mubr.bf16.mxu1 %v4859_v7 }
 0x3b0   : > { %5496 = vmatmul.mubr.bf16.vlgmr.msra.gmra.mxu1 %v4858_v42 }
 0x3d5   : > { %v4700_v16 = vpop.f32.mrf.mxu1 }
 0x3d6   : > { %v4701_v36 = vadd.f32 %v4700_v16, %v1577_v26 }
 0x3d7   : > { %v4702_v8 = vpop.f32.mrf.mxu1 }
 0x3d8   : > { %v4703_v45 = vadd.f32 %v4702_v8, %v1581_v23 }
 0x3d9   : > { %v4704_v12 = vpop.f32.mrf.mxu1 }
 0x3da   : > { %v4705_v30 = vadd.f32 %v4704_v12, %v1577_v26 }
 0x3db   : > { %v4706_v34 = vpop.f32.mrf.mxu1 }
 0x3dc   : > { %v4707_v33 = vadd.f32 %v4706_v34, %v1581_v23 }
 0x3e2   : > { %v4743_v3 = vpop.f32.mrf.mxu0 }
 0x3e3   : > { %v4744_v27 = vadd.f32 %v4743_v3, %v4701_v36 }
 0x3e4   : > { %v4745_v13 = vpop.f32.mrf.mxu0 }
 0x3e5   : > { %v4746_v54 = vadd.f32 %v4745_v13, %v4703_v45 }
 0x3e6   : > { %v4747_v2 = vpop.f32.mrf.mxu0 }
 0x3e7   : > { %v4748_v4 = vadd.f32 %v4747_v2, %v4705_v30 }
 0x3e8   : > { %v4749_v24 = vpop.f32.mrf.mxu0 }
 0x3e9   : > { %v4750_v11 = vadd.f32 %v4749_v24, %v4707_v33 }
 0x415   : > { %v4786_v15 = vpop.f32.mrf.mxu1 }
 0x416   : > { %v4787_v35 = vadd.f32 %v4786_v15, %v4744_v27 }
 0x417   : > { %v4788_v19 = vpop.f32.mrf.mxu1 }
 0x418   : > { %v4789_v41 = vadd.f32 %v4788_v19, %v4746_v54 }
 0x419   : > { %v4790_v29 = vpop.f32.mrf.mxu1 }
 0x41a   : > { %v4791_v9 = vadd.f32 %v4790_v29, %v4748_v4 }
 0x41b   : > { %v4792_v39 = vpop.f32.mrf.mxu1 }
 0x41c   : > { %v4793_v44 = vadd.f32 %v4792_v39, %v4750_v11 }
 0x422   : > { %v4829_v32 = vpop.f32.mrf.mxu0 }
 0x423   : > { %v4830_v46 = vadd.f32 %v4829_v32, %v4787_v35 }
 0x424   : > { %v4831_v49 = vpop.f32.mrf.mxu0 }
 0x425   : > { %v4832_v38 = vadd.f32 %v4831_v49, %v4789_v41  ;;  %v4844_v0 = vmax.f32 %v4830_v46, 0.0 }
 0x426   : > { %v4833_v22 = vpop.f32.mrf.mxu0 }
 0x427   : > { %v4834_v10 = vadd.f32 %v4833_v22, %v4791_v9  ;;  %v4845_v55 = vmax.f32 %v4832_v38, 0.0 }
 0x428   : > { %v4835_v61 = vpop.f32.mrf.mxu0 }
 0x429   : > { %v4836_v25 = vadd.f32 %v4835_v61, %v4793_v44  ;;  %v4852_v52 = vmax.f32 %v4834_v10, 0.0 }
 0x42b   : > { %v4853_v17 = vmax.f32 %v4836_v25, 0.0  ;;  %v4860_v53 = vpack.c.bf16 %v4852_v52, %v4844_v0 }
 0x42d   : > { %v4861_v57 = vpack.c.bf16 %v4853_v17, %v4845_v55 }
 0x42f   : > { %5536 = vmatprep.mubr.bf16.mxu0 %v4861_v57 }
 0x430   : > { %5537 = vmatmul.mubr.bf16.vlgmr.msra.gmra.mxu0 %v4860_v53 }
 0x431   : > { %6987 = shalt.err (!%p6984_p4)
}
 0x432   : > { %s6988_s1 = scalar_lea.hbm %s7635_s26, 256  ;;  %s6992_s11 = scalar_lea.hbm %s7724_s9, 512 }
 0x433   : > { %p6989_p9 = scmp.ne.s32.totalorder %s7635_s26, %s6988_s1  ;;  %p6993_p12 = scmp.lt.s32.totalorder %s7635_s26, %s7724_s9 }
 0x434   : > { %p6994_p13 = scmp.lt.s32.totalorder %s6992_s11, %s6988_s1 }
 0x435   : > { %p6990_p1 = pnand %p6989_p9, %p7761_p2 }
 0x436   : > { %p6995_p0 = por %p6994_p13, %p6993_p12 }
 0x437   : > { %p6991_p3 = pneg %p6990_p1 }
 0x439   : > { %p6996_p5 = pnand %p6995_p0, %p6991_p3 }
 0x43b   : > { %6999 = shalt.err (!%p6996_p5)
}
 0x43c   : > { %s7103_s22 = smov 128   ;;  %s7104_s3 = smov 8   ;;  %v6442_v50 = vpop.f32.mrf.mxu1  ;;  %v6340_v60 = vld [vmem:[#allocation16] ss:$0 sm:$0xff] }
 0x43d   : > { %6567 = dma.vmem_to_hbm [thread:$0]  (%p7761_p2), %s7627_s20, 256, %s7635_s26, %s5548_s24, %s7103_s22, %s7103_s22, %s7104_s3  }
 0x43e   : > { %v6443_v20 = vpop.f32.mrf.mxu1  ;;  %s496_s20 = scalar_lea.vmem [#allocation18], %s7355_s4  ;;  %s7671_s1 = scalar_lea.hbm %s7725_s10, %s6414_s29 }
 0x43f   : > { %v6444_v47 = vadd.f32 %v6443_v20, %v6442_v50  ;;  %s5582_s26 = sshll.u32 %s496_s20, 4  ;;  %s5553_s25 = scalar_lea.sflag [#allocation19], %s7352_s27  ;;  %s7664_s26 = int_to_ptr.vmem [resolvable:$true] %s5582_s26 }
 0x440   : > { %v6445_v18 = vpop.f32.mrf.mxu1  ;;  %s7000_s4 = scalar_lea.vmem %s7664_s26, 256  ;;  %s7105_s2 = smov [#allocation18]  }
 0x441   : > { %v5416_v28 = vadd.f32 %v6444_v47, %v6340_v60  ;;  %p7001_p10 = scmp.ne.s32.totalorder %s7664_s26, %s7000_s4  ;;  %s7004_s11 = sshll.u32 %s7105_s2, 4  ;;  %s7005_s11 = int_to_ptr.vmem [resolvable:$false] %s7004_s11 }
 0x442   : > { %v6446_v51 = vpop.f32.mrf.mxu1  ;;  %v6464_v58 = vpop.f32.mrf.mxu0  ;;  %s7006_s17 = scalar_lea.vmem %s7005_s11, 512  ;;  %p7007_p6 = scmp.lt.s32.totalorder %s7664_s26, %s7005_s11 }
 0x443   : > { %v6447_v43 = vadd.f32 %v6446_v51, %v6445_v18  ;;  %p7002_p11 = pnand %p7001_p10, %p7761_p2  ;;  %p7008_p8 = scmp.lt.s32.totalorder %s7006_s17, %s7000_s4 }
 0x444   : > { %v6465_v56 = vpop.f32.mrf.mxu0 }
 0x445   : > { %v6466_v14 = vadd.f32 %v6465_v56, %v6464_v58  ;;  %v5419_v7 = vadd.f32 %v6447_v43, %v6340_v60  ;;  %p7003_p7 = pneg %p7002_p11  ;;  %p7009_p4 = por %p7008_p8, %p7007_p6 }
 0x446   : > { %v6467_v6 = vpop.f32.mrf.mxu0 }
 0x447   : > { %v5457_v1 = vadd.f32 %v6466_v14, %v5416_v28  ;;  %p7010_p9 = pnand %p7009_p4, %p7003_p7 }
 0x448   : > { %v6468_v48 = vpop.f32.mrf.mxu0 }
 0x449   : > { %v6469_v40 = vadd.f32 %v6468_v48, %v6467_v6 }
 0x44b   : > { %v5460_v3 = vadd.f32 %v6469_v40, %v5419_v7 }
 0x470   : > { %v6486_v5 = vpop.f32.mrf.mxu1 }
 0x472   : > { %v6487_v62 = vpop.f32.mrf.mxu1 }
 0x473   : > { %v6488_v63 = vadd.f32 %v6487_v62, %v6486_v5 }
 0x474   : > { %v6489_v37 = vpop.f32.mrf.mxu1 }
 0x475   : > { %v5498_v42 = vadd.f32 %v6488_v63, %v5457_v1 }
 0x476   : > { %v6490_v31 = vpop.f32.mrf.mxu1 }
 0x477   : > { %v6491_v16 = vadd.f32 %v6490_v31, %v6489_v37 }
 0x479   : > { %v5501_v15 = vadd.f32 %v6491_v16, %v5460_v3 }
 0x4f0   : > { %v6508_v59 = vpop.f32.mrf.mxu0 }
 0x4f2   : > { %v6509_v21 = vpop.f32.mrf.mxu0 }
 0x4f3   : > { %v6510_v8 = vadd.f32 %v6509_v21, %v6508_v59 }
 0x4f4   : > { %v6511_v12 = vpop.f32.mrf.mxu0 }
 0x4f5   : > { %v5539_v34 = vadd.f32 %v6510_v8, %v5498_v42 }
 0x4f6   : > { %v6512_v13 = vpop.f32.mrf.mxu0 }
 0x4f7   : > { %5545 = vst [vmem:[%s496_s20] sm:$0xff] %v5539_v34  ;;  %v6513_v2 = vadd.f32 %v6512_v13, %v6511_v12 }
 0x4f9   : > { %v5542_v19 = vadd.f32 %v6513_v2, %v5501_v15 }
 0x4fb   : > { %5546 = vst [vmem:[%s496_s20 + $0x8] sm:$0xff] %v5542_v19 }
 0x4fc   : > { %7013 = shalt.err (!%p7010_p9)
}
 0x4fd   : > { %s7014_s19 = scalar_lea.hbm %s7671_s1, 256  ;;  %s7018_s28 = scalar_lea.hbm %s7725_s10, 512 }
 0x4fe   : > { %p7015_p1 = scmp.ne.s32.totalorder %s7671_s1, %s7014_s19  ;;  %p7019_p13 = scmp.lt.s32.totalorder %s7671_s1, %s7725_s10 }
 0x4ff   : > { %p7020_p0 = scmp.lt.s32.totalorder %s7018_s28, %s7014_s19 }
 0x500   : > { %p7016_p3 = pnand %p7015_p1, %p7761_p2 }
 0x501   : > { %p7021_p5 = por %p7020_p0, %p7019_p13 }
 0x502   : > { %p7017_p12 = pneg %p7016_p3 }
 0x504   : > { %p7022_p10 = pnand %p7021_p5, %p7017_p12 }
 0x506   : > { %7025 = shalt.err (!%p7022_p10)
}
 0x507   : > { %6568 = dma.vmem_to_hbm [thread:$0]  (%p7761_p2), %s7664_s26, 256, %s7671_s1, %s5553_s25, %s7103_s22, %s7103_s22, %s7104_s3  }
 0x508 PF: > { %s5597_s30 = sand.u32 1, %s7072_s13   ;;  %p7762_p11 = scmp.ne.s32.totalorder %s7747_s18, 0 }
 0x509   : > { %p7763_p7 = scmp.ge.s32.totalorder %s7084_s16, 2  ;;  %s5598_s4 = scalar_lea.sflag [#allocation4], %s5597_s30 }
 0x50b   : > { %p6601_p6 = pnand %p7763_p7, %p7762_p11 }
 0x50d   : > { %p6602_p8 = pneg %p6601_p6 }
 0x50f   : > { %7063 = dma.done.wait (%p6602_p8), %s5598_s4, 256  }
 0x510   : > { %7065 = vsyncadd (%p6602_p8), %s5598_s4, 4294967040  ;;  %s5607_s2 = scalar_lea.sflag [#allocation19], %s5597_s30 }
 0x511   : > { %7067 = dma.done.wait (%p6602_p8), %s5607_s2, 256  }
 0x512   : > { %7069 = vsyncadd (%p6602_p8), %s5607_s2, 4294967040  ;;  %p31_p2 = scmp.ge.s32.totalorder %s7277_s23, 4   ;;  %s7764_s13 = smov %s7076_s14 }
 0x513   : > { %s7765_s14 = smov %s7080_s15  ;;  %s7766_s15 = smov %s7288_s21 }
 0x514   : > { %s7767_s16 = smov %s7277_s23  ;;  %33 = sbr.rel (!%p31_p2) target bundleno = 16 (0x10), region = 150 }
 0x519   :  { %5612 = vsyncpa [#allocation3], 1 }
 0x51a   :  { %5614 = vsyncpa [#allocation3 + $0x1], 1 }
 0x51b   :  { %5615 = vsyncpa [#allocation6], 1 }
 0x51c   :  { %5616 = vsyncpa [#allocation9], 1 }
 0x51d   :  { %5617 = vsyncpa [#allocation12], 1 }
 0x51e   :  { %5618 = vsyncpa [#allocation15], 1 }
 0x51f   :  { %5619 = vsyncpa [#allocation4], 1 }
 0x520   :  { %5621 = vsyncpa [#allocation4 + $0x1], 1 }
 0x521   :  { %5622 = vsyncpa [#allocation19], 1 }
 0x522   :  { %5624 = vsyncpa [#allocation19 + $0x1], 1 }

</bundles_post_ra>
